<compile_context>
chip_gen: v7x
topology: tpu7x:2x2x1
jax: 0.10.0
libtpu: 0.0.40
codegen_flags: <defaults>
</compile_context>

<pallas_src>
import functools

import jax
import jax.numpy as jnp
from jax.experimental import pallas as pl
from jax.experimental.pallas import tpu as pltpu


# ----------------------------------------------------------------------------- kernel

def _agent_gat_kernel(x_ref, adj_ref,
                      w1_ref, b1_ref, att1_ref, bias1_ref, bn1s_ref, bn1b_ref,
                      w2_ref, b2_ref, att2_ref, bias2_ref, bn2s_ref, bn2b_ref,
                      w3_ref, b3_ref, att3_ref, bias3_ref, bn3s_ref, bn3b_ref,
                      lnw_ref, lnb_ref,
                      out_ref, *, heads1, c1, heads2, c2, heads3, c3):
    x = x_ref[...]                       # [N, F_in]
    adj = adj_ref[...]                   # [N, N]; adj[i, j] = 1 iff edge j -> i (incl. self loop)
    neg_big = jnp.float32(-1e30)

    def gat_layer(h_in, w_lr, b_lr, att, bias, heads, ch):
        d = heads * ch
        # fused lin_l / lin_r projection: one MXU pass over [F_in, 2*d]
        xlr = jnp.dot(h_in, w_lr, preferred_element_type=jnp.float32) + b_lr   # [N, 2*d]
        xl = xlr[:, :d]                  # source / message features
        xr = xlr[:, d:]                  # target features
        xl_t = xl.T                      # [d, N] -> source features broadcastable along lanes

        outs = []
        for h in range(heads):           # static unrolled loop over heads
            lo = h * ch
            # lane-dense [N_i, N_j] logits accumulation over channels (no 3-D temp)
            logits = jnp.zeros_like(adj)
            for c in range(ch):
                idx = lo + c
                col = xr[:, idx:idx + 1]            # [N, 1]  target feature c
                row = xl_t[idx:idx + 1, :]          # [1, N]  source feature c
                s = col + row                       # [N, N]
                s = jnp.where(s > 0, s, 0.2 * s)    # leaky_relu(0.2)
                logits = logits + att[h:h + 1, c:c + 1] * s

            # masked softmax over incoming edges j of each target i
            logits = jnp.where(adj > 0, logits, neg_big)
            logits = logits - jnp.max(logits, axis=1, keepdims=True)
            p = jnp.exp(logits) * adj
            denom = jnp.sum(p, axis=1, keepdims=True)
            alpha = p * pl.reciprocal(denom, approx=True)   # EUP reciprocal, not VALU divide

            # aggregate source messages (x_l of the source)
            outs.append(jnp.dot(alpha, xl[:, lo:lo + ch],
                                preferred_element_type=jnp.float32))            # [N, C]

        out = outs[0] if heads == 1 else jnp.concatenate(outs, axis=1)          # [N, H*C]
        return out + bias

    def bn_lrelu(h, scale, shift):
        # eval-mode BatchNorm folded to per-feature affine, then leaky_relu(0.2)
        y = h * scale + shift
        return jnp.where(y > 0, y, 0.2 * y)

    # layer 1
    h = gat_layer(x, w1_ref[...], b1_ref[...], att1_ref[...], bias1_ref[...], heads1, c1)
    h = bn_lrelu(h, bn1s_ref[...], bn1b_ref[...])     # dropout: identity (eval mode)
    residual = h

    # middle layer
    h = gat_layer(h, w2_ref[...], b2_ref[...], att2_ref[...], bias2_ref[...], heads2, c2)
    h = bn_lrelu(h, bn2s_ref[...], bn2b_ref[...])
    h = h + residual

    # output layer
    h = gat_layer(h, w3_ref[...], b3_ref[...], att3_ref[...], bias3_ref[...], heads3, c3)
    h = bn_lrelu(h, bn3s_ref[...], bn3b_ref[...])

    # LayerNorm epilogue + single full-width store
    mu = jnp.mean(h, axis=-1, keepdims=True)
    hc = h - mu
    var = jnp.mean(hc * hc, axis=-1, keepdims=True)
    out_ref[...] = hc * jax.lax.rsqrt(var + 1e-5) * lnw_ref[...] + lnb_ref[...]


# ----------------------------------------------------------------------------- wrapper

def _vmem_spec():
    return pl.BlockSpec(memory_space=pltpu.MemorySpace.VMEM)


def edge_index_to_adj(edge_index, num_nodes):
    """Dense mask adj[i, j] = 1 iff edge j -> i; diagonal = 1 (add_self_loops)."""
    src, dst = edge_index[0], edge_index[1]
    adj = jnp.zeros((num_nodes, num_nodes), jnp.float32)
    adj = adj.at[dst, src].set(1.0)
    idx = jnp.arange(num_nodes)
    adj = adj.at[idx, idx].set(1.0)
    return adj


def _fold_bn(bn):
    scale = bn["gamma"] * jax.lax.rsqrt(bn["var"] + 1e-5)
    shift = bn["beta"] - bn["mean"] * scale
    return scale, shift


def _fuse_lr(p):
    w = jnp.concatenate([p["wl"], p["wr"]], axis=1)
    b = jnp.concatenate([p["bl"], p["br"]], axis=1)
    return w, b


def agent_gat_forward(x, edge_index, params, *, hidden_dim, num_heads, embedding_dim):
    n = x.shape[0]
    adj = edge_index_to_adj(edge_index, n)
    hd = hidden_dim * num_heads

    w1, b1 = _fuse_lr(params["conv1"]);    s1, t1 = _fold_bn(params["bn1"])
    w2, b2 = _fuse_lr(params["conv_mid"]); s2, t2 = _fold_bn(params["bn_mid"])
    w3, b3 = _fuse_lr(params["conv2"]);    s3, t3 = _fold_bn(params["bn2"])

    kernel = functools.partial(
        _agent_gat_kernel,
        heads1=num_heads, c1=hidden_dim,
        heads2=1, c2=hd,
        heads3=1, c3=embedding_dim)

    n_inputs = 22
    return pl.pallas_call(
        kernel,
        out_shape=jax.ShapeDtypeStruct((n, embedding_dim), jnp.float32),
        in_specs=[_vmem_spec()] * n_inputs,
        out_specs=_vmem_spec(),
        # actual VMEM footprint is well under 1 MiB at these shapes; set the scoped
        # limit explicitly (safe on v5e/v6e/v7x) instead of relying on defaults.
        compiler_params=pltpu.CompilerParams(vmem_limit_bytes=16 * 1024 * 1024),
    )(x, adj,
      w1, b1, params["conv1"]["att"], params["conv1"]["bias"], s1, t1,
      w2, b2, params["conv_mid"]["att"], params["conv_mid"]["bias"], s2, t2,
      w3, b3, params["conv2"]["att"], params["conv2"]["bias"], s3, t3,
      params["ln"]["w"], params["ln"]["b"])


# ----------------------------------------------------------------------------- param init

def _glorot(key, shape):
    limit = (6.0 / (shape[0] + shape[1])) ** 0.5
    return jax.random.uniform(key, shape, jnp.float32, -limit, limit)


def init_gat_layer(key, in_dim, out_ch, heads):
    ks = jax.random.split(key, 6)
    d = heads * out_ch
    return {
        "wl": _glorot(ks[0], (in_dim, d)),
        "bl": 0.05 * jax.random.normal(ks[1], (1, d), jnp.float32),
        "wr": _glorot(ks[2], (in_dim, d)),
        "br": 0.05 * jax.random.normal(ks[3], (1, d), jnp.float32),
        "att": _glorot(ks[4], (heads, out_ch)),
        "bias": 0.05 * jax.random.normal(ks[5], (1, d), jnp.float32),
    }


def init_bn(key, dim):
    ks = jax.random.split(key, 4)
    return {
        "gamma": 1.0 + 0.1 * jax.random.normal(ks[0], (1, dim), jnp.float32),
        "beta": 0.1 * jax.random.normal(ks[1], (1, dim), jnp.float32),
        "mean": 0.1 * jax.random.normal(ks[2], (1, dim), jnp.float32),
        "var": 1.0 + 0.1 * jnp.abs(jax.random.normal(ks[3], (1, dim), jnp.float32)),
    }


def init_ln(key, dim):
    ks = jax.random.split(key, 2)
    return {
        "w": 1.0 + 0.1 * jax.random.normal(ks[0], (1, dim), jnp.float32),
        "b": 0.1 * jax.random.normal(ks[1], (1, dim), jnp.float32),
    }


def init_agent_gat(key, in_dim, hidden_dim, embedding_dim, num_heads):
    ks = jax.random.split(key, 7)
    hd = hidden_dim * num_heads
    return {
        "conv1": init_gat_layer(ks[0], in_dim, hidden_dim, num_heads),
        "bn1": init_bn(ks[1], hd),
        "conv_mid": init_gat_layer(ks[2], hd, hd, 1),
        "bn_mid": init_bn(ks[3], hd),
        "conv2": init_gat_layer(ks[4], hd, embedding_dim, 1),
        "bn2": init_bn(ks[5], embedding_dim),
        "ln": init_ln(ks[6], embedding_dim),
    }


# ----------------------------------------------------------------------------- main

if __name__ == "__main__":
    in_dim, hidden_dim, embedding_dim, num_heads = 16, 8, 32, 4
    num_nodes = 8

    key = jax.random.PRNGKey(0)
    k_x, k_p = jax.random.split(key)

    x = jax.random.normal(k_x, (num_nodes, in_dim), jnp.float32)

    # deterministic ring graph (both directions), E = 16 edges
    src = jnp.concatenate([jnp.arange(num_nodes), (jnp.arange(num_nodes) + 1) % num_nodes])
    dst = jnp.concatenate([(jnp.arange(num_nodes) + 1) % num_nodes, jnp.arange(num_nodes)])
    edge_index = jnp.stack([src, dst]).astype(jnp.int32)  # [2, 16]

    params = init_agent_gat(k_p, in_dim, hidden_dim, embedding_dim, num_heads)

    fwd = jax.jit(functools.partial(agent_gat_forward,
                                    hidden_dim=hidden_dim,
                                    num_heads=num_heads,
                                    embedding_dim=embedding_dim))
    out = fwd(x, edge_index, params)
    jax.block_until_ready(out)

    assert out.shape == (num_nodes, embedding_dim)
    assert bool(jnp.all(jnp.isfinite(out)))
    print("KERNEL_OK")
</pallas_src>

<mosaic_0001>
module attributes {stable_mosaic.version = 11 : i64} {
  func.func @_agent_gat_kernel(%arg0: memref<8x16xf32, #tpu.memory_space<vmem>>, %arg1: memref<8x8xf32, #tpu.memory_space<vmem>>, %arg2: memref<16x64xf32, #tpu.memory_space<vmem>>, %arg3: memref<1x64xf32, #tpu.memory_space<vmem>>, %arg4: memref<4x8xf32, #tpu.memory_space<vmem>>, %arg5: memref<1x32xf32, #tpu.memory_space<vmem>>, %arg6: memref<1x32xf32, #tpu.memory_space<vmem>>, %arg7: memref<1x32xf32, #tpu.memory_space<vmem>>, %arg8: memref<32x64xf32, #tpu.memory_space<vmem>>, %arg9: memref<1x64xf32, #tpu.memory_space<vmem>>, %arg10: memref<1x32xf32, #tpu.memory_space<vmem>>, %arg11: memref<1x32xf32, #tpu.memory_space<vmem>>, %arg12: memref<1x32xf32, #tpu.memory_space<vmem>>, %arg13: memref<1x32xf32, #tpu.memory_space<vmem>>, %arg14: memref<32x64xf32, #tpu.memory_space<vmem>>, %arg15: memref<1x64xf32, #tpu.memory_space<vmem>>, %arg16: memref<1x32xf32, #tpu.memory_space<vmem>>, %arg17: memref<1x32xf32, #tpu.memory_space<vmem>>, %arg18: memref<1x32xf32, #tpu.memory_space<vmem>>, %arg19: memref<1x32xf32, #tpu.memory_space<vmem>>, %arg20: memref<1x32xf32, #tpu.memory_space<vmem>>, %arg21: memref<1x32xf32, #tpu.memory_space<vmem>>, %arg22: memref<8x32xf32, #tpu.memory_space<vmem>>) attributes {dimension_semantics = [], scalar_prefetch = 0 : i64, scratch_operands = 0 : i64, tpu.core_type = #tpu.core_type<tc>} {
    %c0 = arith.constant 0 : index
    %c0_0 = arith.constant 0 : index
    %0 = vector.load %arg0[%c0, %c0_0] : memref<8x16xf32, #tpu.memory_space<vmem>>, vector<8x16xf32>
    %c0_1 = arith.constant 0 : index
    %c0_2 = arith.constant 0 : index
    %1 = vector.load %arg1[%c0_1, %c0_2] : memref<8x8xf32, #tpu.memory_space<vmem>>, vector<8x8xf32>
    %c0_3 = arith.constant 0 : index
    %c0_4 = arith.constant 0 : index
    %2 = vector.load %arg2[%c0_3, %c0_4] : memref<16x64xf32, #tpu.memory_space<vmem>>, vector<16x64xf32>
    %c0_5 = arith.constant 0 : index
    %c0_6 = arith.constant 0 : index
    %3 = vector.load %arg3[%c0_5, %c0_6] : memref<1x64xf32, #tpu.memory_space<vmem>>, vector<1x64xf32>
    %c0_7 = arith.constant 0 : index
    %c0_8 = arith.constant 0 : index
    %4 = vector.load %arg4[%c0_7, %c0_8] : memref<4x8xf32, #tpu.memory_space<vmem>>, vector<4x8xf32>
    %c0_9 = arith.constant 0 : index
    %c0_10 = arith.constant 0 : index
    %5 = vector.load %arg5[%c0_9, %c0_10] : memref<1x32xf32, #tpu.memory_space<vmem>>, vector<1x32xf32>
    %cst = arith.constant dense<0.000000e+00> : vector<8x64xf32>
    %6 = tpu.matmul %0, %2, %cst {dimension_numbers = #tpu.dot_dimension_numbers<[1], [0], [0], [1], [0, 0, 1, 1], [], []>} : vector<8x16xf32>, vector<16x64xf32>, vector<8x64xf32> -> vector<8x64xf32>
    %7 = vector.broadcast %3 : vector<1x64xf32> to vector<8x64xf32>
    %8 = arith.addf %6, %7 : vector<8x64xf32>
    %9 = vector.extract_strided_slice %8 {offsets = [0, 0], sizes = [8, 32], strides = [1, 1]} : vector<8x64xf32> to vector<8x32xf32>
    %10 = vector.extract_strided_slice %8 {offsets = [0, 32], sizes = [8, 32], strides = [1, 1]} : vector<8x64xf32> to vector<8x32xf32>
    %11 = tpu.transpose %9, [1, 0] : vector<8x32xf32> -> vector<32x8xf32>
    %cst_11 = arith.constant 0.000000e+00 : f32
    %12 = vector.broadcast %cst_11 : f32 to vector<8x8xf32>
    %13 = vector.extract_strided_slice %10 {offsets = [0, 0], sizes = [8, 1], strides = [1, 1]} : vector<8x32xf32> to vector<8x1xf32>
    %14 = vector.extract_strided_slice %11 {offsets = [0, 0], sizes = [1, 8], strides = [1, 1]} : vector<32x8xf32> to vector<1x8xf32>
    %15 = vector.broadcast %13 : vector<8x1xf32> to vector<8x8xf32>
    %16 = vector.broadcast %14 : vector<1x8xf32> to vector<8x8xf32>
    %17 = arith.addf %15, %16 : vector<8x8xf32>
    %cst_12 = arith.constant 0.000000e+00 : f32
    %18 = vector.broadcast %cst_12 : f32 to vector<8x8xf32>
    %19 = arith.cmpf ogt, %17, %18 : vector<8x8xf32>
    %cst_13 = arith.constant 2.000000e-01 : f32
    %20 = vector.broadcast %cst_13 : f32 to vector<8x8xf32>
    %21 = arith.mulf %20, %17 : vector<8x8xf32>
    %22 = arith.select %19, %17, %21 : vector<8x8xi1>, vector<8x8xf32>
    %23 = vector.extract_strided_slice %4 {offsets = [0, 0], sizes = [1, 1], strides = [1, 1]} : vector<4x8xf32> to vector<1x1xf32>
    %24 = vector.broadcast %23 : vector<1x1xf32> to vector<8x8xf32>
    %25 = arith.mulf %24, %22 : vector<8x8xf32>
    %26 = arith.addf %12, %25 : vector<8x8xf32>
    %27 = vector.extract_strided_slice %10 {offsets = [0, 1], sizes = [8, 1], strides = [1, 1]} : vector<8x32xf32> to vector<8x1xf32>
    %28 = vector.extract_strided_slice %11 {offsets = [1, 0], sizes = [1, 8], strides = [1, 1]} : vector<32x8xf32> to vector<1x8xf32>
    %29 = vector.broadcast %27 : vector<8x1xf32> to vector<8x8xf32>
    %30 = vector.broadcast %28 : vector<1x8xf32> to vector<8x8xf32>
    %31 = arith.addf %29, %30 : vector<8x8xf32>
    %cst_14 = arith.constant 0.000000e+00 : f32
    %32 = vector.broadcast %cst_14 : f32 to vector<8x8xf32>
    %33 = arith.cmpf ogt, %31, %32 : vector<8x8xf32>
    %cst_15 = arith.constant 2.000000e-01 : f32
    %34 = vector.broadcast %cst_15 : f32 to vector<8x8xf32>
    %35 = arith.mulf %34, %31 : vector<8x8xf32>
    %36 = arith.select %33, %31, %35 : vector<8x8xi1>, vector<8x8xf32>
    %37 = vector.extract_strided_slice %4 {offsets = [0, 1], sizes = [1, 1], strides = [1, 1]} : vector<4x8xf32> to vector<1x1xf32>
    %38 = vector.broadcast %37 : vector<1x1xf32> to vector<8x8xf32>
    %39 = arith.mulf %38, %36 : vector<8x8xf32>
    %40 = arith.addf %26, %39 : vector<8x8xf32>
    %41 = vector.extract_strided_slice %10 {offsets = [0, 2], sizes = [8, 1], strides = [1, 1]} : vector<8x32xf32> to vector<8x1xf32>
    %42 = vector.extract_strided_slice %11 {offsets = [2, 0], sizes = [1, 8], strides = [1, 1]} : vector<32x8xf32> to vector<1x8xf32>
    %43 = vector.broadcast %41 : vector<8x1xf32> to vector<8x8xf32>
    %44 = vector.broadcast %42 : vector<1x8xf32> to vector<8x8xf32>
    %45 = arith.addf %43, %44 : vector<8x8xf32>
    %cst_16 = arith.constant 0.000000e+00 : f32
    %46 = vector.broadcast %cst_16 : f32 to vector<8x8xf32>
    %47 = arith.cmpf ogt, %45, %46 : vector<8x8xf32>
    %cst_17 = arith.constant 2.000000e-01 : f32
    %48 = vector.broadcast %cst_17 : f32 to vector<8x8xf32>
    %49 = arith.mulf %48, %45 : vector<8x8xf32>
    %50 = arith.select %47, %45, %49 : vector<8x8xi1>, vector<8x8xf32>
    %51 = vector.extract_strided_slice %4 {offsets = [0, 2], sizes = [1, 1], strides = [1, 1]} : vector<4x8xf32> to vector<1x1xf32>
    %52 = vector.broadcast %51 : vector<1x1xf32> to vector<8x8xf32>
    %53 = arith.mulf %52, %50 : vector<8x8xf32>
    %54 = arith.addf %40, %53 : vector<8x8xf32>
    %55 = vector.extract_strided_slice %10 {offsets = [0, 3], sizes = [8, 1], strides = [1, 1]} : vector<8x32xf32> to vector<8x1xf32>
    %56 = vector.extract_strided_slice %11 {offsets = [3, 0], sizes = [1, 8], strides = [1, 1]} : vector<32x8xf32> to vector<1x8xf32>
    %57 = vector.broadcast %55 : vector<8x1xf32> to vector<8x8xf32>
    %58 = vector.broadcast %56 : vector<1x8xf32> to vector<8x8xf32>
    %59 = arith.addf %57, %58 : vector<8x8xf32>
    %cst_18 = arith.constant 0.000000e+00 : f32
    %60 = vector.broadcast %cst_18 : f32 to vector<8x8xf32>
    %61 = arith.cmpf ogt, %59, %60 : vector<8x8xf32>
    %cst_19 = arith.constant 2.000000e-01 : f32
    %62 = vector.broadcast %cst_19 : f32 to vector<8x8xf32>
    %63 = arith.mulf %62, %59 : vector<8x8xf32>
    %64 = arith.select %61, %59, %63 : vector<8x8xi1>, vector<8x8xf32>
    %65 = vector.extract_strided_slice %4 {offsets = [0, 3], sizes = [1, 1], strides = [1, 1]} : vector<4x8xf32> to vector<1x1xf32>
    %66 = vector.broadcast %65 : vector<1x1xf32> to vector<8x8xf32>
    %67 = arith.mulf %66, %64 : vector<8x8xf32>
    %68 = arith.addf %54, %67 : vector<8x8xf32>
    %69 = vector.extract_strided_slice %10 {offsets = [0, 4], sizes = [8, 1], strides = [1, 1]} : vector<8x32xf32> to vector<8x1xf32>
    %70 = vector.extract_strided_slice %11 {offsets = [4, 0], sizes = [1, 8], strides = [1, 1]} : vector<32x8xf32> to vector<1x8xf32>
    %71 = vector.broadcast %69 : vector<8x1xf32> to vector<8x8xf32>
    %72 = vector.broadcast %70 : vector<1x8xf32> to vector<8x8xf32>
    %73 = arith.addf %71, %72 : vector<8x8xf32>
    %cst_20 = arith.constant 0.000000e+00 : f32
    %74 = vector.broadcast %cst_20 : f32 to vector<8x8xf32>
    %75 = arith.cmpf ogt, %73, %74 : vector<8x8xf32>
    %cst_21 = arith.constant 2.000000e-01 : f32
    %76 = vector.broadcast %cst_21 : f32 to vector<8x8xf32>
    %77 = arith.mulf %76, %73 : vector<8x8xf32>
    %78 = arith.select %75, %73, %77 : vector<8x8xi1>, vector<8x8xf32>
    %79 = vector.extract_strided_slice %4 {offsets = [0, 4], sizes = [1, 1], strides = [1, 1]} : vector<4x8xf32> to vector<1x1xf32>
    %80 = vector.broadcast %79 : vector<1x1xf32> to vector<8x8xf32>
    %81 = arith.mulf %80, %78 : vector<8x8xf32>
    %82 = arith.addf %68, %81 : vector<8x8xf32>
    %83 = vector.extract_strided_slice %10 {offsets = [0, 5], sizes = [8, 1], strides = [1, 1]} : vector<8x32xf32> to vector<8x1xf32>
    %84 = vector.extract_strided_slice %11 {offsets = [5, 0], sizes = [1, 8], strides = [1, 1]} : vector<32x8xf32> to vector<1x8xf32>
    %85 = vector.broadcast %83 : vector<8x1xf32> to vector<8x8xf32>
    %86 = vector.broadcast %84 : vector<1x8xf32> to vector<8x8xf32>
    %87 = arith.addf %85, %86 : vector<8x8xf32>
    %cst_22 = arith.constant 0.000000e+00 : f32
    %88 = vector.broadcast %cst_22 : f32 to vector<8x8xf32>
    %89 = arith.cmpf ogt, %87, %88 : vector<8x8xf32>
    %cst_23 = arith.constant 2.000000e-01 : f32
    %90 = vector.broadcast %cst_23 : f32 to vector<8x8xf32>
    %91 = arith.mulf %90, %87 : vector<8x8xf32>
    %92 = arith.select %89, %87, %91 : vector<8x8xi1>, vector<8x8xf32>
    %93 = vector.extract_strided_slice %4 {offsets = [0, 5], sizes = [1, 1], strides = [1, 1]} : vector<4x8xf32> to vector<1x1xf32>
    %94 = vector.broadcast %93 : vector<1x1xf32> to vector<8x8xf32>
    %95 = arith.mulf %94, %92 : vector<8x8xf32>
    %96 = arith.addf %82, %95 : vector<8x8xf32>
    %97 = vector.extract_strided_slice %10 {offsets = [0, 6], sizes = [8, 1], strides = [1, 1]} : vector<8x32xf32> to vector<8x1xf32>
    %98 = vector.extract_strided_slice %11 {offsets = [6, 0], sizes = [1, 8], strides = [1, 1]} : vector<32x8xf32> to vector<1x8xf32>
    %99 = vector.broadcast %97 : vector<8x1xf32> to vector<8x8xf32>
    %100 = vector.broadcast %98 : vector<1x8xf32> to vector<8x8xf32>
    %101 = arith.addf %99, %100 : vector<8x8xf32>
    %cst_24 = arith.constant 0.000000e+00 : f32
    %102 = vector.broadcast %cst_24 : f32 to vector<8x8xf32>
    %103 = arith.cmpf ogt, %101, %102 : vector<8x8xf32>
    %cst_25 = arith.constant 2.000000e-01 : f32
    %104 = vector.broadcast %cst_25 : f32 to vector<8x8xf32>
    %105 = arith.mulf %104, %101 : vector<8x8xf32>
    %106 = arith.select %103, %101, %105 : vector<8x8xi1>, vector<8x8xf32>
    %107 = vector.extract_strided_slice %4 {offsets = [0, 6], sizes = [1, 1], strides = [1, 1]} : vector<4x8xf32> to vector<1x1xf32>
    %108 = vector.broadcast %107 : vector<1x1xf32> to vector<8x8xf32>
    %109 = arith.mulf %108, %106 : vector<8x8xf32>
    %110 = arith.addf %96, %109 : vector<8x8xf32>
    %111 = vector.extract_strided_slice %10 {offsets = [0, 7], sizes = [8, 1], strides = [1, 1]} : vector<8x32xf32> to vector<8x1xf32>
    %112 = vector.extract_strided_slice %11 {offsets = [7, 0], sizes = [1, 8], strides = [1, 1]} : vector<32x8xf32> to vector<1x8xf32>
    %113 = vector.broadcast %111 : vector<8x1xf32> to vector<8x8xf32>
    %114 = vector.broadcast %112 : vector<1x8xf32> to vector<8x8xf32>
    %115 = arith.addf %113, %114 : vector<8x8xf32>
    %cst_26 = arith.constant 0.000000e+00 : f32
    %116 = vector.broadcast %cst_26 : f32 to vector<8x8xf32>
    %117 = arith.cmpf ogt, %115, %116 : vector<8x8xf32>
    %cst_27 = arith.constant 2.000000e-01 : f32
    %118 = vector.broadcast %cst_27 : f32 to vector<8x8xf32>
    %119 = arith.mulf %118, %115 : vector<8x8xf32>
    %120 = arith.select %117, %115, %119 : vector<8x8xi1>, vector<8x8xf32>
    %121 = vector.extract_strided_slice %4 {offsets = [0, 7], sizes = [1, 1], strides = [1, 1]} : vector<4x8xf32> to vector<1x1xf32>
    %122 = vector.broadcast %121 : vector<1x1xf32> to vector<8x8xf32>
    %123 = arith.mulf %122, %120 : vector<8x8xf32>
    %124 = arith.addf %110, %123 : vector<8x8xf32>
    %cst_28 = arith.constant 0.000000e+00 : f32
    %125 = vector.broadcast %cst_28 : f32 to vector<8x8xf32>
    %126 = arith.cmpf ogt, %1, %125 : vector<8x8xf32>
    %cst_29 = arith.constant -1.000000e+30 : f32
    %127 = vector.broadcast %cst_29 : f32 to vector<8x8xf32>
    %128 = arith.select %126, %124, %127 : vector<8x8xi1>, vector<8x8xf32>
    %cst_30 = arith.constant dense<0xFF800000> : vector<8xf32>
    %129 = vector.multi_reduction <maximumf>, %128, %cst_30 [1] : vector<8x8xf32> to vector<8xf32>
    %130 = vector.shape_cast %129 : vector<8xf32> to vector<8x1xf32>
    %131 = vector.broadcast %130 : vector<8x1xf32> to vector<8x8xf32>
    %132 = arith.subf %128, %131 : vector<8x8xf32>
    %133 = math.exp %132 : vector<8x8xf32>
    %134 = arith.mulf %133, %1 : vector<8x8xf32>
    %cst_31 = arith.constant dense<0.000000e+00> : vector<8xf32>
    %135 = vector.multi_reduction <add>, %134, %cst_31 [1] : vector<8x8xf32> to vector<8xf32>
    %136 = vector.shape_cast %135 : vector<8xf32> to vector<8x1xf32>
    %137 = tpu.reciprocal %136 {approx = true} : vector<8x1xf32> -> vector<8x1xf32>
    %138 = vector.broadcast %137 : vector<8x1xf32> to vector<8x8xf32>
    %139 = arith.mulf %134, %138 : vector<8x8xf32>
    %140 = vector.extract_strided_slice %9 {offsets = [0, 0], sizes = [8, 8], strides = [1, 1]} : vector<8x32xf32> to vector<8x8xf32>
    %cst_32 = arith.constant dense<0.000000e+00> : vector<8x8xf32>
    %141 = tpu.matmul %139, %140, %cst_32 {dimension_numbers = #tpu.dot_dimension_numbers<[1], [0], [0], [1], [0, 0, 1, 1], [], []>} : vector<8x8xf32>, vector<8x8xf32>, vector<8x8xf32> -> vector<8x8xf32>
    %cst_33 = arith.constant 0.000000e+00 : f32
    %142 = vector.broadcast %cst_33 : f32 to vector<8x8xf32>
    %143 = vector.extract_strided_slice %10 {offsets = [0, 8], sizes = [8, 1], strides = [1, 1]} : vector<8x32xf32> to vector<8x1xf32>
    %144 = vector.extract_strided_slice %11 {offsets = [8, 0], sizes = [1, 8], strides = [1, 1]} : vector<32x8xf32> to vector<1x8xf32>
    %145 = vector.broadcast %143 : vector<8x1xf32> to vector<8x8xf32>
    %146 = vector.broadcast %144 : vector<1x8xf32> to vector<8x8xf32>
    %147 = arith.addf %145, %146 : vector<8x8xf32>
    %cst_34 = arith.constant 0.000000e+00 : f32
    %148 = vector.broadcast %cst_34 : f32 to vector<8x8xf32>
    %149 = arith.cmpf ogt, %147, %148 : vector<8x8xf32>
    %cst_35 = arith.constant 2.000000e-01 : f32
    %150 = vector.broadcast %cst_35 : f32 to vector<8x8xf32>
    %151 = arith.mulf %150, %147 : vector<8x8xf32>
    %152 = arith.select %149, %147, %151 : vector<8x8xi1>, vector<8x8xf32>
    %153 = vector.extract_strided_slice %4 {offsets = [1, 0], sizes = [1, 1], strides = [1, 1]} : vector<4x8xf32> to vector<1x1xf32>
    %154 = vector.broadcast %153 : vector<1x1xf32> to vector<8x8xf32>
    %155 = arith.mulf %154, %152 : vector<8x8xf32>
    %156 = arith.addf %142, %155 : vector<8x8xf32>
    %157 = vector.extract_strided_slice %10 {offsets = [0, 9], sizes = [8, 1], strides = [1, 1]} : vector<8x32xf32> to vector<8x1xf32>
    %158 = vector.extract_strided_slice %11 {offsets = [9, 0], sizes = [1, 8], strides = [1, 1]} : vector<32x8xf32> to vector<1x8xf32>
    %159 = vector.broadcast %157 : vector<8x1xf32> to vector<8x8xf32>
    %160 = vector.broadcast %158 : vector<1x8xf32> to vector<8x8xf32>
    %161 = arith.addf %159, %160 : vector<8x8xf32>
    %cst_36 = arith.constant 0.000000e+00 : f32
    %162 = vector.broadcast %cst_36 : f32 to vector<8x8xf32>
    %163 = arith.cmpf ogt, %161, %162 : vector<8x8xf32>
    %cst_37 = arith.constant 2.000000e-01 : f32
    %164 = vector.broadcast %cst_37 : f32 to vector<8x8xf32>
    %165 = arith.mulf %164, %161 : vector<8x8xf32>
    %166 = arith.select %163, %161, %165 : vector<8x8xi1>, vector<8x8xf32>
    %167 = vector.extract_strided_slice %4 {offsets = [1, 1], sizes = [1, 1], strides = [1, 1]} : vector<4x8xf32> to vector<1x1xf32>
    %168 = vector.broadcast %167 : vector<1x1xf32> to vector<8x8xf32>
    %169 = arith.mulf %168, %166 : vector<8x8xf32>
    %170 = arith.addf %156, %169 : vector<8x8xf32>
    %171 = vector.extract_strided_slice %10 {offsets = [0, 10], sizes = [8, 1], strides = [1, 1]} : vector<8x32xf32> to vector<8x1xf32>
    %172 = vector.extract_strided_slice %11 {offsets = [10, 0], sizes = [1, 8], strides = [1, 1]} : vector<32x8xf32> to vector<1x8xf32>
    %173 = vector.broadcast %171 : vector<8x1xf32> to vector<8x8xf32>
    %174 = vector.broadcast %172 : vector<1x8xf32> to vector<8x8xf32>
    %175 = arith.addf %173, %174 : vector<8x8xf32>
    %cst_38 = arith.constant 0.000000e+00 : f32
    %176 = vector.broadcast %cst_38 : f32 to vector<8x8xf32>
    %177 = arith.cmpf ogt, %175, %176 : vector<8x8xf32>
    %cst_39 = arith.constant 2.000000e-01 : f32
    %178 = vector.broadcast %cst_39 : f32 to vector<8x8xf32>
    %179 = arith.mulf %178, %175 : vector<8x8xf32>
    %180 = arith.select %177, %175, %179 : vector<8x8xi1>, vector<8x8xf32>
    %181 = vector.extract_strided_slice %4 {offsets = [1, 2], sizes = [1, 1], strides = [1, 1]} : vector<4x8xf32> to vector<1x1xf32>
    %182 = vector.broadcast %181 : vector<1x1xf32> to vector<8x8xf32>
    %183 = arith.mulf %182, %180 : vector<8x8xf32>
    %184 = arith.addf %170, %183 : vector<8x8xf32>
    %185 = vector.extract_strided_slice %10 {offsets = [0, 11], sizes = [8, 1], strides = [1, 1]} : vector<8x32xf32> to vector<8x1xf32>
    %186 = vector.extract_strided_slice %11 {offsets = [11, 0], sizes = [1, 8], strides = [1, 1]} : vector<32x8xf32> to vector<1x8xf32>
    %187 = vector.broadcast %185 : vector<8x1xf32> to vector<8x8xf32>
    %188 = vector.broadcast %186 : vector<1x8xf32> to vector<8x8xf32>
    %189 = arith.addf %187, %188 : vector<8x8xf32>
    %cst_40 = arith.constant 0.000000e+00 : f32
    %190 = vector.broadcast %cst_40 : f32 to vector<8x8xf32>
    %191 = arith.cmpf ogt, %189, %190 : vector<8x8xf32>
    %cst_41 = arith.constant 2.000000e-01 : f32
    %192 = vector.broadcast %cst_41 : f32 to vector<8x8xf32>
    %193 = arith.mulf %192, %189 : vector<8x8xf32>
    %194 = arith.select %191, %189, %193 : vector<8x8xi1>, vector<8x8xf32>
    %195 = vector.extract_strided_slice %4 {offsets = [1, 3], sizes = [1, 1], strides = [1, 1]} : vector<4x8xf32> to vector<1x1xf32>
    %196 = vector.broadcast %195 : vector<1x1xf32> to vector<8x8xf32>
    %197 = arith.mulf %196, %194 : vector<8x8xf32>
    %198 = arith.addf %184, %197 : vector<8x8xf32>
    %199 = vector.extract_strided_slice %10 {offsets = [0, 12], sizes = [8, 1], strides = [1, 1]} : vector<8x32xf32> to vector<8x1xf32>
    %200 = vector.extract_strided_slice %11 {offsets = [12, 0], sizes = [1, 8], strides = [1, 1]} : vector<32x8xf32> to vector<1x8xf32>
    %201 = vector.broadcast %199 : vector<8x1xf32> to vector<8x8xf32>
    %202 = vector.broadcast %200 : vector<1x8xf32> to vector<8x8xf32>
    %203 = arith.addf %201, %202 : vector<8x8xf32>
    %cst_42 = arith.constant 0.000000e+00 : f32
    %204 = vector.broadcast %cst_42 : f32 to vector<8x8xf32>
    %205 = arith.cmpf ogt, %203, %204 : vector<8x8xf32>
    %cst_43 = arith.constant 2.000000e-01 : f32
    %206 = vector.broadcast %cst_43 : f32 to vector<8x8xf32>
    %207 = arith.mulf %206, %203 : vector<8x8xf32>
    %208 = arith.select %205, %203, %207 : vector<8x8xi1>, vector<8x8xf32>
    %209 = vector.extract_strided_slice %4 {offsets = [1, 4], sizes = [1, 1], strides = [1, 1]} : vector<4x8xf32> to vector<1x1xf32>
    %210 = vector.broadcast %209 : vector<1x1xf32> to vector<8x8xf32>
    %211 = arith.mulf %210, %208 : vector<8x8xf32>
    %212 = arith.addf %198, %211 : vector<8x8xf32>
    %213 = vector.extract_strided_slice %10 {offsets = [0, 13], sizes = [8, 1], strides = [1, 1]} : vector<8x32xf32> to vector<8x1xf32>
    %214 = vector.extract_strided_slice %11 {offsets = [13, 0], sizes = [1, 8], strides = [1, 1]} : vector<32x8xf32> to vector<1x8xf32>
    %215 = vector.broadcast %213 : vector<8x1xf32> to vector<8x8xf32>
    %216 = vector.broadcast %214 : vector<1x8xf32> to vector<8x8xf32>
    %217 = arith.addf %215, %216 : vector<8x8xf32>
    %cst_44 = arith.constant 0.000000e+00 : f32
    %218 = vector.broadcast %cst_44 : f32 to vector<8x8xf32>
    %219 = arith.cmpf ogt, %217, %218 : vector<8x8xf32>
    %cst_45 = arith.constant 2.000000e-01 : f32
    %220 = vector.broadcast %cst_45 : f32 to vector<8x8xf32>
    %221 = arith.mulf %220, %217 : vector<8x8xf32>
    %222 = arith.select %219, %217, %221 : vector<8x8xi1>, vector<8x8xf32>
    %223 = vector.extract_strided_slice %4 {offsets = [1, 5], sizes = [1, 1], strides = [1, 1]} : vector<4x8xf32> to vector<1x1xf32>
    %224 = vector.broadcast %223 : vector<1x1xf32> to vector<8x8xf32>
    %225 = arith.mulf %224, %222 : vector<8x8xf32>
    %226 = arith.addf %212, %225 : vector<8x8xf32>
    %227 = vector.extract_strided_slice %10 {offsets = [0, 14], sizes = [8, 1], strides = [1, 1]} : vector<8x32xf32> to vector<8x1xf32>
    %228 = vector.extract_strided_slice %11 {offsets = [14, 0], sizes = [1, 8], strides = [1, 1]} : vector<32x8xf32> to vector<1x8xf32>
    %229 = vector.broadcast %227 : vector<8x1xf32> to vector<8x8xf32>
    %230 = vector.broadcast %228 : vector<1x8xf32> to vector<8x8xf32>
    %231 = arith.addf %229, %230 : vector<8x8xf32>
    %cst_46 = arith.constant 0.000000e+00 : f32
    %232 = vector.broadcast %cst_46 : f32 to vector<8x8xf32>
    %233 = arith.cmpf ogt, %231, %232 : vector<8x8xf32>
    %cst_47 = arith.constant 2.000000e-01 : f32
    %234 = vector.broadcast %cst_47 : f32 to vector<8x8xf32>
    %235 = arith.mulf %234, %231 : vector<8x8xf32>
    %236 = arith.select %233, %231, %235 : vector<8x8xi1>, vector<8x8xf32>
    %237 = vector.extract_strided_slice %4 {offsets = [1, 6], sizes = [1, 1], strides = [1, 1]} : vector<4x8xf32> to vector<1x1xf32>
    %238 = vector.broadcast %237 : vector<1x1xf32> to vector<8x8xf32>
    %239 = arith.mulf %238, %236 : vector<8x8xf32>
    %240 = arith.addf %226, %239 : vector<8x8xf32>
    %241 = vector.extract_strided_slice %10 {offsets = [0, 15], sizes = [8, 1], strides = [1, 1]} : vector<8x32xf32> to vector<8x1xf32>
    %242 = vector.extract_strided_slice %11 {offsets = [15, 0], sizes = [1, 8], strides = [1, 1]} : vector<32x8xf32> to vector<1x8xf32>
    %243 = vector.broadcast %241 : vector<8x1xf32> to vector<8x8xf32>
    %244 = vector.broadcast %242 : vector<1x8xf32> to vector<8x8xf32>
    %245 = arith.addf %243, %244 : vector<8x8xf32>
    %cst_48 = arith.constant 0.000000e+00 : f32
    %246 = vector.broadcast %cst_48 : f32 to vector<8x8xf32>
    %247 = arith.cmpf ogt, %245, %246 : vector<8x8xf32>
    %cst_49 = arith.constant 2.000000e-01 : f32
    %248 = vector.broadcast %cst_49 : f32 to vector<8x8xf32>
    %249 = arith.mulf %248, %245 : vector<8x8xf32>
    %250 = arith.select %247, %245, %249 : vector<8x8xi1>, vector<8x8xf32>
    %251 = vector.extract_strided_slice %4 {offsets = [1, 7], sizes = [1, 1], strides = [1, 1]} : vector<4x8xf32> to vector<1x1xf32>
    %252 = vector.broadcast %251 : vector<1x1xf32> to vector<8x8xf32>
    %253 = arith.mulf %252, %250 : vector<8x8xf32>
    %254 = arith.addf %240, %253 : vector<8x8xf32>
    %cst_50 = arith.constant 0.000000e+00 : f32
    %255 = vector.broadcast %cst_50 : f32 to vector<8x8xf32>
    %256 = arith.cmpf ogt, %1, %255 : vector<8x8xf32>
    %cst_51 = arith.constant -1.000000e+30 : f32
    %257 = vector.broadcast %cst_51 : f32 to vector<8x8xf32>
    %258 = arith.select %256, %254, %257 : vector<8x8xi1>, vector<8x8xf32>
    %cst_52 = arith.constant dense<0xFF800000> : vector<8xf32>
    %259 = vector.multi_reduction <maximumf>, %258, %cst_52 [1] : vector<8x8xf32> to vector<8xf32>
    %260 = vector.shape_cast %259 : vector<8xf32> to vector<8x1xf32>
    %261 = vector.broadcast %260 : vector<8x1xf32> to vector<8x8xf32>
    %262 = arith.subf %258, %261 : vector<8x8xf32>
    %263 = math.exp %262 : vector<8x8xf32>
    %264 = arith.mulf %263, %1 : vector<8x8xf32>
    %cst_53 = arith.constant dense<0.000000e+00> : vector<8xf32>
    %265 = vector.multi_reduction <add>, %264, %cst_53 [1] : vector<8x8xf32> to vector<8xf32>
    %266 = vector.shape_cast %265 : vector<8xf32> to vector<8x1xf32>
    %267 = tpu.reciprocal %266 {approx = true} : vector<8x1xf32> -> vector<8x1xf32>
    %268 = vector.broadcast %267 : vector<8x1xf32> to vector<8x8xf32>
    %269 = arith.mulf %264, %268 : vector<8x8xf32>
    %270 = vector.extract_strided_slice %9 {offsets = [0, 8], sizes = [8, 8], strides = [1, 1]} : vector<8x32xf32> to vector<8x8xf32>
    %cst_54 = arith.constant dense<0.000000e+00> : vector<8x8xf32>
    %271 = tpu.matmul %269, %270, %cst_54 {dimension_numbers = #tpu.dot_dimension_numbers<[1], [0], [0], [1], [0, 0, 1, 1], [], []>} : vector<8x8xf32>, vector<8x8xf32>, vector<8x8xf32> -> vector<8x8xf32>
    %cst_55 = arith.constant 0.000000e+00 : f32
    %272 = vector.broadcast %cst_55 : f32 to vector<8x8xf32>
    %273 = vector.extract_strided_slice %10 {offsets = [0, 16], sizes = [8, 1], strides = [1, 1]} : vector<8x32xf32> to vector<8x1xf32>
    %274 = vector.extract_strided_slice %11 {offsets = [16, 0], sizes = [1, 8], strides = [1, 1]} : vector<32x8xf32> to vector<1x8xf32>
    %275 = vector.broadcast %273 : vector<8x1xf32> to vector<8x8xf32>
    %276 = vector.broadcast %274 : vector<1x8xf32> to vector<8x8xf32>
    %277 = arith.addf %275, %276 : vector<8x8xf32>
    %cst_56 = arith.constant 0.000000e+00 : f32
    %278 = vector.broadcast %cst_56 : f32 to vector<8x8xf32>
    %279 = arith.cmpf ogt, %277, %278 : vector<8x8xf32>
    %cst_57 = arith.constant 2.000000e-01 : f32
    %280 = vector.broadcast %cst_57 : f32 to vector<8x8xf32>
    %281 = arith.mulf %280, %277 : vector<8x8xf32>
    %282 = arith.select %279, %277, %281 : vector<8x8xi1>, vector<8x8xf32>
    %283 = vector.extract_strided_slice %4 {offsets = [2, 0], sizes = [1, 1], strides = [1, 1]} : vector<4x8xf32> to vector<1x1xf32>
    %284 = vector.broadcast %283 : vector<1x1xf32> to vector<8x8xf32>
    %285 = arith.mulf %284, %282 : vector<8x8xf32>
    %286 = arith.addf %272, %285 : vector<8x8xf32>
    %287 = vector.extract_strided_slice %10 {offsets = [0, 17], sizes = [8, 1], strides = [1, 1]} : vector<8x32xf32> to vector<8x1xf32>
    %288 = vector.extract_strided_slice %11 {offsets = [17, 0], sizes = [1, 8], strides = [1, 1]} : vector<32x8xf32> to vector<1x8xf32>
    %289 = vector.broadcast %287 : vector<8x1xf32> to vector<8x8xf32>
    %290 = vector.broadcast %288 : vector<1x8xf32> to vector<8x8xf32>
    %291 = arith.addf %289, %290 : vector<8x8xf32>
    %cst_58 = arith.constant 0.000000e+00 : f32
    %292 = vector.broadcast %cst_58 : f32 to vector<8x8xf32>
    %293 = arith.cmpf ogt, %291, %292 : vector<8x8xf32>
    %cst_59 = arith.constant 2.000000e-01 : f32
    %294 = vector.broadcast %cst_59 : f32 to vector<8x8xf32>
    %295 = arith.mulf %294, %291 : vector<8x8xf32>
    %296 = arith.select %293, %291, %295 : vector<8x8xi1>, vector<8x8xf32>
    %297 = vector.extract_strided_slice %4 {offsets = [2, 1], sizes = [1, 1], strides = [1, 1]} : vector<4x8xf32> to vector<1x1xf32>
    %298 = vector.broadcast %297 : vector<1x1xf32> to vector<8x8xf32>
    %299 = arith.mulf %298, %296 : vector<8x8xf32>
    %300 = arith.addf %286, %299 : vector<8x8xf32>
    %301 = vector.extract_strided_slice %10 {offsets = [0, 18], sizes = [8, 1], strides = [1, 1]} : vector<8x32xf32> to vector<8x1xf32>
    %302 = vector.extract_strided_slice %11 {offsets = [18, 0], sizes = [1, 8], strides = [1, 1]} : vector<32x8xf32> to vector<1x8xf32>
    %303 = vector.broadcast %301 : vector<8x1xf32> to vector<8x8xf32>
    %304 = vector.broadcast %302 : vector<1x8xf32> to vector<8x8xf32>
    %305 = arith.addf %303, %304 : vector<8x8xf32>
    %cst_60 = arith.constant 0.000000e+00 : f32
    %306 = vector.broadcast %cst_60 : f32 to vector<8x8xf32>
    %307 = arith.cmpf ogt, %305, %306 : vector<8x8xf32>
    %cst_61 = arith.constant 2.000000e-01 : f32
    %308 = vector.broadcast %cst_61 : f32 to vector<8x8xf32>
    %309 = arith.mulf %308, %305 : vector<8x8xf32>
    %310 = arith.select %307, %305, %309 : vector<8x8xi1>, vector<8x8xf32>
    %311 = vector.extract_strided_slice %4 {offsets = [2, 2], sizes = [1, 1], strides = [1, 1]} : vector<4x8xf32> to vector<1x1xf32>
    %312 = vector.broadcast %311 : vector<1x1xf32> to vector<8x8xf32>
    %313 = arith.mulf %312, %310 : vector<8x8xf32>
    %314 = arith.addf %300, %313 : vector<8x8xf32>
    %315 = vector.extract_strided_slice %10 {offsets = [0, 19], sizes = [8, 1], strides = [1, 1]} : vector<8x32xf32> to vector<8x1xf32>
    %316 = vector.extract_strided_slice %11 {offsets = [19, 0], sizes = [1, 8], strides = [1, 1]} : vector<32x8xf32> to vector<1x8xf32>
    %317 = vector.broadcast %315 : vector<8x1xf32> to vector<8x8xf32>
    %318 = vector.broadcast %316 : vector<1x8xf32> to vector<8x8xf32>
    %319 = arith.addf %317, %318 : vector<8x8xf32>
    %cst_62 = arith.constant 0.000000e+00 : f32
    %320 = vector.broadcast %cst_62 : f32 to vector<8x8xf32>
    %321 = arith.cmpf ogt, %319, %320 : vector<8x8xf32>
    %cst_63 = arith.constant 2.000000e-01 : f32
    %322 = vector.broadcast %cst_63 : f32 to vector<8x8xf32>
    %323 = arith.mulf %322, %319 : vector<8x8xf32>
    %324 = arith.select %321, %319, %323 : vector<8x8xi1>, vector<8x8xf32>
    %325 = vector.extract_strided_slice %4 {offsets = [2, 3], sizes = [1, 1], strides = [1, 1]} : vector<4x8xf32> to vector<1x1xf32>
    %326 = vector.broadcast %325 : vector<1x1xf32> to vector<8x8xf32>
    %327 = arith.mulf %326, %324 : vector<8x8xf32>
    %328 = arith.addf %314, %327 : vector<8x8xf32>
    %329 = vector.extract_strided_slice %10 {offsets = [0, 20], sizes = [8, 1], strides = [1, 1]} : vector<8x32xf32> to vector<8x1xf32>
    %330 = vector.extract_strided_slice %11 {offsets = [20, 0], sizes = [1, 8], strides = [1, 1]} : vector<32x8xf32> to vector<1x8xf32>
    %331 = vector.broadcast %329 : vector<8x1xf32> to vector<8x8xf32>
    %332 = vector.broadcast %330 : vector<1x8xf32> to vector<8x8xf32>
    %333 = arith.addf %331, %332 : vector<8x8xf32>
    %cst_64 = arith.constant 0.000000e+00 : f32
    %334 = vector.broadcast %cst_64 : f32 to vector<8x8xf32>
    %335 = arith.cmpf ogt, %333, %334 : vector<8x8xf32>
    %cst_65 = arith.constant 2.000000e-01 : f32
    %336 = vector.broadcast %cst_65 : f32 to vector<8x8xf32>
    %337 = arith.mulf %336, %333 : vector<8x8xf32>
    %338 = arith.select %335, %333, %337 : vector<8x8xi1>, vector<8x8xf32>
    %339 = vector.extract_strided_slice %4 {offsets = [2, 4], sizes = [1, 1], strides = [1, 1]} : vector<4x8xf32> to vector<1x1xf32>
    %340 = vector.broadcast %339 : vector<1x1xf32> to vector<8x8xf32>
    %341 = arith.mulf %340, %338 : vector<8x8xf32>
    %342 = arith.addf %328, %341 : vector<8x8xf32>
    %343 = vector.extract_strided_slice %10 {offsets = [0, 21], sizes = [8, 1], strides = [1, 1]} : vector<8x32xf32> to vector<8x1xf32>
    %344 = vector.extract_strided_slice %11 {offsets = [21, 0], sizes = [1, 8], strides = [1, 1]} : vector<32x8xf32> to vector<1x8xf32>
    %345 = vector.broadcast %343 : vector<8x1xf32> to vector<8x8xf32>
    %346 = vector.broadcast %344 : vector<1x8xf32> to vector<8x8xf32>
    %347 = arith.addf %345, %346 : vector<8x8xf32>
    %cst_66 = arith.constant 0.000000e+00 : f32
    %348 = vector.broadcast %cst_66 : f32 to vector<8x8xf32>
    %349 = arith.cmpf ogt, %347, %348 : vector<8x8xf32>
    %cst_67 = arith.constant 2.000000e-01 : f32
    %350 = vector.broadcast %cst_67 : f32 to vector<8x8xf32>
    %351 = arith.mulf %350, %347 : vector<8x8xf32>
    %352 = arith.select %349, %347, %351 : vector<8x8xi1>, vector<8x8xf32>
    %353 = vector.extract_strided_slice %4 {offsets = [2, 5], sizes = [1, 1], strides = [1, 1]} : vector<4x8xf32> to vector<1x1xf32>
    %354 = vector.broadcast %353 : vector<1x1xf32> to vector<8x8xf32>
    %355 = arith.mulf %354, %352 : vector<8x8xf32>
    %356 = arith.addf %342, %355 : vector<8x8xf32>
    %357 = vector.extract_strided_slice %10 {offsets = [0, 22], sizes = [8, 1], strides = [1, 1]} : vector<8x32xf32> to vector<8x1xf32>
    %358 = vector.extract_strided_slice %11 {offsets = [22, 0], sizes = [1, 8], strides = [1, 1]} : vector<32x8xf32> to vector<1x8xf32>
    %359 = vector.broadcast %357 : vector<8x1xf32> to vector<8x8xf32>
    %360 = vector.broadcast %358 : vector<1x8xf32> to vector<8x8xf32>
    %361 = arith.addf %359, %360 : vector<8x8xf32>
    %cst_68 = arith.constant 0.000000e+00 : f32
    %362 = vector.broadcast %cst_68 : f32 to vector<8x8xf32>
    %363 = arith.cmpf ogt, %361, %362 : vector<8x8xf32>
    %cst_69 = arith.constant 2.000000e-01 : f32
    %364 = vector.broadcast %cst_69 : f32 to vector<8x8xf32>
    %365 = arith.mulf %364, %361 : vector<8x8xf32>
    %366 = arith.select %363, %361, %365 : vector<8x8xi1>, vector<8x8xf32>
    %367 = vector.extract_strided_slice %4 {offsets = [2, 6], sizes = [1, 1], strides = [1, 1]} : vector<4x8xf32> to vector<1x1xf32>
    %368 = vector.broadcast %367 : vector<1x1xf32> to vector<8x8xf32>
    %369 = arith.mulf %368, %366 : vector<8x8xf32>
    %370 = arith.addf %356, %369 : vector<8x8xf32>
    %371 = vector.extract_strided_slice %10 {offsets = [0, 23], sizes = [8, 1], strides = [1, 1]} : vector<8x32xf32> to vector<8x1xf32>
    %372 = vector.extract_strided_slice %11 {offsets = [23, 0], sizes = [1, 8], strides = [1, 1]} : vector<32x8xf32> to vector<1x8xf32>
    %373 = vector.broadcast %371 : vector<8x1xf32> to vector<8x8xf32>
    %374 = vector.broadcast %372 : vector<1x8xf32> to vector<8x8xf32>
    %375 = arith.addf %373, %374 : vector<8x8xf32>
    %cst_70 = arith.constant 0.000000e+00 : f32
    %376 = vector.broadcast %cst_70 : f32 to vector<8x8xf32>
    %377 = arith.cmpf ogt, %375, %376 : vector<8x8xf32>
    %cst_71 = arith.constant 2.000000e-01 : f32
    %378 = vector.broadcast %cst_71 : f32 to vector<8x8xf32>
    %379 = arith.mulf %378, %375 : vector<8x8xf32>
    %380 = arith.select %377, %375, %379 : vector<8x8xi1>, vector<8x8xf32>
    %381 = vector.extract_strided_slice %4 {offsets = [2, 7], sizes = [1, 1], strides = [1, 1]} : vector<4x8xf32> to vector<1x1xf32>
    %382 = vector.broadcast %381 : vector<1x1xf32> to vector<8x8xf32>
    %383 = arith.mulf %382, %380 : vector<8x8xf32>
    %384 = arith.addf %370, %383 : vector<8x8xf32>
    %cst_72 = arith.constant 0.000000e+00 : f32
    %385 = vector.broadcast %cst_72 : f32 to vector<8x8xf32>
    %386 = arith.cmpf ogt, %1, %385 : vector<8x8xf32>
    %cst_73 = arith.constant -1.000000e+30 : f32
    %387 = vector.broadcast %cst_73 : f32 to vector<8x8xf32>
    %388 = arith.select %386, %384, %387 : vector<8x8xi1>, vector<8x8xf32>
    %cst_74 = arith.constant dense<0xFF800000> : vector<8xf32>
    %389 = vector.multi_reduction <maximumf>, %388, %cst_74 [1] : vector<8x8xf32> to vector<8xf32>
    %390 = vector.shape_cast %389 : vector<8xf32> to vector<8x1xf32>
    %391 = vector.broadcast %390 : vector<8x1xf32> to vector<8x8xf32>
    %392 = arith.subf %388, %391 : vector<8x8xf32>
    %393 = math.exp %392 : vector<8x8xf32>
    %394 = arith.mulf %393, %1 : vector<8x8xf32>
    %cst_75 = arith.constant dense<0.000000e+00> : vector<8xf32>
    %395 = vector.multi_reduction <add>, %394, %cst_75 [1] : vector<8x8xf32> to vector<8xf32>
    %396 = vector.shape_cast %395 : vector<8xf32> to vector<8x1xf32>
    %397 = tpu.reciprocal %396 {approx = true} : vector<8x1xf32> -> vector<8x1xf32>
    %398 = vector.broadcast %397 : vector<8x1xf32> to vector<8x8xf32>
    %399 = arith.mulf %394, %398 : vector<8x8xf32>
    %400 = vector.extract_strided_slice %9 {offsets = [0, 16], sizes = [8, 8], strides = [1, 1]} : vector<8x32xf32> to vector<8x8xf32>
    %cst_76 = arith.constant dense<0.000000e+00> : vector<8x8xf32>
    %401 = tpu.matmul %399, %400, %cst_76 {dimension_numbers = #tpu.dot_dimension_numbers<[1], [0], [0], [1], [0, 0, 1, 1], [], []>} : vector<8x8xf32>, vector<8x8xf32>, vector<8x8xf32> -> vector<8x8xf32>
    %cst_77 = arith.constant 0.000000e+00 : f32
    %402 = vector.broadcast %cst_77 : f32 to vector<8x8xf32>
    %403 = vector.extract_strided_slice %10 {offsets = [0, 24], sizes = [8, 1], strides = [1, 1]} : vector<8x32xf32> to vector<8x1xf32>
    %404 = vector.extract_strided_slice %11 {offsets = [24, 0], sizes = [1, 8], strides = [1, 1]} : vector<32x8xf32> to vector<1x8xf32>
    %405 = vector.broadcast %403 : vector<8x1xf32> to vector<8x8xf32>
    %406 = vector.broadcast %404 : vector<1x8xf32> to vector<8x8xf32>
    %407 = arith.addf %405, %406 : vector<8x8xf32>
    %cst_78 = arith.constant 0.000000e+00 : f32
    %408 = vector.broadcast %cst_78 : f32 to vector<8x8xf32>
    %409 = arith.cmpf ogt, %407, %408 : vector<8x8xf32>
    %cst_79 = arith.constant 2.000000e-01 : f32
    %410 = vector.broadcast %cst_79 : f32 to vector<8x8xf32>
    %411 = arith.mulf %410, %407 : vector<8x8xf32>
    %412 = arith.select %409, %407, %411 : vector<8x8xi1>, vector<8x8xf32>
    %413 = vector.extract_strided_slice %4 {offsets = [3, 0], sizes = [1, 1], strides = [1, 1]} : vector<4x8xf32> to vector<1x1xf32>
    %414 = vector.broadcast %413 : vector<1x1xf32> to vector<8x8xf32>
    %415 = arith.mulf %414, %412 : vector<8x8xf32>
    %416 = arith.addf %402, %415 : vector<8x8xf32>
    %417 = vector.extract_strided_slice %10 {offsets = [0, 25], sizes = [8, 1], strides = [1, 1]} : vector<8x32xf32> to vector<8x1xf32>
    %418 = vector.extract_strided_slice %11 {offsets = [25, 0], sizes = [1, 8], strides = [1, 1]} : vector<32x8xf32> to vector<1x8xf32>
    %419 = vector.broadcast %417 : vector<8x1xf32> to vector<8x8xf32>
    %420 = vector.broadcast %418 : vector<1x8xf32> to vector<8x8xf32>
    %421 = arith.addf %419, %420 : vector<8x8xf32>
    %cst_80 = arith.constant 0.000000e+00 : f32
    %422 = vector.broadcast %cst_80 : f32 to vector<8x8xf32>
    %423 = arith.cmpf ogt, %421, %422 : vector<8x8xf32>
    %cst_81 = arith.constant 2.000000e-01 : f32
    %424 = vector.broadcast %cst_81 : f32 to vector<8x8xf32>
    %425 = arith.mulf %424, %421 : vector<8x8xf32>
    %426 = arith.select %423, %421, %425 : vector<8x8xi1>, vector<8x8xf32>
    %427 = vector.extract_strided_slice %4 {offsets = [3, 1], sizes = [1, 1], strides = [1, 1]} : vector<4x8xf32> to vector<1x1xf32>
    %428 = vector.broadcast %427 : vector<1x1xf32> to vector<8x8xf32>
    %429 = arith.mulf %428, %426 : vector<8x8xf32>
    %430 = arith.addf %416, %429 : vector<8x8xf32>
    %431 = vector.extract_strided_slice %10 {offsets = [0, 26], sizes = [8, 1], strides = [1, 1]} : vector<8x32xf32> to vector<8x1xf32>
    %432 = vector.extract_strided_slice %11 {offsets = [26, 0], sizes = [1, 8], strides = [1, 1]} : vector<32x8xf32> to vector<1x8xf32>
    %433 = vector.broadcast %431 : vector<8x1xf32> to vector<8x8xf32>
    %434 = vector.broadcast %432 : vector<1x8xf32> to vector<8x8xf32>
    %435 = arith.addf %433, %434 : vector<8x8xf32>
    %cst_82 = arith.constant 0.000000e+00 : f32
    %436 = vector.broadcast %cst_82 : f32 to vector<8x8xf32>
    %437 = arith.cmpf ogt, %435, %436 : vector<8x8xf32>
    %cst_83 = arith.constant 2.000000e-01 : f32
    %438 = vector.broadcast %cst_83 : f32 to vector<8x8xf32>
    %439 = arith.mulf %438, %435 : vector<8x8xf32>
    %440 = arith.select %437, %435, %439 : vector<8x8xi1>, vector<8x8xf32>
    %441 = vector.extract_strided_slice %4 {offsets = [3, 2], sizes = [1, 1], strides = [1, 1]} : vector<4x8xf32> to vector<1x1xf32>
    %442 = vector.broadcast %441 : vector<1x1xf32> to vector<8x8xf32>
    %443 = arith.mulf %442, %440 : vector<8x8xf32>
    %444 = arith.addf %430, %443 : vector<8x8xf32>
    %445 = vector.extract_strided_slice %10 {offsets = [0, 27], sizes = [8, 1], strides = [1, 1]} : vector<8x32xf32> to vector<8x1xf32>
    %446 = vector.extract_strided_slice %11 {offsets = [27, 0], sizes = [1, 8], strides = [1, 1]} : vector<32x8xf32> to vector<1x8xf32>
    %447 = vector.broadcast %445 : vector<8x1xf32> to vector<8x8xf32>
    %448 = vector.broadcast %446 : vector<1x8xf32> to vector<8x8xf32>
    %449 = arith.addf %447, %448 : vector<8x8xf32>
    %cst_84 = arith.constant 0.000000e+00 : f32
    %450 = vector.broadcast %cst_84 : f32 to vector<8x8xf32>
    %451 = arith.cmpf ogt, %449, %450 : vector<8x8xf32>
    %cst_85 = arith.constant 2.000000e-01 : f32
    %452 = vector.broadcast %cst_85 : f32 to vector<8x8xf32>
    %453 = arith.mulf %452, %449 : vector<8x8xf32>
    %454 = arith.select %451, %449, %453 : vector<8x8xi1>, vector<8x8xf32>
    %455 = vector.extract_strided_slice %4 {offsets = [3, 3], sizes = [1, 1], strides = [1, 1]} : vector<4x8xf32> to vector<1x1xf32>
    %456 = vector.broadcast %455 : vector<1x1xf32> to vector<8x8xf32>
    %457 = arith.mulf %456, %454 : vector<8x8xf32>
    %458 = arith.addf %444, %457 : vector<8x8xf32>
    %459 = vector.extract_strided_slice %10 {offsets = [0, 28], sizes = [8, 1], strides = [1, 1]} : vector<8x32xf32> to vector<8x1xf32>
    %460 = vector.extract_strided_slice %11 {offsets = [28, 0], sizes = [1, 8], strides = [1, 1]} : vector<32x8xf32> to vector<1x8xf32>
    %461 = vector.broadcast %459 : vector<8x1xf32> to vector<8x8xf32>
    %462 = vector.broadcast %460 : vector<1x8xf32> to vector<8x8xf32>
    %463 = arith.addf %461, %462 : vector<8x8xf32>
    %cst_86 = arith.constant 0.000000e+00 : f32
    %464 = vector.broadcast %cst_86 : f32 to vector<8x8xf32>
    %465 = arith.cmpf ogt, %463, %464 : vector<8x8xf32>
    %cst_87 = arith.constant 2.000000e-01 : f32
    %466 = vector.broadcast %cst_87 : f32 to vector<8x8xf32>
    %467 = arith.mulf %466, %463 : vector<8x8xf32>
    %468 = arith.select %465, %463, %467 : vector<8x8xi1>, vector<8x8xf32>
    %469 = vector.extract_strided_slice %4 {offsets = [3, 4], sizes = [1, 1], strides = [1, 1]} : vector<4x8xf32> to vector<1x1xf32>
    %470 = vector.broadcast %469 : vector<1x1xf32> to vector<8x8xf32>
    %471 = arith.mulf %470, %468 : vector<8x8xf32>
    %472 = arith.addf %458, %471 : vector<8x8xf32>
    %473 = vector.extract_strided_slice %10 {offsets = [0, 29], sizes = [8, 1], strides = [1, 1]} : vector<8x32xf32> to vector<8x1xf32>
    %474 = vector.extract_strided_slice %11 {offsets = [29, 0], sizes = [1, 8], strides = [1, 1]} : vector<32x8xf32> to vector<1x8xf32>
    %475 = vector.broadcast %473 : vector<8x1xf32> to vector<8x8xf32>
    %476 = vector.broadcast %474 : vector<1x8xf32> to vector<8x8xf32>
    %477 = arith.addf %475, %476 : vector<8x8xf32>
    %cst_88 = arith.constant 0.000000e+00 : f32
    %478 = vector.broadcast %cst_88 : f32 to vector<8x8xf32>
    %479 = arith.cmpf ogt, %477, %478 : vector<8x8xf32>
    %cst_89 = arith.constant 2.000000e-01 : f32
    %480 = vector.broadcast %cst_89 : f32 to vector<8x8xf32>
    %481 = arith.mulf %480, %477 : vector<8x8xf32>
    %482 = arith.select %479, %477, %481 : vector<8x8xi1>, vector<8x8xf32>
    %483 = vector.extract_strided_slice %4 {offsets = [3, 5], sizes = [1, 1], strides = [1, 1]} : vector<4x8xf32> to vector<1x1xf32>
    %484 = vector.broadcast %483 : vector<1x1xf32> to vector<8x8xf32>
    %485 = arith.mulf %484, %482 : vector<8x8xf32>
    %486 = arith.addf %472, %485 : vector<8x8xf32>
    %487 = vector.extract_strided_slice %10 {offsets = [0, 30], sizes = [8, 1], strides = [1, 1]} : vector<8x32xf32> to vector<8x1xf32>
    %488 = vector.extract_strided_slice %11 {offsets = [30, 0], sizes = [1, 8], strides = [1, 1]} : vector<32x8xf32> to vector<1x8xf32>
    %489 = vector.broadcast %487 : vector<8x1xf32> to vector<8x8xf32>
    %490 = vector.broadcast %488 : vector<1x8xf32> to vector<8x8xf32>
    %491 = arith.addf %489, %490 : vector<8x8xf32>
    %cst_90 = arith.constant 0.000000e+00 : f32
    %492 = vector.broadcast %cst_90 : f32 to vector<8x8xf32>
    %493 = arith.cmpf ogt, %491, %492 : vector<8x8xf32>
    %cst_91 = arith.constant 2.000000e-01 : f32
    %494 = vector.broadcast %cst_91 : f32 to vector<8x8xf32>
    %495 = arith.mulf %494, %491 : vector<8x8xf32>
    %496 = arith.select %493, %491, %495 : vector<8x8xi1>, vector<8x8xf32>
    %497 = vector.extract_strided_slice %4 {offsets = [3, 6], sizes = [1, 1], strides = [1, 1]} : vector<4x8xf32> to vector<1x1xf32>
    %498 = vector.broadcast %497 : vector<1x1xf32> to vector<8x8xf32>
    %499 = arith.mulf %498, %496 : vector<8x8xf32>
    %500 = arith.addf %486, %499 : vector<8x8xf32>
    %501 = vector.extract_strided_slice %10 {offsets = [0, 31], sizes = [8, 1], strides = [1, 1]} : vector<8x32xf32> to vector<8x1xf32>
    %502 = vector.extract_strided_slice %11 {offsets = [31, 0], sizes = [1, 8], strides = [1, 1]} : vector<32x8xf32> to vector<1x8xf32>
    %503 = vector.broadcast %501 : vector<8x1xf32> to vector<8x8xf32>
    %504 = vector.broadcast %502 : vector<1x8xf32> to vector<8x8xf32>
    %505 = arith.addf %503, %504 : vector<8x8xf32>
    %cst_92 = arith.constant 0.000000e+00 : f32
    %506 = vector.broadcast %cst_92 : f32 to vector<8x8xf32>
    %507 = arith.cmpf ogt, %505, %506 : vector<8x8xf32>
    %cst_93 = arith.constant 2.000000e-01 : f32
    %508 = vector.broadcast %cst_93 : f32 to vector<8x8xf32>
    %509 = arith.mulf %508, %505 : vector<8x8xf32>
    %510 = arith.select %507, %505, %509 : vector<8x8xi1>, vector<8x8xf32>
    %511 = vector.extract_strided_slice %4 {offsets = [3, 7], sizes = [1, 1], strides = [1, 1]} : vector<4x8xf32> to vector<1x1xf32>
    %512 = vector.broadcast %511 : vector<1x1xf32> to vector<8x8xf32>
    %513 = arith.mulf %512, %510 : vector<8x8xf32>
    %514 = arith.addf %500, %513 : vector<8x8xf32>
    %cst_94 = arith.constant 0.000000e+00 : f32
    %515 = vector.broadcast %cst_94 : f32 to vector<8x8xf32>
    %516 = arith.cmpf ogt, %1, %515 : vector<8x8xf32>
    %cst_95 = arith.constant -1.000000e+30 : f32
    %517 = vector.broadcast %cst_95 : f32 to vector<8x8xf32>
    %518 = arith.select %516, %514, %517 : vector<8x8xi1>, vector<8x8xf32>
    %cst_96 = arith.constant dense<0xFF800000> : vector<8xf32>
    %519 = vector.multi_reduction <maximumf>, %518, %cst_96 [1] : vector<8x8xf32> to vector<8xf32>
    %520 = vector.shape_cast %519 : vector<8xf32> to vector<8x1xf32>
    %521 = vector.broadcast %520 : vector<8x1xf32> to vector<8x8xf32>
    %522 = arith.subf %518, %521 : vector<8x8xf32>
    %523 = math.exp %522 : vector<8x8xf32>
    %524 = arith.mulf %523, %1 : vector<8x8xf32>
    %cst_97 = arith.constant dense<0.000000e+00> : vector<8xf32>
    %525 = vector.multi_reduction <add>, %524, %cst_97 [1] : vector<8x8xf32> to vector<8xf32>
    %526 = vector.shape_cast %525 : vector<8xf32> to vector<8x1xf32>
    %527 = tpu.reciprocal %526 {approx = true} : vector<8x1xf32> -> vector<8x1xf32>
    %528 = vector.broadcast %527 : vector<8x1xf32> to vector<8x8xf32>
    %529 = arith.mulf %524, %528 : vector<8x8xf32>
    %530 = vector.extract_strided_slice %9 {offsets = [0, 24], sizes = [8, 8], strides = [1, 1]} : vector<8x32xf32> to vector<8x8xf32>
    %cst_98 = arith.constant dense<0.000000e+00> : vector<8x8xf32>
    %531 = tpu.matmul %529, %530, %cst_98 {dimension_numbers = #tpu.dot_dimension_numbers<[1], [0], [0], [1], [0, 0, 1, 1], [], []>} : vector<8x8xf32>, vector<8x8xf32>, vector<8x8xf32> -> vector<8x8xf32>
    %532 = tpu.concatenate %141, %271, %401, %531 in 1 : vector<8x8xf32>, vector<8x8xf32>, vector<8x8xf32>, vector<8x8xf32> -> vector<8x32xf32>
    %533 = vector.broadcast %5 : vector<1x32xf32> to vector<8x32xf32>
    %534 = arith.addf %532, %533 : vector<8x32xf32>
    %c0_99 = arith.constant 0 : index
    %c0_100 = arith.constant 0 : index
    %535 = vector.load %arg6[%c0_99, %c0_100] : memref<1x32xf32, #tpu.memory_space<vmem>>, vector<1x32xf32>
    %c0_101 = arith.constant 0 : index
    %c0_102 = arith.constant 0 : index
    %536 = vector.load %arg7[%c0_101, %c0_102] : memref<1x32xf32, #tpu.memory_space<vmem>>, vector<1x32xf32>
    %537 = vector.broadcast %535 : vector<1x32xf32> to vector<8x32xf32>
    %538 = arith.mulf %534, %537 : vector<8x32xf32>
    %539 = vector.broadcast %536 : vector<1x32xf32> to vector<8x32xf32>
    %540 = arith.addf %538, %539 : vector<8x32xf32>
    %cst_103 = arith.constant 0.000000e+00 : f32
    %541 = vector.broadcast %cst_103 : f32 to vector<8x32xf32>
    %542 = arith.cmpf ogt, %540, %541 : vector<8x32xf32>
    %cst_104 = arith.constant 2.000000e-01 : f32
    %543 = vector.broadcast %cst_104 : f32 to vector<8x32xf32>
    %544 = arith.mulf %543, %540 : vector<8x32xf32>
    %545 = arith.select %542, %540, %544 : vector<8x32xi1>, vector<8x32xf32>
    %c0_105 = arith.constant 0 : index
    %c0_106 = arith.constant 0 : index
    %546 = vector.load %arg8[%c0_105, %c0_106] : memref<32x64xf32, #tpu.memory_space<vmem>>, vector<32x64xf32>
    %c0_107 = arith.constant 0 : index
    %c0_108 = arith.constant 0 : index
    %547 = vector.load %arg9[%c0_107, %c0_108] : memref<1x64xf32, #tpu.memory_space<vmem>>, vector<1x64xf32>
    %c0_109 = arith.constant 0 : index
    %c0_110 = arith.constant 0 : index
    %548 = vector.load %arg10[%c0_109, %c0_110] : memref<1x32xf32, #tpu.memory_space<vmem>>, vector<1x32xf32>
    %c0_111 = arith.constant 0 : index
    %c0_112 = arith.constant 0 : index
    %549 = vector.load %arg11[%c0_111, %c0_112] : memref<1x32xf32, #tpu.memory_space<vmem>>, vector<1x32xf32>
    %cst_113 = arith.constant dense<0.000000e+00> : vector<8x64xf32>
    %550 = tpu.matmul %545, %546, %cst_113 {dimension_numbers = #tpu.dot_dimension_numbers<[1], [0], [0], [1], [0, 0, 1, 1], [], []>} : vector<8x32xf32>, vector<32x64xf32>, vector<8x64xf32> -> vector<8x64xf32>
    %551 = vector.broadcast %547 : vector<1x64xf32> to vector<8x64xf32>
    %552 = arith.addf %550, %551 : vector<8x64xf32>
    %553 = vector.extract_strided_slice %552 {offsets = [0, 0], sizes = [8, 32], strides = [1, 1]} : vector<8x64xf32> to vector<8x32xf32>
    %554 = vector.extract_strided_slice %552 {offsets = [0, 32], sizes = [8, 32], strides = [1, 1]} : vector<8x64xf32> to vector<8x32xf32>
    %555 = tpu.transpose %553, [1, 0] : vector<8x32xf32> -> vector<32x8xf32>
    %cst_114 = arith.constant 0.000000e+00 : f32
    %556 = vector.broadcast %cst_114 : f32 to vector<8x8xf32>
    %557 = vector.extract_strided_slice %554 {offsets = [0, 0], sizes = [8, 1], strides = [1, 1]} : vector<8x32xf32> to vector<8x1xf32>
    %558 = vector.extract_strided_slice %555 {offsets = [0, 0], sizes = [1, 8], strides = [1, 1]} : vector<32x8xf32> to vector<1x8xf32>
    %559 = vector.broadcast %557 : vector<8x1xf32> to vector<8x8xf32>
    %560 = vector.broadcast %558 : vector<1x8xf32> to vector<8x8xf32>
    %561 = arith.addf %559, %560 : vector<8x8xf32>
    %cst_115 = arith.constant 0.000000e+00 : f32
    %562 = vector.broadcast %cst_115 : f32 to vector<8x8xf32>
    %563 = arith.cmpf ogt, %561, %562 : vector<8x8xf32>
    %cst_116 = arith.constant 2.000000e-01 : f32
    %564 = vector.broadcast %cst_116 : f32 to vector<8x8xf32>
    %565 = arith.mulf %564, %561 : vector<8x8xf32>
    %566 = arith.select %563, %561, %565 : vector<8x8xi1>, vector<8x8xf32>
    %567 = vector.extract_strided_slice %548 {offsets = [0, 0], sizes = [1, 1], strides = [1, 1]} : vector<1x32xf32> to vector<1x1xf32>
    %568 = vector.broadcast %567 : vector<1x1xf32> to vector<8x8xf32>
    %569 = arith.mulf %568, %566 : vector<8x8xf32>
    %570 = arith.addf %556, %569 : vector<8x8xf32>
    %571 = vector.extract_strided_slice %554 {offsets = [0, 1], sizes = [8, 1], strides = [1, 1]} : vector<8x32xf32> to vector<8x1xf32>
    %572 = vector.extract_strided_slice %555 {offsets = [1, 0], sizes = [1, 8], strides = [1, 1]} : vector<32x8xf32> to vector<1x8xf32>
    %573 = vector.broadcast %571 : vector<8x1xf32> to vector<8x8xf32>
    %574 = vector.broadcast %572 : vector<1x8xf32> to vector<8x8xf32>
    %575 = arith.addf %573, %574 : vector<8x8xf32>
    %cst_117 = arith.constant 0.000000e+00 : f32
    %576 = vector.broadcast %cst_117 : f32 to vector<8x8xf32>
    %577 = arith.cmpf ogt, %575, %576 : vector<8x8xf32>
    %cst_118 = arith.constant 2.000000e-01 : f32
    %578 = vector.broadcast %cst_118 : f32 to vector<8x8xf32>
    %579 = arith.mulf %578, %575 : vector<8x8xf32>
    %580 = arith.select %577, %575, %579 : vector<8x8xi1>, vector<8x8xf32>
    %581 = vector.extract_strided_slice %548 {offsets = [0, 1], sizes = [1, 1], strides = [1, 1]} : vector<1x32xf32> to vector<1x1xf32>
    %582 = vector.broadcast %581 : vector<1x1xf32> to vector<8x8xf32>
    %583 = arith.mulf %582, %580 : vector<8x8xf32>
    %584 = arith.addf %570, %583 : vector<8x8xf32>
    %585 = vector.extract_strided_slice %554 {offsets = [0, 2], sizes = [8, 1], strides = [1, 1]} : vector<8x32xf32> to vector<8x1xf32>
    %586 = vector.extract_strided_slice %555 {offsets = [2, 0], sizes = [1, 8], strides = [1, 1]} : vector<32x8xf32> to vector<1x8xf32>
    %587 = vector.broadcast %585 : vector<8x1xf32> to vector<8x8xf32>
    %588 = vector.broadcast %586 : vector<1x8xf32> to vector<8x8xf32>
    %589 = arith.addf %587, %588 : vector<8x8xf32>
    %cst_119 = arith.constant 0.000000e+00 : f32
    %590 = vector.broadcast %cst_119 : f32 to vector<8x8xf32>
    %591 = arith.cmpf ogt, %589, %590 : vector<8x8xf32>
    %cst_120 = arith.constant 2.000000e-01 : f32
    %592 = vector.broadcast %cst_120 : f32 to vector<8x8xf32>
    %593 = arith.mulf %592, %589 : vector<8x8xf32>
    %594 = arith.select %591, %589, %593 : vector<8x8xi1>, vector<8x8xf32>
    %595 = vector.extract_strided_slice %548 {offsets = [0, 2], sizes = [1, 1], strides = [1, 1]} : vector<1x32xf32> to vector<1x1xf32>
    %596 = vector.broadcast %595 : vector<1x1xf32> to vector<8x8xf32>
    %597 = arith.mulf %596, %594 : vector<8x8xf32>
    %598 = arith.addf %584, %597 : vector<8x8xf32>
    %599 = vector.extract_strided_slice %554 {offsets = [0, 3], sizes = [8, 1], strides = [1, 1]} : vector<8x32xf32> to vector<8x1xf32>
    %600 = vector.extract_strided_slice %555 {offsets = [3, 0], sizes = [1, 8], strides = [1, 1]} : vector<32x8xf32> to vector<1x8xf32>
    %601 = vector.broadcast %599 : vector<8x1xf32> to vector<8x8xf32>
    %602 = vector.broadcast %600 : vector<1x8xf32> to vector<8x8xf32>
    %603 = arith.addf %601, %602 : vector<8x8xf32>
    %cst_121 = arith.constant 0.000000e+00 : f32
    %604 = vector.broadcast %cst_121 : f32 to vector<8x8xf32>
    %605 = arith.cmpf ogt, %603, %604 : vector<8x8xf32>
    %cst_122 = arith.constant 2.000000e-01 : f32
    %606 = vector.broadcast %cst_122 : f32 to vector<8x8xf32>
    %607 = arith.mulf %606, %603 : vector<8x8xf32>
    %608 = arith.select %605, %603, %607 : vector<8x8xi1>, vector<8x8xf32>
    %609 = vector.extract_strided_slice %548 {offsets = [0, 3], sizes = [1, 1], strides = [1, 1]} : vector<1x32xf32> to vector<1x1xf32>
    %610 = vector.broadcast %609 : vector<1x1xf32> to vector<8x8xf32>
    %611 = arith.mulf %610, %608 : vector<8x8xf32>
    %612 = arith.addf %598, %611 : vector<8x8xf32>
    %613 = vector.extract_strided_slice %554 {offsets = [0, 4], sizes = [8, 1], strides = [1, 1]} : vector<8x32xf32> to vector<8x1xf32>
    %614 = vector.extract_strided_slice %555 {offsets = [4, 0], sizes = [1, 8], strides = [1, 1]} : vector<32x8xf32> to vector<1x8xf32>
    %615 = vector.broadcast %613 : vector<8x1xf32> to vector<8x8xf32>
    %616 = vector.broadcast %614 : vector<1x8xf32> to vector<8x8xf32>
    %617 = arith.addf %615, %616 : vector<8x8xf32>
    %cst_123 = arith.constant 0.000000e+00 : f32
    %618 = vector.broadcast %cst_123 : f32 to vector<8x8xf32>
    %619 = arith.cmpf ogt, %617, %618 : vector<8x8xf32>
    %cst_124 = arith.constant 2.000000e-01 : f32
    %620 = vector.broadcast %cst_124 : f32 to vector<8x8xf32>
    %621 = arith.mulf %620, %617 : vector<8x8xf32>
    %622 = arith.select %619, %617, %621 : vector<8x8xi1>, vector<8x8xf32>
    %623 = vector.extract_strided_slice %548 {offsets = [0, 4], sizes = [1, 1], strides = [1, 1]} : vector<1x32xf32> to vector<1x1xf32>
    %624 = vector.broadcast %623 : vector<1x1xf32> to vector<8x8xf32>
    %625 = arith.mulf %624, %622 : vector<8x8xf32>
    %626 = arith.addf %612, %625 : vector<8x8xf32>
    %627 = vector.extract_strided_slice %554 {offsets = [0, 5], sizes = [8, 1], strides = [1, 1]} : vector<8x32xf32> to vector<8x1xf32>
    %628 = vector.extract_strided_slice %555 {offsets = [5, 0], sizes = [1, 8], strides = [1, 1]} : vector<32x8xf32> to vector<1x8xf32>
    %629 = vector.broadcast %627 : vector<8x1xf32> to vector<8x8xf32>
    %630 = vector.broadcast %628 : vector<1x8xf32> to vector<8x8xf32>
    %631 = arith.addf %629, %630 : vector<8x8xf32>
    %cst_125 = arith.constant 0.000000e+00 : f32
    %632 = vector.broadcast %cst_125 : f32 to vector<8x8xf32>
    %633 = arith.cmpf ogt, %631, %632 : vector<8x8xf32>
    %cst_126 = arith.constant 2.000000e-01 : f32
    %634 = vector.broadcast %cst_126 : f32 to vector<8x8xf32>
    %635 = arith.mulf %634, %631 : vector<8x8xf32>
    %636 = arith.select %633, %631, %635 : vector<8x8xi1>, vector<8x8xf32>
    %637 = vector.extract_strided_slice %548 {offsets = [0, 5], sizes = [1, 1], strides = [1, 1]} : vector<1x32xf32> to vector<1x1xf32>
    %638 = vector.broadcast %637 : vector<1x1xf32> to vector<8x8xf32>
    %639 = arith.mulf %638, %636 : vector<8x8xf32>
    %640 = arith.addf %626, %639 : vector<8x8xf32>
    %641 = vector.extract_strided_slice %554 {offsets = [0, 6], sizes = [8, 1], strides = [1, 1]} : vector<8x32xf32> to vector<8x1xf32>
    %642 = vector.extract_strided_slice %555 {offsets = [6, 0], sizes = [1, 8], strides = [1, 1]} : vector<32x8xf32> to vector<1x8xf32>
    %643 = vector.broadcast %641 : vector<8x1xf32> to vector<8x8xf32>
    %644 = vector.broadcast %642 : vector<1x8xf32> to vector<8x8xf32>
    %645 = arith.addf %643, %644 : vector<8x8xf32>
    %cst_127 = arith.constant 0.000000e+00 : f32
    %646 = vector.broadcast %cst_127 : f32 to vector<8x8xf32>
    %647 = arith.cmpf ogt, %645, %646 : vector<8x8xf32>
    %cst_128 = arith.constant 2.000000e-01 : f32
    %648 = vector.broadcast %cst_128 : f32 to vector<8x8xf32>
    %649 = arith.mulf %648, %645 : vector<8x8xf32>
    %650 = arith.select %647, %645, %649 : vector<8x8xi1>, vector<8x8xf32>
    %651 = vector.extract_strided_slice %548 {offsets = [0, 6], sizes = [1, 1], strides = [1, 1]} : vector<1x32xf32> to vector<1x1xf32>
    %652 = vector.broadcast %651 : vector<1x1xf32> to vector<8x8xf32>
    %653 = arith.mulf %652, %650 : vector<8x8xf32>
    %654 = arith.addf %640, %653 : vector<8x8xf32>
    %655 = vector.extract_strided_slice %554 {offsets = [0, 7], sizes = [8, 1], strides = [1, 1]} : vector<8x32xf32> to vector<8x1xf32>
    %656 = vector.extract_strided_slice %555 {offsets = [7, 0], sizes = [1, 8], strides = [1, 1]} : vector<32x8xf32> to vector<1x8xf32>
    %657 = vector.broadcast %655 : vector<8x1xf32> to vector<8x8xf32>
    %658 = vector.broadcast %656 : vector<1x8xf32> to vector<8x8xf32>
    %659 = arith.addf %657, %658 : vector<8x8xf32>
    %cst_129 = arith.constant 0.000000e+00 : f32
    %660 = vector.broadcast %cst_129 : f32 to vector<8x8xf32>
    %661 = arith.cmpf ogt, %659, %660 : vector<8x8xf32>
    %cst_130 = arith.constant 2.000000e-01 : f32
    %662 = vector.broadcast %cst_130 : f32 to vector<8x8xf32>
    %663 = arith.mulf %662, %659 : vector<8x8xf32>
    %664 = arith.select %661, %659, %663 : vector<8x8xi1>, vector<8x8xf32>
    %665 = vector.extract_strided_slice %548 {offsets = [0, 7], sizes = [1, 1], strides = [1, 1]} : vector<1x32xf32> to vector<1x1xf32>
    %666 = vector.broadcast %665 : vector<1x1xf32> to vector<8x8xf32>
    %667 = arith.mulf %666, %664 : vector<8x8xf32>
    %668 = arith.addf %654, %667 : vector<8x8xf32>
    %669 = vector.extract_strided_slice %554 {offsets = [0, 8], sizes = [8, 1], strides = [1, 1]} : vector<8x32xf32> to vector<8x1xf32>
    %670 = vector.extract_strided_slice %555 {offsets = [8, 0], sizes = [1, 8], strides = [1, 1]} : vector<32x8xf32> to vector<1x8xf32>
    %671 = vector.broadcast %669 : vector<8x1xf32> to vector<8x8xf32>
    %672 = vector.broadcast %670 : vector<1x8xf32> to vector<8x8xf32>
    %673 = arith.addf %671, %672 : vector<8x8xf32>
    %cst_131 = arith.constant 0.000000e+00 : f32
    %674 = vector.broadcast %cst_131 : f32 to vector<8x8xf32>
    %675 = arith.cmpf ogt, %673, %674 : vector<8x8xf32>
    %cst_132 = arith.constant 2.000000e-01 : f32
    %676 = vector.broadcast %cst_132 : f32 to vector<8x8xf32>
    %677 = arith.mulf %676, %673 : vector<8x8xf32>
    %678 = arith.select %675, %673, %677 : vector<8x8xi1>, vector<8x8xf32>
    %679 = vector.extract_strided_slice %548 {offsets = [0, 8], sizes = [1, 1], strides = [1, 1]} : vector<1x32xf32> to vector<1x1xf32>
    %680 = vector.broadcast %679 : vector<1x1xf32> to vector<8x8xf32>
    %681 = arith.mulf %680, %678 : vector<8x8xf32>
    %682 = arith.addf %668, %681 : vector<8x8xf32>
    %683 = vector.extract_strided_slice %554 {offsets = [0, 9], sizes = [8, 1], strides = [1, 1]} : vector<8x32xf32> to vector<8x1xf32>
    %684 = vector.extract_strided_slice %555 {offsets = [9, 0], sizes = [1, 8], strides = [1, 1]} : vector<32x8xf32> to vector<1x8xf32>
    %685 = vector.broadcast %683 : vector<8x1xf32> to vector<8x8xf32>
    %686 = vector.broadcast %684 : vector<1x8xf32> to vector<8x8xf32>
    %687 = arith.addf %685, %686 : vector<8x8xf32>
    %cst_133 = arith.constant 0.000000e+00 : f32
    %688 = vector.broadcast %cst_133 : f32 to vector<8x8xf32>
    %689 = arith.cmpf ogt, %687, %688 : vector<8x8xf32>
    %cst_134 = arith.constant 2.000000e-01 : f32
    %690 = vector.broadcast %cst_134 : f32 to vector<8x8xf32>
    %691 = arith.mulf %690, %687 : vector<8x8xf32>
    %692 = arith.select %689, %687, %691 : vector<8x8xi1>, vector<8x8xf32>
    %693 = vector.extract_strided_slice %548 {offsets = [0, 9], sizes = [1, 1], strides = [1, 1]} : vector<1x32xf32> to vector<1x1xf32>
    %694 = vector.broadcast %693 : vector<1x1xf32> to vector<8x8xf32>
    %695 = arith.mulf %694, %692 : vector<8x8xf32>
    %696 = arith.addf %682, %695 : vector<8x8xf32>
    %697 = vector.extract_strided_slice %554 {offsets = [0, 10], sizes = [8, 1], strides = [1, 1]} : vector<8x32xf32> to vector<8x1xf32>
    %698 = vector.extract_strided_slice %555 {offsets = [10, 0], sizes = [1, 8], strides = [1, 1]} : vector<32x8xf32> to vector<1x8xf32>
    %699 = vector.broadcast %697 : vector<8x1xf32> to vector<8x8xf32>
    %700 = vector.broadcast %698 : vector<1x8xf32> to vector<8x8xf32>
    %701 = arith.addf %699, %700 : vector<8x8xf32>
    %cst_135 = arith.constant 0.000000e+00 : f32
    %702 = vector.broadcast %cst_135 : f32 to vector<8x8xf32>
    %703 = arith.cmpf ogt, %701, %702 : vector<8x8xf32>
    %cst_136 = arith.constant 2.000000e-01 : f32
    %704 = vector.broadcast %cst_136 : f32 to vector<8x8xf32>
    %705 = arith.mulf %704, %701 : vector<8x8xf32>
    %706 = arith.select %703, %701, %705 : vector<8x8xi1>, vector<8x8xf32>
    %707 = vector.extract_strided_slice %548 {offsets = [0, 10], sizes = [1, 1], strides = [1, 1]} : vector<1x32xf32> to vector<1x1xf32>
    %708 = vector.broadcast %707 : vector<1x1xf32> to vector<8x8xf32>
    %709 = arith.mulf %708, %706 : vector<8x8xf32>
    %710 = arith.addf %696, %709 : vector<8x8xf32>
    %711 = vector.extract_strided_slice %554 {offsets = [0, 11], sizes = [8, 1], strides = [1, 1]} : vector<8x32xf32> to vector<8x1xf32>
    %712 = vector.extract_strided_slice %555 {offsets = [11, 0], sizes = [1, 8], strides = [1, 1]} : vector<32x8xf32> to vector<1x8xf32>
    %713 = vector.broadcast %711 : vector<8x1xf32> to vector<8x8xf32>
    %714 = vector.broadcast %712 : vector<1x8xf32> to vector<8x8xf32>
    %715 = arith.addf %713, %714 : vector<8x8xf32>
    %cst_137 = arith.constant 0.000000e+00 : f32
    %716 = vector.broadcast %cst_137 : f32 to vector<8x8xf32>
    %717 = arith.cmpf ogt, %715, %716 : vector<8x8xf32>
    %cst_138 = arith.constant 2.000000e-01 : f32
    %718 = vector.broadcast %cst_138 : f32 to vector<8x8xf32>
    %719 = arith.mulf %718, %715 : vector<8x8xf32>
    %720 = arith.select %717, %715, %719 : vector<8x8xi1>, vector<8x8xf32>
    %721 = vector.extract_strided_slice %548 {offsets = [0, 11], sizes = [1, 1], strides = [1, 1]} : vector<1x32xf32> to vector<1x1xf32>
    %722 = vector.broadcast %721 : vector<1x1xf32> to vector<8x8xf32>
    %723 = arith.mulf %722, %720 : vector<8x8xf32>
    %724 = arith.addf %710, %723 : vector<8x8xf32>
    %725 = vector.extract_strided_slice %554 {offsets = [0, 12], sizes = [8, 1], strides = [1, 1]} : vector<8x32xf32> to vector<8x1xf32>
    %726 = vector.extract_strided_slice %555 {offsets = [12, 0], sizes = [1, 8], strides = [1, 1]} : vector<32x8xf32> to vector<1x8xf32>
    %727 = vector.broadcast %725 : vector<8x1xf32> to vector<8x8xf32>
    %728 = vector.broadcast %726 : vector<1x8xf32> to vector<8x8xf32>
    %729 = arith.addf %727, %728 : vector<8x8xf32>
    %cst_139 = arith.constant 0.000000e+00 : f32
    %730 = vector.broadcast %cst_139 : f32 to vector<8x8xf32>
    %731 = arith.cmpf ogt, %729, %730 : vector<8x8xf32>
    %cst_140 = arith.constant 2.000000e-01 : f32
    %732 = vector.broadcast %cst_140 : f32 to vector<8x8xf32>
    %733 = arith.mulf %732, %729 : vector<8x8xf32>
    %734 = arith.select %731, %729, %733 : vector<8x8xi1>, vector<8x8xf32>
    %735 = vector.extract_strided_slice %548 {offsets = [0, 12], sizes = [1, 1], strides = [1, 1]} : vector<1x32xf32> to vector<1x1xf32>
    %736 = vector.broadcast %735 : vector<1x1xf32> to vector<8x8xf32>
    %737 = arith.mulf %736, %734 : vector<8x8xf32>
    %738 = arith.addf %724, %737 : vector<8x8xf32>
    %739 = vector.extract_strided_slice %554 {offsets = [0, 13], sizes = [8, 1], strides = [1, 1]} : vector<8x32xf32> to vector<8x1xf32>
    %740 = vector.extract_strided_slice %555 {offsets = [13, 0], sizes = [1, 8], strides = [1, 1]} : vector<32x8xf32> to vector<1x8xf32>
    %741 = vector.broadcast %739 : vector<8x1xf32> to vector<8x8xf32>
    %742 = vector.broadcast %740 : vector<1x8xf32> to vector<8x8xf32>
    %743 = arith.addf %741, %742 : vector<8x8xf32>
    %cst_141 = arith.constant 0.000000e+00 : f32
    %744 = vector.broadcast %cst_141 : f32 to vector<8x8xf32>
    %745 = arith.cmpf ogt, %743, %744 : vector<8x8xf32>
    %cst_142 = arith.constant 2.000000e-01 : f32
    %746 = vector.broadcast %cst_142 : f32 to vector<8x8xf32>
    %747 = arith.mulf %746, %743 : vector<8x8xf32>
    %748 = arith.select %745, %743, %747 : vector<8x8xi1>, vector<8x8xf32>
    %749 = vector.extract_strided_slice %548 {offsets = [0, 13], sizes = [1, 1], strides = [1, 1]} : vector<1x32xf32> to vector<1x1xf32>
    %750 = vector.broadcast %749 : vector<1x1xf32> to vector<8x8xf32>
    %751 = arith.mulf %750, %748 : vector<8x8xf32>
    %752 = arith.addf %738, %751 : vector<8x8xf32>
    %753 = vector.extract_strided_slice %554 {offsets = [0, 14], sizes = [8, 1], strides = [1, 1]} : vector<8x32xf32> to vector<8x1xf32>
    %754 = vector.extract_strided_slice %555 {offsets = [14, 0], sizes = [1, 8], strides = [1, 1]} : vector<32x8xf32> to vector<1x8xf32>
    %755 = vector.broadcast %753 : vector<8x1xf32> to vector<8x8xf32>
    %756 = vector.broadcast %754 : vector<1x8xf32> to vector<8x8xf32>
    %757 = arith.addf %755, %756 : vector<8x8xf32>
    %cst_143 = arith.constant 0.000000e+00 : f32
    %758 = vector.broadcast %cst_143 : f32 to vector<8x8xf32>
    %759 = arith.cmpf ogt, %757, %758 : vector<8x8xf32>
    %cst_144 = arith.constant 2.000000e-01 : f32
    %760 = vector.broadcast %cst_144 : f32 to vector<8x8xf32>
    %761 = arith.mulf %760, %757 : vector<8x8xf32>
    %762 = arith.select %759, %757, %761 : vector<8x8xi1>, vector<8x8xf32>
    %763 = vector.extract_strided_slice %548 {offsets = [0, 14], sizes = [1, 1], strides = [1, 1]} : vector<1x32xf32> to vector<1x1xf32>
    %764 = vector.broadcast %763 : vector<1x1xf32> to vector<8x8xf32>
    %765 = arith.mulf %764, %762 : vector<8x8xf32>
    %766 = arith.addf %752, %765 : vector<8x8xf32>
    %767 = vector.extract_strided_slice %554 {offsets = [0, 15], sizes = [8, 1], strides = [1, 1]} : vector<8x32xf32> to vector<8x1xf32>
    %768 = vector.extract_strided_slice %555 {offsets = [15, 0], sizes = [1, 8], strides = [1, 1]} : vector<32x8xf32> to vector<1x8xf32>
    %769 = vector.broadcast %767 : vector<8x1xf32> to vector<8x8xf32>
    %770 = vector.broadcast %768 : vector<1x8xf32> to vector<8x8xf32>
    %771 = arith.addf %769, %770 : vector<8x8xf32>
    %cst_145 = arith.constant 0.000000e+00 : f32
    %772 = vector.broadcast %cst_145 : f32 to vector<8x8xf32>
    %773 = arith.cmpf ogt, %771, %772 : vector<8x8xf32>
    %cst_146 = arith.constant 2.000000e-01 : f32
    %774 = vector.broadcast %cst_146 : f32 to vector<8x8xf32>
    %775 = arith.mulf %774, %771 : vector<8x8xf32>
    %776 = arith.select %773, %771, %775 : vector<8x8xi1>, vector<8x8xf32>
    %777 = vector.extract_strided_slice %548 {offsets = [0, 15], sizes = [1, 1], strides = [1, 1]} : vector<1x32xf32> to vector<1x1xf32>
    %778 = vector.broadcast %777 : vector<1x1xf32> to vector<8x8xf32>
    %779 = arith.mulf %778, %776 : vector<8x8xf32>
    %780 = arith.addf %766, %779 : vector<8x8xf32>
    %781 = vector.extract_strided_slice %554 {offsets = [0, 16], sizes = [8, 1], strides = [1, 1]} : vector<8x32xf32> to vector<8x1xf32>
    %782 = vector.extract_strided_slice %555 {offsets = [16, 0], sizes = [1, 8], strides = [1, 1]} : vector<32x8xf32> to vector<1x8xf32>
    %783 = vector.broadcast %781 : vector<8x1xf32> to vector<8x8xf32>
    %784 = vector.broadcast %782 : vector<1x8xf32> to vector<8x8xf32>
    %785 = arith.addf %783, %784 : vector<8x8xf32>
    %cst_147 = arith.constant 0.000000e+00 : f32
    %786 = vector.broadcast %cst_147 : f32 to vector<8x8xf32>
    %787 = arith.cmpf ogt, %785, %786 : vector<8x8xf32>
    %cst_148 = arith.constant 2.000000e-01 : f32
    %788 = vector.broadcast %cst_148 : f32 to vector<8x8xf32>
    %789 = arith.mulf %788, %785 : vector<8x8xf32>
    %790 = arith.select %787, %785, %789 : vector<8x8xi1>, vector<8x8xf32>
    %791 = vector.extract_strided_slice %548 {offsets = [0, 16], sizes = [1, 1], strides = [1, 1]} : vector<1x32xf32> to vector<1x1xf32>
    %792 = vector.broadcast %791 : vector<1x1xf32> to vector<8x8xf32>
    %793 = arith.mulf %792, %790 : vector<8x8xf32>
    %794 = arith.addf %780, %793 : vector<8x8xf32>
    %795 = vector.extract_strided_slice %554 {offsets = [0, 17], sizes = [8, 1], strides = [1, 1]} : vector<8x32xf32> to vector<8x1xf32>
    %796 = vector.extract_strided_slice %555 {offsets = [17, 0], sizes = [1, 8], strides = [1, 1]} : vector<32x8xf32> to vector<1x8xf32>
    %797 = vector.broadcast %795 : vector<8x1xf32> to vector<8x8xf32>
    %798 = vector.broadcast %796 : vector<1x8xf32> to vector<8x8xf32>
    %799 = arith.addf %797, %798 : vector<8x8xf32>
    %cst_149 = arith.constant 0.000000e+00 : f32
    %800 = vector.broadcast %cst_149 : f32 to vector<8x8xf32>
    %801 = arith.cmpf ogt, %799, %800 : vector<8x8xf32>
    %cst_150 = arith.constant 2.000000e-01 : f32
    %802 = vector.broadcast %cst_150 : f32 to vector<8x8xf32>
    %803 = arith.mulf %802, %799 : vector<8x8xf32>
    %804 = arith.select %801, %799, %803 : vector<8x8xi1>, vector<8x8xf32>
    %805 = vector.extract_strided_slice %548 {offsets = [0, 17], sizes = [1, 1], strides = [1, 1]} : vector<1x32xf32> to vector<1x1xf32>
    %806 = vector.broadcast %805 : vector<1x1xf32> to vector<8x8xf32>
    %807 = arith.mulf %806, %804 : vector<8x8xf32>
    %808 = arith.addf %794, %807 : vector<8x8xf32>
    %809 = vector.extract_strided_slice %554 {offsets = [0, 18], sizes = [8, 1], strides = [1, 1]} : vector<8x32xf32> to vector<8x1xf32>
    %810 = vector.extract_strided_slice %555 {offsets = [18, 0], sizes = [1, 8], strides = [1, 1]} : vector<32x8xf32> to vector<1x8xf32>
    %811 = vector.broadcast %809 : vector<8x1xf32> to vector<8x8xf32>
    %812 = vector.broadcast %810 : vector<1x8xf32> to vector<8x8xf32>
    %813 = arith.addf %811, %812 : vector<8x8xf32>
    %cst_151 = arith.constant 0.000000e+00 : f32
    %814 = vector.broadcast %cst_151 : f32 to vector<8x8xf32>
    %815 = arith.cmpf ogt, %813, %814 : vector<8x8xf32>
    %cst_152 = arith.constant 2.000000e-01 : f32
    %816 = vector.broadcast %cst_152 : f32 to vector<8x8xf32>
    %817 = arith.mulf %816, %813 : vector<8x8xf32>
    %818 = arith.select %815, %813, %817 : vector<8x8xi1>, vector<8x8xf32>
    %819 = vector.extract_strided_slice %548 {offsets = [0, 18], sizes = [1, 1], strides = [1, 1]} : vector<1x32xf32> to vector<1x1xf32>
    %820 = vector.broadcast %819 : vector<1x1xf32> to vector<8x8xf32>
    %821 = arith.mulf %820, %818 : vector<8x8xf32>
    %822 = arith.addf %808, %821 : vector<8x8xf32>
    %823 = vector.extract_strided_slice %554 {offsets = [0, 19], sizes = [8, 1], strides = [1, 1]} : vector<8x32xf32> to vector<8x1xf32>
    %824 = vector.extract_strided_slice %555 {offsets = [19, 0], sizes = [1, 8], strides = [1, 1]} : vector<32x8xf32> to vector<1x8xf32>
    %825 = vector.broadcast %823 : vector<8x1xf32> to vector<8x8xf32>
    %826 = vector.broadcast %824 : vector<1x8xf32> to vector<8x8xf32>
    %827 = arith.addf %825, %826 : vector<8x8xf32>
    %cst_153 = arith.constant 0.000000e+00 : f32
    %828 = vector.broadcast %cst_153 : f32 to vector<8x8xf32>
    %829 = arith.cmpf ogt, %827, %828 : vector<8x8xf32>
    %cst_154 = arith.constant 2.000000e-01 : f32
    %830 = vector.broadcast %cst_154 : f32 to vector<8x8xf32>
    %831 = arith.mulf %830, %827 : vector<8x8xf32>
    %832 = arith.select %829, %827, %831 : vector<8x8xi1>, vector<8x8xf32>
    %833 = vector.extract_strided_slice %548 {offsets = [0, 19], sizes = [1, 1], strides = [1, 1]} : vector<1x32xf32> to vector<1x1xf32>
    %834 = vector.broadcast %833 : vector<1x1xf32> to vector<8x8xf32>
    %835 = arith.mulf %834, %832 : vector<8x8xf32>
    %836 = arith.addf %822, %835 : vector<8x8xf32>
    %837 = vector.extract_strided_slice %554 {offsets = [0, 20], sizes = [8, 1], strides = [1, 1]} : vector<8x32xf32> to vector<8x1xf32>
    %838 = vector.extract_strided_slice %555 {offsets = [20, 0], sizes = [1, 8], strides = [1, 1]} : vector<32x8xf32> to vector<1x8xf32>
    %839 = vector.broadcast %837 : vector<8x1xf32> to vector<8x8xf32>
    %840 = vector.broadcast %838 : vector<1x8xf32> to vector<8x8xf32>
    %841 = arith.addf %839, %840 : vector<8x8xf32>
    %cst_155 = arith.constant 0.000000e+00 : f32
    %842 = vector.broadcast %cst_155 : f32 to vector<8x8xf32>
    %843 = arith.cmpf ogt, %841, %842 : vector<8x8xf32>
    %cst_156 = arith.constant 2.000000e-01 : f32
    %844 = vector.broadcast %cst_156 : f32 to vector<8x8xf32>
    %845 = arith.mulf %844, %841 : vector<8x8xf32>
    %846 = arith.select %843, %841, %845 : vector<8x8xi1>, vector<8x8xf32>
    %847 = vector.extract_strided_slice %548 {offsets = [0, 20], sizes = [1, 1], strides = [1, 1]} : vector<1x32xf32> to vector<1x1xf32>
    %848 = vector.broadcast %847 : vector<1x1xf32> to vector<8x8xf32>
    %849 = arith.mulf %848, %846 : vector<8x8xf32>
    %850 = arith.addf %836, %849 : vector<8x8xf32>
    %851 = vector.extract_strided_slice %554 {offsets = [0, 21], sizes = [8, 1], strides = [1, 1]} : vector<8x32xf32> to vector<8x1xf32>
    %852 = vector.extract_strided_slice %555 {offsets = [21, 0], sizes = [1, 8], strides = [1, 1]} : vector<32x8xf32> to vector<1x8xf32>
    %853 = vector.broadcast %851 : vector<8x1xf32> to vector<8x8xf32>
    %854 = vector.broadcast %852 : vector<1x8xf32> to vector<8x8xf32>
    %855 = arith.addf %853, %854 : vector<8x8xf32>
    %cst_157 = arith.constant 0.000000e+00 : f32
    %856 = vector.broadcast %cst_157 : f32 to vector<8x8xf32>
    %857 = arith.cmpf ogt, %855, %856 : vector<8x8xf32>
    %cst_158 = arith.constant 2.000000e-01 : f32
    %858 = vector.broadcast %cst_158 : f32 to vector<8x8xf32>
    %859 = arith.mulf %858, %855 : vector<8x8xf32>
    %860 = arith.select %857, %855, %859 : vector<8x8xi1>, vector<8x8xf32>
    %861 = vector.extract_strided_slice %548 {offsets = [0, 21], sizes = [1, 1], strides = [1, 1]} : vector<1x32xf32> to vector<1x1xf32>
    %862 = vector.broadcast %861 : vector<1x1xf32> to vector<8x8xf32>
    %863 = arith.mulf %862, %860 : vector<8x8xf32>
    %864 = arith.addf %850, %863 : vector<8x8xf32>
    %865 = vector.extract_strided_slice %554 {offsets = [0, 22], sizes = [8, 1], strides = [1, 1]} : vector<8x32xf32> to vector<8x1xf32>
    %866 = vector.extract_strided_slice %555 {offsets = [22, 0], sizes = [1, 8], strides = [1, 1]} : vector<32x8xf32> to vector<1x8xf32>
    %867 = vector.broadcast %865 : vector<8x1xf32> to vector<8x8xf32>
    %868 = vector.broadcast %866 : vector<1x8xf32> to vector<8x8xf32>
    %869 = arith.addf %867, %868 : vector<8x8xf32>
    %cst_159 = arith.constant 0.000000e+00 : f32
    %870 = vector.broadcast %cst_159 : f32 to vector<8x8xf32>
    %871 = arith.cmpf ogt, %869, %870 : vector<8x8xf32>
    %cst_160 = arith.constant 2.000000e-01 : f32
    %872 = vector.broadcast %cst_160 : f32 to vector<8x8xf32>
    %873 = arith.mulf %872, %869 : vector<8x8xf32>
    %874 = arith.select %871, %869, %873 : vector<8x8xi1>, vector<8x8xf32>
    %875 = vector.extract_strided_slice %548 {offsets = [0, 22], sizes = [1, 1], strides = [1, 1]} : vector<1x32xf32> to vector<1x1xf32>
    %876 = vector.broadcast %875 : vector<1x1xf32> to vector<8x8xf32>
    %877 = arith.mulf %876, %874 : vector<8x8xf32>
    %878 = arith.addf %864, %877 : vector<8x8xf32>
    %879 = vector.extract_strided_slice %554 {offsets = [0, 23], sizes = [8, 1], strides = [1, 1]} : vector<8x32xf32> to vector<8x1xf32>
    %880 = vector.extract_strided_slice %555 {offsets = [23, 0], sizes = [1, 8], strides = [1, 1]} : vector<32x8xf32> to vector<1x8xf32>
    %881 = vector.broadcast %879 : vector<8x1xf32> to vector<8x8xf32>
    %882 = vector.broadcast %880 : vector<1x8xf32> to vector<8x8xf32>
    %883 = arith.addf %881, %882 : vector<8x8xf32>
    %cst_161 = arith.constant 0.000000e+00 : f32
    %884 = vector.broadcast %cst_161 : f32 to vector<8x8xf32>
    %885 = arith.cmpf ogt, %883, %884 : vector<8x8xf32>
    %cst_162 = arith.constant 2.000000e-01 : f32
    %886 = vector.broadcast %cst_162 : f32 to vector<8x8xf32>
    %887 = arith.mulf %886, %883 : vector<8x8xf32>
    %888 = arith.select %885, %883, %887 : vector<8x8xi1>, vector<8x8xf32>
    %889 = vector.extract_strided_slice %548 {offsets = [0, 23], sizes = [1, 1], strides = [1, 1]} : vector<1x32xf32> to vector<1x1xf32>
    %890 = vector.broadcast %889 : vector<1x1xf32> to vector<8x8xf32>
    %891 = arith.mulf %890, %888 : vector<8x8xf32>
    %892 = arith.addf %878, %891 : vector<8x8xf32>
    %893 = vector.extract_strided_slice %554 {offsets = [0, 24], sizes = [8, 1], strides = [1, 1]} : vector<8x32xf32> to vector<8x1xf32>
    %894 = vector.extract_strided_slice %555 {offsets = [24, 0], sizes = [1, 8], strides = [1, 1]} : vector<32x8xf32> to vector<1x8xf32>
    %895 = vector.broadcast %893 : vector<8x1xf32> to vector<8x8xf32>
    %896 = vector.broadcast %894 : vector<1x8xf32> to vector<8x8xf32>
    %897 = arith.addf %895, %896 : vector<8x8xf32>
    %cst_163 = arith.constant 0.000000e+00 : f32
    %898 = vector.broadcast %cst_163 : f32 to vector<8x8xf32>
    %899 = arith.cmpf ogt, %897, %898 : vector<8x8xf32>
    %cst_164 = arith.constant 2.000000e-01 : f32
    %900 = vector.broadcast %cst_164 : f32 to vector<8x8xf32>
    %901 = arith.mulf %900, %897 : vector<8x8xf32>
    %902 = arith.select %899, %897, %901 : vector<8x8xi1>, vector<8x8xf32>
    %903 = vector.extract_strided_slice %548 {offsets = [0, 24], sizes = [1, 1], strides = [1, 1]} : vector<1x32xf32> to vector<1x1xf32>
    %904 = vector.broadcast %903 : vector<1x1xf32> to vector<8x8xf32>
    %905 = arith.mulf %904, %902 : vector<8x8xf32>
    %906 = arith.addf %892, %905 : vector<8x8xf32>
    %907 = vector.extract_strided_slice %554 {offsets = [0, 25], sizes = [8, 1], strides = [1, 1]} : vector<8x32xf32> to vector<8x1xf32>
    %908 = vector.extract_strided_slice %555 {offsets = [25, 0], sizes = [1, 8], strides = [1, 1]} : vector<32x8xf32> to vector<1x8xf32>
    %909 = vector.broadcast %907 : vector<8x1xf32> to vector<8x8xf32>
    %910 = vector.broadcast %908 : vector<1x8xf32> to vector<8x8xf32>
    %911 = arith.addf %909, %910 : vector<8x8xf32>
    %cst_165 = arith.constant 0.000000e+00 : f32
    %912 = vector.broadcast %cst_165 : f32 to vector<8x8xf32>
    %913 = arith.cmpf ogt, %911, %912 : vector<8x8xf32>
    %cst_166 = arith.constant 2.000000e-01 : f32
    %914 = vector.broadcast %cst_166 : f32 to vector<8x8xf32>
    %915 = arith.mulf %914, %911 : vector<8x8xf32>
    %916 = arith.select %913, %911, %915 : vector<8x8xi1>, vector<8x8xf32>
    %917 = vector.extract_strided_slice %548 {offsets = [0, 25], sizes = [1, 1], strides = [1, 1]} : vector<1x32xf32> to vector<1x1xf32>
    %918 = vector.broadcast %917 : vector<1x1xf32> to vector<8x8xf32>
    %919 = arith.mulf %918, %916 : vector<8x8xf32>
    %920 = arith.addf %906, %919 : vector<8x8xf32>
    %921 = vector.extract_strided_slice %554 {offsets = [0, 26], sizes = [8, 1], strides = [1, 1]} : vector<8x32xf32> to vector<8x1xf32>
    %922 = vector.extract_strided_slice %555 {offsets = [26, 0], sizes = [1, 8], strides = [1, 1]} : vector<32x8xf32> to vector<1x8xf32>
    %923 = vector.broadcast %921 : vector<8x1xf32> to vector<8x8xf32>
    %924 = vector.broadcast %922 : vector<1x8xf32> to vector<8x8xf32>
    %925 = arith.addf %923, %924 : vector<8x8xf32>
    %cst_167 = arith.constant 0.000000e+00 : f32
    %926 = vector.broadcast %cst_167 : f32 to vector<8x8xf32>
    %927 = arith.cmpf ogt, %925, %926 : vector<8x8xf32>
    %cst_168 = arith.constant 2.000000e-01 : f32
    %928 = vector.broadcast %cst_168 : f32 to vector<8x8xf32>
    %929 = arith.mulf %928, %925 : vector<8x8xf32>
    %930 = arith.select %927, %925, %929 : vector<8x8xi1>, vector<8x8xf32>
    %931 = vector.extract_strided_slice %548 {offsets = [0, 26], sizes = [1, 1], strides = [1, 1]} : vector<1x32xf32> to vector<1x1xf32>
    %932 = vector.broadcast %931 : vector<1x1xf32> to vector<8x8xf32>
    %933 = arith.mulf %932, %930 : vector<8x8xf32>
    %934 = arith.addf %920, %933 : vector<8x8xf32>
    %935 = vector.extract_strided_slice %554 {offsets = [0, 27], sizes = [8, 1], strides = [1, 1]} : vector<8x32xf32> to vector<8x1xf32>
    %936 = vector.extract_strided_slice %555 {offsets = [27, 0], sizes = [1, 8], strides = [1, 1]} : vector<32x8xf32> to vector<1x8xf32>
    %937 = vector.broadcast %935 : vector<8x1xf32> to vector<8x8xf32>
    %938 = vector.broadcast %936 : vector<1x8xf32> to vector<8x8xf32>
    %939 = arith.addf %937, %938 : vector<8x8xf32>
    %cst_169 = arith.constant 0.000000e+00 : f32
    %940 = vector.broadcast %cst_169 : f32 to vector<8x8xf32>
    %941 = arith.cmpf ogt, %939, %940 : vector<8x8xf32>
    %cst_170 = arith.constant 2.000000e-01 : f32
    %942 = vector.broadcast %cst_170 : f32 to vector<8x8xf32>
    %943 = arith.mulf %942, %939 : vector<8x8xf32>
    %944 = arith.select %941, %939, %943 : vector<8x8xi1>, vector<8x8xf32>
    %945 = vector.extract_strided_slice %548 {offsets = [0, 27], sizes = [1, 1], strides = [1, 1]} : vector<1x32xf32> to vector<1x1xf32>
    %946 = vector.broadcast %945 : vector<1x1xf32> to vector<8x8xf32>
    %947 = arith.mulf %946, %944 : vector<8x8xf32>
    %948 = arith.addf %934, %947 : vector<8x8xf32>
    %949 = vector.extract_strided_slice %554 {offsets = [0, 28], sizes = [8, 1], strides = [1, 1]} : vector<8x32xf32> to vector<8x1xf32>
    %950 = vector.extract_strided_slice %555 {offsets = [28, 0], sizes = [1, 8], strides = [1, 1]} : vector<32x8xf32> to vector<1x8xf32>
    %951 = vector.broadcast %949 : vector<8x1xf32> to vector<8x8xf32>
    %952 = vector.broadcast %950 : vector<1x8xf32> to vector<8x8xf32>
    %953 = arith.addf %951, %952 : vector<8x8xf32>
    %cst_171 = arith.constant 0.000000e+00 : f32
    %954 = vector.broadcast %cst_171 : f32 to vector<8x8xf32>
    %955 = arith.cmpf ogt, %953, %954 : vector<8x8xf32>
    %cst_172 = arith.constant 2.000000e-01 : f32
    %956 = vector.broadcast %cst_172 : f32 to vector<8x8xf32>
    %957 = arith.mulf %956, %953 : vector<8x8xf32>
    %958 = arith.select %955, %953, %957 : vector<8x8xi1>, vector<8x8xf32>
    %959 = vector.extract_strided_slice %548 {offsets = [0, 28], sizes = [1, 1], strides = [1, 1]} : vector<1x32xf32> to vector<1x1xf32>
    %960 = vector.broadcast %959 : vector<1x1xf32> to vector<8x8xf32>
    %961 = arith.mulf %960, %958 : vector<8x8xf32>
    %962 = arith.addf %948, %961 : vector<8x8xf32>
    %963 = vector.extract_strided_slice %554 {offsets = [0, 29], sizes = [8, 1], strides = [1, 1]} : vector<8x32xf32> to vector<8x1xf32>
    %964 = vector.extract_strided_slice %555 {offsets = [29, 0], sizes = [1, 8], strides = [1, 1]} : vector<32x8xf32> to vector<1x8xf32>
    %965 = vector.broadcast %963 : vector<8x1xf32> to vector<8x8xf32>
    %966 = vector.broadcast %964 : vector<1x8xf32> to vector<8x8xf32>
    %967 = arith.addf %965, %966 : vector<8x8xf32>
    %cst_173 = arith.constant 0.000000e+00 : f32
    %968 = vector.broadcast %cst_173 : f32 to vector<8x8xf32>
    %969 = arith.cmpf ogt, %967, %968 : vector<8x8xf32>
    %cst_174 = arith.constant 2.000000e-01 : f32
    %970 = vector.broadcast %cst_174 : f32 to vector<8x8xf32>
    %971 = arith.mulf %970, %967 : vector<8x8xf32>
    %972 = arith.select %969, %967, %971 : vector<8x8xi1>, vector<8x8xf32>
    %973 = vector.extract_strided_slice %548 {offsets = [0, 29], sizes = [1, 1], strides = [1, 1]} : vector<1x32xf32> to vector<1x1xf32>
    %974 = vector.broadcast %973 : vector<1x1xf32> to vector<8x8xf32>
    %975 = arith.mulf %974, %972 : vector<8x8xf32>
    %976 = arith.addf %962, %975 : vector<8x8xf32>
    %977 = vector.extract_strided_slice %554 {offsets = [0, 30], sizes = [8, 1], strides = [1, 1]} : vector<8x32xf32> to vector<8x1xf32>
    %978 = vector.extract_strided_slice %555 {offsets = [30, 0], sizes = [1, 8], strides = [1, 1]} : vector<32x8xf32> to vector<1x8xf32>
    %979 = vector.broadcast %977 : vector<8x1xf32> to vector<8x8xf32>
    %980 = vector.broadcast %978 : vector<1x8xf32> to vector<8x8xf32>
    %981 = arith.addf %979, %980 : vector<8x8xf32>
    %cst_175 = arith.constant 0.000000e+00 : f32
    %982 = vector.broadcast %cst_175 : f32 to vector<8x8xf32>
    %983 = arith.cmpf ogt, %981, %982 : vector<8x8xf32>
    %cst_176 = arith.constant 2.000000e-01 : f32
    %984 = vector.broadcast %cst_176 : f32 to vector<8x8xf32>
    %985 = arith.mulf %984, %981 : vector<8x8xf32>
    %986 = arith.select %983, %981, %985 : vector<8x8xi1>, vector<8x8xf32>
    %987 = vector.extract_strided_slice %548 {offsets = [0, 30], sizes = [1, 1], strides = [1, 1]} : vector<1x32xf32> to vector<1x1xf32>
    %988 = vector.broadcast %987 : vector<1x1xf32> to vector<8x8xf32>
    %989 = arith.mulf %988, %986 : vector<8x8xf32>
    %990 = arith.addf %976, %989 : vector<8x8xf32>
    %991 = vector.extract_strided_slice %554 {offsets = [0, 31], sizes = [8, 1], strides = [1, 1]} : vector<8x32xf32> to vector<8x1xf32>
    %992 = vector.extract_strided_slice %555 {offsets = [31, 0], sizes = [1, 8], strides = [1, 1]} : vector<32x8xf32> to vector<1x8xf32>
    %993 = vector.broadcast %991 : vector<8x1xf32> to vector<8x8xf32>
    %994 = vector.broadcast %992 : vector<1x8xf32> to vector<8x8xf32>
    %995 = arith.addf %993, %994 : vector<8x8xf32>
    %cst_177 = arith.constant 0.000000e+00 : f32
    %996 = vector.broadcast %cst_177 : f32 to vector<8x8xf32>
    %997 = arith.cmpf ogt, %995, %996 : vector<8x8xf32>
    %cst_178 = arith.constant 2.000000e-01 : f32
    %998 = vector.broadcast %cst_178 : f32 to vector<8x8xf32>
    %999 = arith.mulf %998, %995 : vector<8x8xf32>
    %1000 = arith.select %997, %995, %999 : vector<8x8xi1>, vector<8x8xf32>
    %1001 = vector.extract_strided_slice %548 {offsets = [0, 31], sizes = [1, 1], strides = [1, 1]} : vector<1x32xf32> to vector<1x1xf32>
    %1002 = vector.broadcast %1001 : vector<1x1xf32> to vector<8x8xf32>
    %1003 = arith.mulf %1002, %1000 : vector<8x8xf32>
    %1004 = arith.addf %990, %1003 : vector<8x8xf32>
    %cst_179 = arith.constant 0.000000e+00 : f32
    %1005 = vector.broadcast %cst_179 : f32 to vector<8x8xf32>
    %1006 = arith.cmpf ogt, %1, %1005 : vector<8x8xf32>
    %cst_180 = arith.constant -1.000000e+30 : f32
    %1007 = vector.broadcast %cst_180 : f32 to vector<8x8xf32>
    %1008 = arith.select %1006, %1004, %1007 : vector<8x8xi1>, vector<8x8xf32>
    %cst_181 = arith.constant dense<0xFF800000> : vector<8xf32>
    %1009 = vector.multi_reduction <maximumf>, %1008, %cst_181 [1] : vector<8x8xf32> to vector<8xf32>
    %1010 = vector.shape_cast %1009 : vector<8xf32> to vector<8x1xf32>
    %1011 = vector.broadcast %1010 : vector<8x1xf32> to vector<8x8xf32>
    %1012 = arith.subf %1008, %1011 : vector<8x8xf32>
    %1013 = math.exp %1012 : vector<8x8xf32>
    %1014 = arith.mulf %1013, %1 : vector<8x8xf32>
    %cst_182 = arith.constant dense<0.000000e+00> : vector<8xf32>
    %1015 = vector.multi_reduction <add>, %1014, %cst_182 [1] : vector<8x8xf32> to vector<8xf32>
    %1016 = vector.shape_cast %1015 : vector<8xf32> to vector<8x1xf32>
    %1017 = tpu.reciprocal %1016 {approx = true} : vector<8x1xf32> -> vector<8x1xf32>
    %1018 = vector.broadcast %1017 : vector<8x1xf32> to vector<8x8xf32>
    %1019 = arith.mulf %1014, %1018 : vector<8x8xf32>
    %cst_183 = arith.constant dense<0.000000e+00> : vector<8x32xf32>
    %1020 = tpu.matmul %1019, %553, %cst_183 {dimension_numbers = #tpu.dot_dimension_numbers<[1], [0], [0], [1], [0, 0, 1, 1], [], []>} : vector<8x8xf32>, vector<8x32xf32>, vector<8x32xf32> -> vector<8x32xf32>
    %1021 = vector.broadcast %549 : vector<1x32xf32> to vector<8x32xf32>
    %1022 = arith.addf %1020, %1021 : vector<8x32xf32>
    %c0_184 = arith.constant 0 : index
    %c0_185 = arith.constant 0 : index
    %1023 = vector.load %arg12[%c0_184, %c0_185] : memref<1x32xf32, #tpu.memory_space<vmem>>, vector<1x32xf32>
    %c0_186 = arith.constant 0 : index
    %c0_187 = arith.constant 0 : index
    %1024 = vector.load %arg13[%c0_186, %c0_187] : memref<1x32xf32, #tpu.memory_space<vmem>>, vector<1x32xf32>
    %1025 = vector.broadcast %1023 : vector<1x32xf32> to vector<8x32xf32>
    %1026 = arith.mulf %1022, %1025 : vector<8x32xf32>
    %1027 = vector.broadcast %1024 : vector<1x32xf32> to vector<8x32xf32>
    %1028 = arith.addf %1026, %1027 : vector<8x32xf32>
    %cst_188 = arith.constant 0.000000e+00 : f32
    %1029 = vector.broadcast %cst_188 : f32 to vector<8x32xf32>
    %1030 = arith.cmpf ogt, %1028, %1029 : vector<8x32xf32>
    %cst_189 = arith.constant 2.000000e-01 : f32
    %1031 = vector.broadcast %cst_189 : f32 to vector<8x32xf32>
    %1032 = arith.mulf %1031, %1028 : vector<8x32xf32>
    %1033 = arith.select %1030, %1028, %1032 : vector<8x32xi1>, vector<8x32xf32>
    %1034 = arith.addf %1033, %545 : vector<8x32xf32>
    %c0_190 = arith.constant 0 : index
    %c0_191 = arith.constant 0 : index
    %1035 = vector.load %arg14[%c0_190, %c0_191] : memref<32x64xf32, #tpu.memory_space<vmem>>, vector<32x64xf32>
    %c0_192 = arith.constant 0 : index
    %c0_193 = arith.constant 0 : index
    %1036 = vector.load %arg15[%c0_192, %c0_193] : memref<1x64xf32, #tpu.memory_space<vmem>>, vector<1x64xf32>
    %c0_194 = arith.constant 0 : index
    %c0_195 = arith.constant 0 : index
    %1037 = vector.load %arg16[%c0_194, %c0_195] : memref<1x32xf32, #tpu.memory_space<vmem>>, vector<1x32xf32>
    %c0_196 = arith.constant 0 : index
    %c0_197 = arith.constant 0 : index
    %1038 = vector.load %arg17[%c0_196, %c0_197] : memref<1x32xf32, #tpu.memory_space<vmem>>, vector<1x32xf32>
    %cst_198 = arith.constant dense<0.000000e+00> : vector<8x64xf32>
    %1039 = tpu.matmul %1034, %1035, %cst_198 {dimension_numbers = #tpu.dot_dimension_numbers<[1], [0], [0], [1], [0, 0, 1, 1], [], []>} : vector<8x32xf32>, vector<32x64xf32>, vector<8x64xf32> -> vector<8x64xf32>
    %1040 = vector.broadcast %1036 : vector<1x64xf32> to vector<8x64xf32>
    %1041 = arith.addf %1039, %1040 : vector<8x64xf32>
    %1042 = vector.extract_strided_slice %1041 {offsets = [0, 0], sizes = [8, 32], strides = [1, 1]} : vector<8x64xf32> to vector<8x32xf32>
    %1043 = vector.extract_strided_slice %1041 {offsets = [0, 32], sizes = [8, 32], strides = [1, 1]} : vector<8x64xf32> to vector<8x32xf32>
    %1044 = tpu.transpose %1042, [1, 0] : vector<8x32xf32> -> vector<32x8xf32>
    %cst_199 = arith.constant 0.000000e+00 : f32
    %1045 = vector.broadcast %cst_199 : f32 to vector<8x8xf32>
    %1046 = vector.extract_strided_slice %1043 {offsets = [0, 0], sizes = [8, 1], strides = [1, 1]} : vector<8x32xf32> to vector<8x1xf32>
    %1047 = vector.extract_strided_slice %1044 {offsets = [0, 0], sizes = [1, 8], strides = [1, 1]} : vector<32x8xf32> to vector<1x8xf32>
    %1048 = vector.broadcast %1046 : vector<8x1xf32> to vector<8x8xf32>
    %1049 = vector.broadcast %1047 : vector<1x8xf32> to vector<8x8xf32>
    %1050 = arith.addf %1048, %1049 : vector<8x8xf32>
    %cst_200 = arith.constant 0.000000e+00 : f32
    %1051 = vector.broadcast %cst_200 : f32 to vector<8x8xf32>
    %1052 = arith.cmpf ogt, %1050, %1051 : vector<8x8xf32>
    %cst_201 = arith.constant 2.000000e-01 : f32
    %1053 = vector.broadcast %cst_201 : f32 to vector<8x8xf32>
    %1054 = arith.mulf %1053, %1050 : vector<8x8xf32>
    %1055 = arith.select %1052, %1050, %1054 : vector<8x8xi1>, vector<8x8xf32>
    %1056 = vector.extract_strided_slice %1037 {offsets = [0, 0], sizes = [1, 1], strides = [1, 1]} : vector<1x32xf32> to vector<1x1xf32>
    %1057 = vector.broadcast %1056 : vector<1x1xf32> to vector<8x8xf32>
    %1058 = arith.mulf %1057, %1055 : vector<8x8xf32>
    %1059 = arith.addf %1045, %1058 : vector<8x8xf32>
    %1060 = vector.extract_strided_slice %1043 {offsets = [0, 1], sizes = [8, 1], strides = [1, 1]} : vector<8x32xf32> to vector<8x1xf32>
    %1061 = vector.extract_strided_slice %1044 {offsets = [1, 0], sizes = [1, 8], strides = [1, 1]} : vector<32x8xf32> to vector<1x8xf32>
    %1062 = vector.broadcast %1060 : vector<8x1xf32> to vector<8x8xf32>
    %1063 = vector.broadcast %1061 : vector<1x8xf32> to vector<8x8xf32>
    %1064 = arith.addf %1062, %1063 : vector<8x8xf32>
    %cst_202 = arith.constant 0.000000e+00 : f32
    %1065 = vector.broadcast %cst_202 : f32 to vector<8x8xf32>
    %1066 = arith.cmpf ogt, %1064, %1065 : vector<8x8xf32>
    %cst_203 = arith.constant 2.000000e-01 : f32
    %1067 = vector.broadcast %cst_203 : f32 to vector<8x8xf32>
    %1068 = arith.mulf %1067, %1064 : vector<8x8xf32>
    %1069 = arith.select %1066, %1064, %1068 : vector<8x8xi1>, vector<8x8xf32>
    %1070 = vector.extract_strided_slice %1037 {offsets = [0, 1], sizes = [1, 1], strides = [1, 1]} : vector<1x32xf32> to vector<1x1xf32>
    %1071 = vector.broadcast %1070 : vector<1x1xf32> to vector<8x8xf32>
    %1072 = arith.mulf %1071, %1069 : vector<8x8xf32>
    %1073 = arith.addf %1059, %1072 : vector<8x8xf32>
    %1074 = vector.extract_strided_slice %1043 {offsets = [0, 2], sizes = [8, 1], strides = [1, 1]} : vector<8x32xf32> to vector<8x1xf32>
    %1075 = vector.extract_strided_slice %1044 {offsets = [2, 0], sizes = [1, 8], strides = [1, 1]} : vector<32x8xf32> to vector<1x8xf32>
    %1076 = vector.broadcast %1074 : vector<8x1xf32> to vector<8x8xf32>
    %1077 = vector.broadcast %1075 : vector<1x8xf32> to vector<8x8xf32>
    %1078 = arith.addf %1076, %1077 : vector<8x8xf32>
    %cst_204 = arith.constant 0.000000e+00 : f32
    %1079 = vector.broadcast %cst_204 : f32 to vector<8x8xf32>
    %1080 = arith.cmpf ogt, %1078, %1079 : vector<8x8xf32>
    %cst_205 = arith.constant 2.000000e-01 : f32
    %1081 = vector.broadcast %cst_205 : f32 to vector<8x8xf32>
    %1082 = arith.mulf %1081, %1078 : vector<8x8xf32>
    %1083 = arith.select %1080, %1078, %1082 : vector<8x8xi1>, vector<8x8xf32>
    %1084 = vector.extract_strided_slice %1037 {offsets = [0, 2], sizes = [1, 1], strides = [1, 1]} : vector<1x32xf32> to vector<1x1xf32>
    %1085 = vector.broadcast %1084 : vector<1x1xf32> to vector<8x8xf32>
    %1086 = arith.mulf %1085, %1083 : vector<8x8xf32>
    %1087 = arith.addf %1073, %1086 : vector<8x8xf32>
    %1088 = vector.extract_strided_slice %1043 {offsets = [0, 3], sizes = [8, 1], strides = [1, 1]} : vector<8x32xf32> to vector<8x1xf32>
    %1089 = vector.extract_strided_slice %1044 {offsets = [3, 0], sizes = [1, 8], strides = [1, 1]} : vector<32x8xf32> to vector<1x8xf32>
    %1090 = vector.broadcast %1088 : vector<8x1xf32> to vector<8x8xf32>
    %1091 = vector.broadcast %1089 : vector<1x8xf32> to vector<8x8xf32>
    %1092 = arith.addf %1090, %1091 : vector<8x8xf32>
    %cst_206 = arith.constant 0.000000e+00 : f32
    %1093 = vector.broadcast %cst_206 : f32 to vector<8x8xf32>
    %1094 = arith.cmpf ogt, %1092, %1093 : vector<8x8xf32>
    %cst_207 = arith.constant 2.000000e-01 : f32
    %1095 = vector.broadcast %cst_207 : f32 to vector<8x8xf32>
    %1096 = arith.mulf %1095, %1092 : vector<8x8xf32>
    %1097 = arith.select %1094, %1092, %1096 : vector<8x8xi1>, vector<8x8xf32>
    %1098 = vector.extract_strided_slice %1037 {offsets = [0, 3], sizes = [1, 1], strides = [1, 1]} : vector<1x32xf32> to vector<1x1xf32>
    %1099 = vector.broadcast %1098 : vector<1x1xf32> to vector<8x8xf32>
    %1100 = arith.mulf %1099, %1097 : vector<8x8xf32>
    %1101 = arith.addf %1087, %1100 : vector<8x8xf32>
    %1102 = vector.extract_strided_slice %1043 {offsets = [0, 4], sizes = [8, 1], strides = [1, 1]} : vector<8x32xf32> to vector<8x1xf32>
    %1103 = vector.extract_strided_slice %1044 {offsets = [4, 0], sizes = [1, 8], strides = [1, 1]} : vector<32x8xf32> to vector<1x8xf32>
    %1104 = vector.broadcast %1102 : vector<8x1xf32> to vector<8x8xf32>
    %1105 = vector.broadcast %1103 : vector<1x8xf32> to vector<8x8xf32>
    %1106 = arith.addf %1104, %1105 : vector<8x8xf32>
    %cst_208 = arith.constant 0.000000e+00 : f32
    %1107 = vector.broadcast %cst_208 : f32 to vector<8x8xf32>
    %1108 = arith.cmpf ogt, %1106, %1107 : vector<8x8xf32>
    %cst_209 = arith.constant 2.000000e-01 : f32
    %1109 = vector.broadcast %cst_209 : f32 to vector<8x8xf32>
    %1110 = arith.mulf %1109, %1106 : vector<8x8xf32>
    %1111 = arith.select %1108, %1106, %1110 : vector<8x8xi1>, vector<8x8xf32>
    %1112 = vector.extract_strided_slice %1037 {offsets = [0, 4], sizes = [1, 1], strides = [1, 1]} : vector<1x32xf32> to vector<1x1xf32>
    %1113 = vector.broadcast %1112 : vector<1x1xf32> to vector<8x8xf32>
    %1114 = arith.mulf %1113, %1111 : vector<8x8xf32>
    %1115 = arith.addf %1101, %1114 : vector<8x8xf32>
    %1116 = vector.extract_strided_slice %1043 {offsets = [0, 5], sizes = [8, 1], strides = [1, 1]} : vector<8x32xf32> to vector<8x1xf32>
    %1117 = vector.extract_strided_slice %1044 {offsets = [5, 0], sizes = [1, 8], strides = [1, 1]} : vector<32x8xf32> to vector<1x8xf32>
    %1118 = vector.broadcast %1116 : vector<8x1xf32> to vector<8x8xf32>
    %1119 = vector.broadcast %1117 : vector<1x8xf32> to vector<8x8xf32>
    %1120 = arith.addf %1118, %1119 : vector<8x8xf32>
    %cst_210 = arith.constant 0.000000e+00 : f32
    %1121 = vector.broadcast %cst_210 : f32 to vector<8x8xf32>
    %1122 = arith.cmpf ogt, %1120, %1121 : vector<8x8xf32>
    %cst_211 = arith.constant 2.000000e-01 : f32
    %1123 = vector.broadcast %cst_211 : f32 to vector<8x8xf32>
    %1124 = arith.mulf %1123, %1120 : vector<8x8xf32>
    %1125 = arith.select %1122, %1120, %1124 : vector<8x8xi1>, vector<8x8xf32>
    %1126 = vector.extract_strided_slice %1037 {offsets = [0, 5], sizes = [1, 1], strides = [1, 1]} : vector<1x32xf32> to vector<1x1xf32>
    %1127 = vector.broadcast %1126 : vector<1x1xf32> to vector<8x8xf32>
    %1128 = arith.mulf %1127, %1125 : vector<8x8xf32>
    %1129 = arith.addf %1115, %1128 : vector<8x8xf32>
    %1130 = vector.extract_strided_slice %1043 {offsets = [0, 6], sizes = [8, 1], strides = [1, 1]} : vector<8x32xf32> to vector<8x1xf32>
    %1131 = vector.extract_strided_slice %1044 {offsets = [6, 0], sizes = [1, 8], strides = [1, 1]} : vector<32x8xf32> to vector<1x8xf32>
    %1132 = vector.broadcast %1130 : vector<8x1xf32> to vector<8x8xf32>
    %1133 = vector.broadcast %1131 : vector<1x8xf32> to vector<8x8xf32>
    %1134 = arith.addf %1132, %1133 : vector<8x8xf32>
    %cst_212 = arith.constant 0.000000e+00 : f32
    %1135 = vector.broadcast %cst_212 : f32 to vector<8x8xf32>
    %1136 = arith.cmpf ogt, %1134, %1135 : vector<8x8xf32>
    %cst_213 = arith.constant 2.000000e-01 : f32
    %1137 = vector.broadcast %cst_213 : f32 to vector<8x8xf32>
    %1138 = arith.mulf %1137, %1134 : vector<8x8xf32>
    %1139 = arith.select %1136, %1134, %1138 : vector<8x8xi1>, vector<8x8xf32>
    %1140 = vector.extract_strided_slice %1037 {offsets = [0, 6], sizes = [1, 1], strides = [1, 1]} : vector<1x32xf32> to vector<1x1xf32>
    %1141 = vector.broadcast %1140 : vector<1x1xf32> to vector<8x8xf32>
    %1142 = arith.mulf %1141, %1139 : vector<8x8xf32>
    %1143 = arith.addf %1129, %1142 : vector<8x8xf32>
    %1144 = vector.extract_strided_slice %1043 {offsets = [0, 7], sizes = [8, 1], strides = [1, 1]} : vector<8x32xf32> to vector<8x1xf32>
    %1145 = vector.extract_strided_slice %1044 {offsets = [7, 0], sizes = [1, 8], strides = [1, 1]} : vector<32x8xf32> to vector<1x8xf32>
    %1146 = vector.broadcast %1144 : vector<8x1xf32> to vector<8x8xf32>
    %1147 = vector.broadcast %1145 : vector<1x8xf32> to vector<8x8xf32>
    %1148 = arith.addf %1146, %1147 : vector<8x8xf32>
    %cst_214 = arith.constant 0.000000e+00 : f32
    %1149 = vector.broadcast %cst_214 : f32 to vector<8x8xf32>
    %1150 = arith.cmpf ogt, %1148, %1149 : vector<8x8xf32>
    %cst_215 = arith.constant 2.000000e-01 : f32
    %1151 = vector.broadcast %cst_215 : f32 to vector<8x8xf32>
    %1152 = arith.mulf %1151, %1148 : vector<8x8xf32>
    %1153 = arith.select %1150, %1148, %1152 : vector<8x8xi1>, vector<8x8xf32>
    %1154 = vector.extract_strided_slice %1037 {offsets = [0, 7], sizes = [1, 1], strides = [1, 1]} : vector<1x32xf32> to vector<1x1xf32>
    %1155 = vector.broadcast %1154 : vector<1x1xf32> to vector<8x8xf32>
    %1156 = arith.mulf %1155, %1153 : vector<8x8xf32>
    %1157 = arith.addf %1143, %1156 : vector<8x8xf32>
    %1158 = vector.extract_strided_slice %1043 {offsets = [0, 8], sizes = [8, 1], strides = [1, 1]} : vector<8x32xf32> to vector<8x1xf32>
    %1159 = vector.extract_strided_slice %1044 {offsets = [8, 0], sizes = [1, 8], strides = [1, 1]} : vector<32x8xf32> to vector<1x8xf32>
    %1160 = vector.broadcast %1158 : vector<8x1xf32> to vector<8x8xf32>
    %1161 = vector.broadcast %1159 : vector<1x8xf32> to vector<8x8xf32>
    %1162 = arith.addf %1160, %1161 : vector<8x8xf32>
    %cst_216 = arith.constant 0.000000e+00 : f32
    %1163 = vector.broadcast %cst_216 : f32 to vector<8x8xf32>
    %1164 = arith.cmpf ogt, %1162, %1163 : vector<8x8xf32>
    %cst_217 = arith.constant 2.000000e-01 : f32
    %1165 = vector.broadcast %cst_217 : f32 to vector<8x8xf32>
    %1166 = arith.mulf %1165, %1162 : vector<8x8xf32>
    %1167 = arith.select %1164, %1162, %1166 : vector<8x8xi1>, vector<8x8xf32>
    %1168 = vector.extract_strided_slice %1037 {offsets = [0, 8], sizes = [1, 1], strides = [1, 1]} : vector<1x32xf32> to vector<1x1xf32>
    %1169 = vector.broadcast %1168 : vector<1x1xf32> to vector<8x8xf32>
    %1170 = arith.mulf %1169, %1167 : vector<8x8xf32>
    %1171 = arith.addf %1157, %1170 : vector<8x8xf32>
    %1172 = vector.extract_strided_slice %1043 {offsets = [0, 9], sizes = [8, 1], strides = [1, 1]} : vector<8x32xf32> to vector<8x1xf32>
    %1173 = vector.extract_strided_slice %1044 {offsets = [9, 0], sizes = [1, 8], strides = [1, 1]} : vector<32x8xf32> to vector<1x8xf32>
    %1174 = vector.broadcast %1172 : vector<8x1xf32> to vector<8x8xf32>
    %1175 = vector.broadcast %1173 : vector<1x8xf32> to vector<8x8xf32>
    %1176 = arith.addf %1174, %1175 : vector<8x8xf32>
    %cst_218 = arith.constant 0.000000e+00 : f32
    %1177 = vector.broadcast %cst_218 : f32 to vector<8x8xf32>
    %1178 = arith.cmpf ogt, %1176, %1177 : vector<8x8xf32>
    %cst_219 = arith.constant 2.000000e-01 : f32
    %1179 = vector.broadcast %cst_219 : f32 to vector<8x8xf32>
    %1180 = arith.mulf %1179, %1176 : vector<8x8xf32>
    %1181 = arith.select %1178, %1176, %1180 : vector<8x8xi1>, vector<8x8xf32>
    %1182 = vector.extract_strided_slice %1037 {offsets = [0, 9], sizes = [1, 1], strides = [1, 1]} : vector<1x32xf32> to vector<1x1xf32>
    %1183 = vector.broadcast %1182 : vector<1x1xf32> to vector<8x8xf32>
    %1184 = arith.mulf %1183, %1181 : vector<8x8xf32>
    %1185 = arith.addf %1171, %1184 : vector<8x8xf32>
    %1186 = vector.extract_strided_slice %1043 {offsets = [0, 10], sizes = [8, 1], strides = [1, 1]} : vector<8x32xf32> to vector<8x1xf32>
    %1187 = vector.extract_strided_slice %1044 {offsets = [10, 0], sizes = [1, 8], strides = [1, 1]} : vector<32x8xf32> to vector<1x8xf32>
    %1188 = vector.broadcast %1186 : vector<8x1xf32> to vector<8x8xf32>
    %1189 = vector.broadcast %1187 : vector<1x8xf32> to vector<8x8xf32>
    %1190 = arith.addf %1188, %1189 : vector<8x8xf32>
    %cst_220 = arith.constant 0.000000e+00 : f32
    %1191 = vector.broadcast %cst_220 : f32 to vector<8x8xf32>
    %1192 = arith.cmpf ogt, %1190, %1191 : vector<8x8xf32>
    %cst_221 = arith.constant 2.000000e-01 : f32
    %1193 = vector.broadcast %cst_221 : f32 to vector<8x8xf32>
    %1194 = arith.mulf %1193, %1190 : vector<8x8xf32>
    %1195 = arith.select %1192, %1190, %1194 : vector<8x8xi1>, vector<8x8xf32>
    %1196 = vector.extract_strided_slice %1037 {offsets = [0, 10], sizes = [1, 1], strides = [1, 1]} : vector<1x32xf32> to vector<1x1xf32>
    %1197 = vector.broadcast %1196 : vector<1x1xf32> to vector<8x8xf32>
    %1198 = arith.mulf %1197, %1195 : vector<8x8xf32>
    %1199 = arith.addf %1185, %1198 : vector<8x8xf32>
    %1200 = vector.extract_strided_slice %1043 {offsets = [0, 11], sizes = [8, 1], strides = [1, 1]} : vector<8x32xf32> to vector<8x1xf32>
    %1201 = vector.extract_strided_slice %1044 {offsets = [11, 0], sizes = [1, 8], strides = [1, 1]} : vector<32x8xf32> to vector<1x8xf32>
    %1202 = vector.broadcast %1200 : vector<8x1xf32> to vector<8x8xf32>
    %1203 = vector.broadcast %1201 : vector<1x8xf32> to vector<8x8xf32>
    %1204 = arith.addf %1202, %1203 : vector<8x8xf32>
    %cst_222 = arith.constant 0.000000e+00 : f32
    %1205 = vector.broadcast %cst_222 : f32 to vector<8x8xf32>
    %1206 = arith.cmpf ogt, %1204, %1205 : vector<8x8xf32>
    %cst_223 = arith.constant 2.000000e-01 : f32
    %1207 = vector.broadcast %cst_223 : f32 to vector<8x8xf32>
    %1208 = arith.mulf %1207, %1204 : vector<8x8xf32>
    %1209 = arith.select %1206, %1204, %1208 : vector<8x8xi1>, vector<8x8xf32>
    %1210 = vector.extract_strided_slice %1037 {offsets = [0, 11], sizes = [1, 1], strides = [1, 1]} : vector<1x32xf32> to vector<1x1xf32>
    %1211 = vector.broadcast %1210 : vector<1x1xf32> to vector<8x8xf32>
    %1212 = arith.mulf %1211, %1209 : vector<8x8xf32>
    %1213 = arith.addf %1199, %1212 : vector<8x8xf32>
    %1214 = vector.extract_strided_slice %1043 {offsets = [0, 12], sizes = [8, 1], strides = [1, 1]} : vector<8x32xf32> to vector<8x1xf32>
    %1215 = vector.extract_strided_slice %1044 {offsets = [12, 0], sizes = [1, 8], strides = [1, 1]} : vector<32x8xf32> to vector<1x8xf32>
    %1216 = vector.broadcast %1214 : vector<8x1xf32> to vector<8x8xf32>
    %1217 = vector.broadcast %1215 : vector<1x8xf32> to vector<8x8xf32>
    %1218 = arith.addf %1216, %1217 : vector<8x8xf32>
    %cst_224 = arith.constant 0.000000e+00 : f32
    %1219 = vector.broadcast %cst_224 : f32 to vector<8x8xf32>
    %1220 = arith.cmpf ogt, %1218, %1219 : vector<8x8xf32>
    %cst_225 = arith.constant 2.000000e-01 : f32
    %1221 = vector.broadcast %cst_225 : f32 to vector<8x8xf32>
    %1222 = arith.mulf %1221, %1218 : vector<8x8xf32>
    %1223 = arith.select %1220, %1218, %1222 : vector<8x8xi1>, vector<8x8xf32>
    %1224 = vector.extract_strided_slice %1037 {offsets = [0, 12], sizes = [1, 1], strides = [1, 1]} : vector<1x32xf32> to vector<1x1xf32>
    %1225 = vector.broadcast %1224 : vector<1x1xf32> to vector<8x8xf32>
    %1226 = arith.mulf %1225, %1223 : vector<8x8xf32>
    %1227 = arith.addf %1213, %1226 : vector<8x8xf32>
    %1228 = vector.extract_strided_slice %1043 {offsets = [0, 13], sizes = [8, 1], strides = [1, 1]} : vector<8x32xf32> to vector<8x1xf32>
    %1229 = vector.extract_strided_slice %1044 {offsets = [13, 0], sizes = [1, 8], strides = [1, 1]} : vector<32x8xf32> to vector<1x8xf32>
    %1230 = vector.broadcast %1228 : vector<8x1xf32> to vector<8x8xf32>
    %1231 = vector.broadcast %1229 : vector<1x8xf32> to vector<8x8xf32>
    %1232 = arith.addf %1230, %1231 : vector<8x8xf32>
    %cst_226 = arith.constant 0.000000e+00 : f32
    %1233 = vector.broadcast %cst_226 : f32 to vector<8x8xf32>
    %1234 = arith.cmpf ogt, %1232, %1233 : vector<8x8xf32>
    %cst_227 = arith.constant 2.000000e-01 : f32
    %1235 = vector.broadcast %cst_227 : f32 to vector<8x8xf32>
    %1236 = arith.mulf %1235, %1232 : vector<8x8xf32>
    %1237 = arith.select %1234, %1232, %1236 : vector<8x8xi1>, vector<8x8xf32>
    %1238 = vector.extract_strided_slice %1037 {offsets = [0, 13], sizes = [1, 1], strides = [1, 1]} : vector<1x32xf32> to vector<1x1xf32>
    %1239 = vector.broadcast %1238 : vector<1x1xf32> to vector<8x8xf32>
    %1240 = arith.mulf %1239, %1237 : vector<8x8xf32>
    %1241 = arith.addf %1227, %1240 : vector<8x8xf32>
    %1242 = vector.extract_strided_slice %1043 {offsets = [0, 14], sizes = [8, 1], strides = [1, 1]} : vector<8x32xf32> to vector<8x1xf32>
    %1243 = vector.extract_strided_slice %1044 {offsets = [14, 0], sizes = [1, 8], strides = [1, 1]} : vector<32x8xf32> to vector<1x8xf32>
    %1244 = vector.broadcast %1242 : vector<8x1xf32> to vector<8x8xf32>
    %1245 = vector.broadcast %1243 : vector<1x8xf32> to vector<8x8xf32>
    %1246 = arith.addf %1244, %1245 : vector<8x8xf32>
    %cst_228 = arith.constant 0.000000e+00 : f32
    %1247 = vector.broadcast %cst_228 : f32 to vector<8x8xf32>
    %1248 = arith.cmpf ogt, %1246, %1247 : vector<8x8xf32>
    %cst_229 = arith.constant 2.000000e-01 : f32
    %1249 = vector.broadcast %cst_229 : f32 to vector<8x8xf32>
    %1250 = arith.mulf %1249, %1246 : vector<8x8xf32>
    %1251 = arith.select %1248, %1246, %1250 : vector<8x8xi1>, vector<8x8xf32>
    %1252 = vector.extract_strided_slice %1037 {offsets = [0, 14], sizes = [1, 1], strides = [1, 1]} : vector<1x32xf32> to vector<1x1xf32>
    %1253 = vector.broadcast %1252 : vector<1x1xf32> to vector<8x8xf32>
    %1254 = arith.mulf %1253, %1251 : vector<8x8xf32>
    %1255 = arith.addf %1241, %1254 : vector<8x8xf32>
    %1256 = vector.extract_strided_slice %1043 {offsets = [0, 15], sizes = [8, 1], strides = [1, 1]} : vector<8x32xf32> to vector<8x1xf32>
    %1257 = vector.extract_strided_slice %1044 {offsets = [15, 0], sizes = [1, 8], strides = [1, 1]} : vector<32x8xf32> to vector<1x8xf32>
    %1258 = vector.broadcast %1256 : vector<8x1xf32> to vector<8x8xf32>
    %1259 = vector.broadcast %1257 : vector<1x8xf32> to vector<8x8xf32>
    %1260 = arith.addf %1258, %1259 : vector<8x8xf32>
    %cst_230 = arith.constant 0.000000e+00 : f32
    %1261 = vector.broadcast %cst_230 : f32 to vector<8x8xf32>
    %1262 = arith.cmpf ogt, %1260, %1261 : vector<8x8xf32>
    %cst_231 = arith.constant 2.000000e-01 : f32
    %1263 = vector.broadcast %cst_231 : f32 to vector<8x8xf32>
    %1264 = arith.mulf %1263, %1260 : vector<8x8xf32>
    %1265 = arith.select %1262, %1260, %1264 : vector<8x8xi1>, vector<8x8xf32>
    %1266 = vector.extract_strided_slice %1037 {offsets = [0, 15], sizes = [1, 1], strides = [1, 1]} : vector<1x32xf32> to vector<1x1xf32>
    %1267 = vector.broadcast %1266 : vector<1x1xf32> to vector<8x8xf32>
    %1268 = arith.mulf %1267, %1265 : vector<8x8xf32>
    %1269 = arith.addf %1255, %1268 : vector<8x8xf32>
    %1270 = vector.extract_strided_slice %1043 {offsets = [0, 16], sizes = [8, 1], strides = [1, 1]} : vector<8x32xf32> to vector<8x1xf32>
    %1271 = vector.extract_strided_slice %1044 {offsets = [16, 0], sizes = [1, 8], strides = [1, 1]} : vector<32x8xf32> to vector<1x8xf32>
    %1272 = vector.broadcast %1270 : vector<8x1xf32> to vector<8x8xf32>
    %1273 = vector.broadcast %1271 : vector<1x8xf32> to vector<8x8xf32>
    %1274 = arith.addf %1272, %1273 : vector<8x8xf32>
    %cst_232 = arith.constant 0.000000e+00 : f32
    %1275 = vector.broadcast %cst_232 : f32 to vector<8x8xf32>
    %1276 = arith.cmpf ogt, %1274, %1275 : vector<8x8xf32>
    %cst_233 = arith.constant 2.000000e-01 : f32
    %1277 = vector.broadcast %cst_233 : f32 to vector<8x8xf32>
    %1278 = arith.mulf %1277, %1274 : vector<8x8xf32>
    %1279 = arith.select %1276, %1274, %1278 : vector<8x8xi1>, vector<8x8xf32>
    %1280 = vector.extract_strided_slice %1037 {offsets = [0, 16], sizes = [1, 1], strides = [1, 1]} : vector<1x32xf32> to vector<1x1xf32>
    %1281 = vector.broadcast %1280 : vector<1x1xf32> to vector<8x8xf32>
    %1282 = arith.mulf %1281, %1279 : vector<8x8xf32>
    %1283 = arith.addf %1269, %1282 : vector<8x8xf32>
    %1284 = vector.extract_strided_slice %1043 {offsets = [0, 17], sizes = [8, 1], strides = [1, 1]} : vector<8x32xf32> to vector<8x1xf32>
    %1285 = vector.extract_strided_slice %1044 {offsets = [17, 0], sizes = [1, 8], strides = [1, 1]} : vector<32x8xf32> to vector<1x8xf32>
    %1286 = vector.broadcast %1284 : vector<8x1xf32> to vector<8x8xf32>
    %1287 = vector.broadcast %1285 : vector<1x8xf32> to vector<8x8xf32>
    %1288 = arith.addf %1286, %1287 : vector<8x8xf32>
    %cst_234 = arith.constant 0.000000e+00 : f32
    %1289 = vector.broadcast %cst_234 : f32 to vector<8x8xf32>
    %1290 = arith.cmpf ogt, %1288, %1289 : vector<8x8xf32>
    %cst_235 = arith.constant 2.000000e-01 : f32
    %1291 = vector.broadcast %cst_235 : f32 to vector<8x8xf32>
    %1292 = arith.mulf %1291, %1288 : vector<8x8xf32>
    %1293 = arith.select %1290, %1288, %1292 : vector<8x8xi1>, vector<8x8xf32>
    %1294 = vector.extract_strided_slice %1037 {offsets = [0, 17], sizes = [1, 1], strides = [1, 1]} : vector<1x32xf32> to vector<1x1xf32>
    %1295 = vector.broadcast %1294 : vector<1x1xf32> to vector<8x8xf32>
    %1296 = arith.mulf %1295, %1293 : vector<8x8xf32>
    %1297 = arith.addf %1283, %1296 : vector<8x8xf32>
    %1298 = vector.extract_strided_slice %1043 {offsets = [0, 18], sizes = [8, 1], strides = [1, 1]} : vector<8x32xf32> to vector<8x1xf32>
    %1299 = vector.extract_strided_slice %1044 {offsets = [18, 0], sizes = [1, 8], strides = [1, 1]} : vector<32x8xf32> to vector<1x8xf32>
    %1300 = vector.broadcast %1298 : vector<8x1xf32> to vector<8x8xf32>
    %1301 = vector.broadcast %1299 : vector<1x8xf32> to vector<8x8xf32>
    %1302 = arith.addf %1300, %1301 : vector<8x8xf32>
    %cst_236 = arith.constant 0.000000e+00 : f32
    %1303 = vector.broadcast %cst_236 : f32 to vector<8x8xf32>
    %1304 = arith.cmpf ogt, %1302, %1303 : vector<8x8xf32>
    %cst_237 = arith.constant 2.000000e-01 : f32
    %1305 = vector.broadcast %cst_237 : f32 to vector<8x8xf32>
    %1306 = arith.mulf %1305, %1302 : vector<8x8xf32>
    %1307 = arith.select %1304, %1302, %1306 : vector<8x8xi1>, vector<8x8xf32>
    %1308 = vector.extract_strided_slice %1037 {offsets = [0, 18], sizes = [1, 1], strides = [1, 1]} : vector<1x32xf32> to vector<1x1xf32>
    %1309 = vector.broadcast %1308 : vector<1x1xf32> to vector<8x8xf32>
    %1310 = arith.mulf %1309, %1307 : vector<8x8xf32>
    %1311 = arith.addf %1297, %1310 : vector<8x8xf32>
    %1312 = vector.extract_strided_slice %1043 {offsets = [0, 19], sizes = [8, 1], strides = [1, 1]} : vector<8x32xf32> to vector<8x1xf32>
    %1313 = vector.extract_strided_slice %1044 {offsets = [19, 0], sizes = [1, 8], strides = [1, 1]} : vector<32x8xf32> to vector<1x8xf32>
    %1314 = vector.broadcast %1312 : vector<8x1xf32> to vector<8x8xf32>
    %1315 = vector.broadcast %1313 : vector<1x8xf32> to vector<8x8xf32>
    %1316 = arith.addf %1314, %1315 : vector<8x8xf32>
    %cst_238 = arith.constant 0.000000e+00 : f32
    %1317 = vector.broadcast %cst_238 : f32 to vector<8x8xf32>
    %1318 = arith.cmpf ogt, %1316, %1317 : vector<8x8xf32>
    %cst_239 = arith.constant 2.000000e-01 : f32
    %1319 = vector.broadcast %cst_239 : f32 to vector<8x8xf32>
    %1320 = arith.mulf %1319, %1316 : vector<8x8xf32>
    %1321 = arith.select %1318, %1316, %1320 : vector<8x8xi1>, vector<8x8xf32>
    %1322 = vector.extract_strided_slice %1037 {offsets = [0, 19], sizes = [1, 1], strides = [1, 1]} : vector<1x32xf32> to vector<1x1xf32>
    %1323 = vector.broadcast %1322 : vector<1x1xf32> to vector<8x8xf32>
    %1324 = arith.mulf %1323, %1321 : vector<8x8xf32>
    %1325 = arith.addf %1311, %1324 : vector<8x8xf32>
    %1326 = vector.extract_strided_slice %1043 {offsets = [0, 20], sizes = [8, 1], strides = [1, 1]} : vector<8x32xf32> to vector<8x1xf32>
    %1327 = vector.extract_strided_slice %1044 {offsets = [20, 0], sizes = [1, 8], strides = [1, 1]} : vector<32x8xf32> to vector<1x8xf32>
    %1328 = vector.broadcast %1326 : vector<8x1xf32> to vector<8x8xf32>
    %1329 = vector.broadcast %1327 : vector<1x8xf32> to vector<8x8xf32>
    %1330 = arith.addf %1328, %1329 : vector<8x8xf32>
    %cst_240 = arith.constant 0.000000e+00 : f32
    %1331 = vector.broadcast %cst_240 : f32 to vector<8x8xf32>
    %1332 = arith.cmpf ogt, %1330, %1331 : vector<8x8xf32>
    %cst_241 = arith.constant 2.000000e-01 : f32
    %1333 = vector.broadcast %cst_241 : f32 to vector<8x8xf32>
    %1334 = arith.mulf %1333, %1330 : vector<8x8xf32>
    %1335 = arith.select %1332, %1330, %1334 : vector<8x8xi1>, vector<8x8xf32>
    %1336 = vector.extract_strided_slice %1037 {offsets = [0, 20], sizes = [1, 1], strides = [1, 1]} : vector<1x32xf32> to vector<1x1xf32>
    %1337 = vector.broadcast %1336 : vector<1x1xf32> to vector<8x8xf32>
    %1338 = arith.mulf %1337, %1335 : vector<8x8xf32>
    %1339 = arith.addf %1325, %1338 : vector<8x8xf32>
    %1340 = vector.extract_strided_slice %1043 {offsets = [0, 21], sizes = [8, 1], strides = [1, 1]} : vector<8x32xf32> to vector<8x1xf32>
    %1341 = vector.extract_strided_slice %1044 {offsets = [21, 0], sizes = [1, 8], strides = [1, 1]} : vector<32x8xf32> to vector<1x8xf32>
    %1342 = vector.broadcast %1340 : vector<8x1xf32> to vector<8x8xf32>
    %1343 = vector.broadcast %1341 : vector<1x8xf32> to vector<8x8xf32>
    %1344 = arith.addf %1342, %1343 : vector<8x8xf32>
    %cst_242 = arith.constant 0.000000e+00 : f32
    %1345 = vector.broadcast %cst_242 : f32 to vector<8x8xf32>
    %1346 = arith.cmpf ogt, %1344, %1345 : vector<8x8xf32>
    %cst_243 = arith.constant 2.000000e-01 : f32
    %1347 = vector.broadcast %cst_243 : f32 to vector<8x8xf32>
    %1348 = arith.mulf %1347, %1344 : vector<8x8xf32>
    %1349 = arith.select %1346, %1344, %1348 : vector<8x8xi1>, vector<8x8xf32>
    %1350 = vector.extract_strided_slice %1037 {offsets = [0, 21], sizes = [1, 1], strides = [1, 1]} : vector<1x32xf32> to vector<1x1xf32>
    %1351 = vector.broadcast %1350 : vector<1x1xf32> to vector<8x8xf32>
    %1352 = arith.mulf %1351, %1349 : vector<8x8xf32>
    %1353 = arith.addf %1339, %1352 : vector<8x8xf32>
    %1354 = vector.extract_strided_slice %1043 {offsets = [0, 22], sizes = [8, 1], strides = [1, 1]} : vector<8x32xf32> to vector<8x1xf32>
    %1355 = vector.extract_strided_slice %1044 {offsets = [22, 0], sizes = [1, 8], strides = [1, 1]} : vector<32x8xf32> to vector<1x8xf32>
    %1356 = vector.broadcast %1354 : vector<8x1xf32> to vector<8x8xf32>
    %1357 = vector.broadcast %1355 : vector<1x8xf32> to vector<8x8xf32>
    %1358 = arith.addf %1356, %1357 : vector<8x8xf32>
    %cst_244 = arith.constant 0.000000e+00 : f32
    %1359 = vector.broadcast %cst_244 : f32 to vector<8x8xf32>
    %1360 = arith.cmpf ogt, %1358, %1359 : vector<8x8xf32>
    %cst_245 = arith.constant 2.000000e-01 : f32
    %1361 = vector.broadcast %cst_245 : f32 to vector<8x8xf32>
    %1362 = arith.mulf %1361, %1358 : vector<8x8xf32>
    %1363 = arith.select %1360, %1358, %1362 : vector<8x8xi1>, vector<8x8xf32>
    %1364 = vector.extract_strided_slice %1037 {offsets = [0, 22], sizes = [1, 1], strides = [1, 1]} : vector<1x32xf32> to vector<1x1xf32>
    %1365 = vector.broadcast %1364 : vector<1x1xf32> to vector<8x8xf32>
    %1366 = arith.mulf %1365, %1363 : vector<8x8xf32>
    %1367 = arith.addf %1353, %1366 : vector<8x8xf32>
    %1368 = vector.extract_strided_slice %1043 {offsets = [0, 23], sizes = [8, 1], strides = [1, 1]} : vector<8x32xf32> to vector<8x1xf32>
    %1369 = vector.extract_strided_slice %1044 {offsets = [23, 0], sizes = [1, 8], strides = [1, 1]} : vector<32x8xf32> to vector<1x8xf32>
    %1370 = vector.broadcast %1368 : vector<8x1xf32> to vector<8x8xf32>
    %1371 = vector.broadcast %1369 : vector<1x8xf32> to vector<8x8xf32>
    %1372 = arith.addf %1370, %1371 : vector<8x8xf32>
    %cst_246 = arith.constant 0.000000e+00 : f32
    %1373 = vector.broadcast %cst_246 : f32 to vector<8x8xf32>
    %1374 = arith.cmpf ogt, %1372, %1373 : vector<8x8xf32>
    %cst_247 = arith.constant 2.000000e-01 : f32
    %1375 = vector.broadcast %cst_247 : f32 to vector<8x8xf32>
    %1376 = arith.mulf %1375, %1372 : vector<8x8xf32>
    %1377 = arith.select %1374, %1372, %1376 : vector<8x8xi1>, vector<8x8xf32>
    %1378 = vector.extract_strided_slice %1037 {offsets = [0, 23], sizes = [1, 1], strides = [1, 1]} : vector<1x32xf32> to vector<1x1xf32>
    %1379 = vector.broadcast %1378 : vector<1x1xf32> to vector<8x8xf32>
    %1380 = arith.mulf %1379, %1377 : vector<8x8xf32>
    %1381 = arith.addf %1367, %1380 : vector<8x8xf32>
    %1382 = vector.extract_strided_slice %1043 {offsets = [0, 24], sizes = [8, 1], strides = [1, 1]} : vector<8x32xf32> to vector<8x1xf32>
    %1383 = vector.extract_strided_slice %1044 {offsets = [24, 0], sizes = [1, 8], strides = [1, 1]} : vector<32x8xf32> to vector<1x8xf32>
    %1384 = vector.broadcast %1382 : vector<8x1xf32> to vector<8x8xf32>
    %1385 = vector.broadcast %1383 : vector<1x8xf32> to vector<8x8xf32>
    %1386 = arith.addf %1384, %1385 : vector<8x8xf32>
    %cst_248 = arith.constant 0.000000e+00 : f32
    %1387 = vector.broadcast %cst_248 : f32 to vector<8x8xf32>
    %1388 = arith.cmpf ogt, %1386, %1387 : vector<8x8xf32>
    %cst_249 = arith.constant 2.000000e-01 : f32
    %1389 = vector.broadcast %cst_249 : f32 to vector<8x8xf32>
    %1390 = arith.mulf %1389, %1386 : vector<8x8xf32>
    %1391 = arith.select %1388, %1386, %1390 : vector<8x8xi1>, vector<8x8xf32>
    %1392 = vector.extract_strided_slice %1037 {offsets = [0, 24], sizes = [1, 1], strides = [1, 1]} : vector<1x32xf32> to vector<1x1xf32>
    %1393 = vector.broadcast %1392 : vector<1x1xf32> to vector<8x8xf32>
    %1394 = arith.mulf %1393, %1391 : vector<8x8xf32>
    %1395 = arith.addf %1381, %1394 : vector<8x8xf32>
    %1396 = vector.extract_strided_slice %1043 {offsets = [0, 25], sizes = [8, 1], strides = [1, 1]} : vector<8x32xf32> to vector<8x1xf32>
    %1397 = vector.extract_strided_slice %1044 {offsets = [25, 0], sizes = [1, 8], strides = [1, 1]} : vector<32x8xf32> to vector<1x8xf32>
    %1398 = vector.broadcast %1396 : vector<8x1xf32> to vector<8x8xf32>
    %1399 = vector.broadcast %1397 : vector<1x8xf32> to vector<8x8xf32>
    %1400 = arith.addf %1398, %1399 : vector<8x8xf32>
    %cst_250 = arith.constant 0.000000e+00 : f32
    %1401 = vector.broadcast %cst_250 : f32 to vector<8x8xf32>
    %1402 = arith.cmpf ogt, %1400, %1401 : vector<8x8xf32>
    %cst_251 = arith.constant 2.000000e-01 : f32
    %1403 = vector.broadcast %cst_251 : f32 to vector<8x8xf32>
    %1404 = arith.mulf %1403, %1400 : vector<8x8xf32>
    %1405 = arith.select %1402, %1400, %1404 : vector<8x8xi1>, vector<8x8xf32>
    %1406 = vector.extract_strided_slice %1037 {offsets = [0, 25], sizes = [1, 1], strides = [1, 1]} : vector<1x32xf32> to vector<1x1xf32>
    %1407 = vector.broadcast %1406 : vector<1x1xf32> to vector<8x8xf32>
    %1408 = arith.mulf %1407, %1405 : vector<8x8xf32>
    %1409 = arith.addf %1395, %1408 : vector<8x8xf32>
    %1410 = vector.extract_strided_slice %1043 {offsets = [0, 26], sizes = [8, 1], strides = [1, 1]} : vector<8x32xf32> to vector<8x1xf32>
    %1411 = vector.extract_strided_slice %1044 {offsets = [26, 0], sizes = [1, 8], strides = [1, 1]} : vector<32x8xf32> to vector<1x8xf32>
    %1412 = vector.broadcast %1410 : vector<8x1xf32> to vector<8x8xf32>
    %1413 = vector.broadcast %1411 : vector<1x8xf32> to vector<8x8xf32>
    %1414 = arith.addf %1412, %1413 : vector<8x8xf32>
    %cst_252 = arith.constant 0.000000e+00 : f32
    %1415 = vector.broadcast %cst_252 : f32 to vector<8x8xf32>
    %1416 = arith.cmpf ogt, %1414, %1415 : vector<8x8xf32>
    %cst_253 = arith.constant 2.000000e-01 : f32
    %1417 = vector.broadcast %cst_253 : f32 to vector<8x8xf32>
    %1418 = arith.mulf %1417, %1414 : vector<8x8xf32>
    %1419 = arith.select %1416, %1414, %1418 : vector<8x8xi1>, vector<8x8xf32>
    %1420 = vector.extract_strided_slice %1037 {offsets = [0, 26], sizes = [1, 1], strides = [1, 1]} : vector<1x32xf32> to vector<1x1xf32>
    %1421 = vector.broadcast %1420 : vector<1x1xf32> to vector<8x8xf32>
    %1422 = arith.mulf %1421, %1419 : vector<8x8xf32>
    %1423 = arith.addf %1409, %1422 : vector<8x8xf32>
    %1424 = vector.extract_strided_slice %1043 {offsets = [0, 27], sizes = [8, 1], strides = [1, 1]} : vector<8x32xf32> to vector<8x1xf32>
    %1425 = vector.extract_strided_slice %1044 {offsets = [27, 0], sizes = [1, 8], strides = [1, 1]} : vector<32x8xf32> to vector<1x8xf32>
    %1426 = vector.broadcast %1424 : vector<8x1xf32> to vector<8x8xf32>
    %1427 = vector.broadcast %1425 : vector<1x8xf32> to vector<8x8xf32>
    %1428 = arith.addf %1426, %1427 : vector<8x8xf32>
    %cst_254 = arith.constant 0.000000e+00 : f32
    %1429 = vector.broadcast %cst_254 : f32 to vector<8x8xf32>
    %1430 = arith.cmpf ogt, %1428, %1429 : vector<8x8xf32>
    %cst_255 = arith.constant 2.000000e-01 : f32
    %1431 = vector.broadcast %cst_255 : f32 to vector<8x8xf32>
    %1432 = arith.mulf %1431, %1428 : vector<8x8xf32>
    %1433 = arith.select %1430, %1428, %1432 : vector<8x8xi1>, vector<8x8xf32>
    %1434 = vector.extract_strided_slice %1037 {offsets = [0, 27], sizes = [1, 1], strides = [1, 1]} : vector<1x32xf32> to vector<1x1xf32>
    %1435 = vector.broadcast %1434 : vector<1x1xf32> to vector<8x8xf32>
    %1436 = arith.mulf %1435, %1433 : vector<8x8xf32>
    %1437 = arith.addf %1423, %1436 : vector<8x8xf32>
    %1438 = vector.extract_strided_slice %1043 {offsets = [0, 28], sizes = [8, 1], strides = [1, 1]} : vector<8x32xf32> to vector<8x1xf32>
    %1439 = vector.extract_strided_slice %1044 {offsets = [28, 0], sizes = [1, 8], strides = [1, 1]} : vector<32x8xf32> to vector<1x8xf32>
    %1440 = vector.broadcast %1438 : vector<8x1xf32> to vector<8x8xf32>
    %1441 = vector.broadcast %1439 : vector<1x8xf32> to vector<8x8xf32>
    %1442 = arith.addf %1440, %1441 : vector<8x8xf32>
    %cst_256 = arith.constant 0.000000e+00 : f32
    %1443 = vector.broadcast %cst_256 : f32 to vector<8x8xf32>
    %1444 = arith.cmpf ogt, %1442, %1443 : vector<8x8xf32>
    %cst_257 = arith.constant 2.000000e-01 : f32
    %1445 = vector.broadcast %cst_257 : f32 to vector<8x8xf32>
    %1446 = arith.mulf %1445, %1442 : vector<8x8xf32>
    %1447 = arith.select %1444, %1442, %1446 : vector<8x8xi1>, vector<8x8xf32>
    %1448 = vector.extract_strided_slice %1037 {offsets = [0, 28], sizes = [1, 1], strides = [1, 1]} : vector<1x32xf32> to vector<1x1xf32>
    %1449 = vector.broadcast %1448 : vector<1x1xf32> to vector<8x8xf32>
    %1450 = arith.mulf %1449, %1447 : vector<8x8xf32>
    %1451 = arith.addf %1437, %1450 : vector<8x8xf32>
    %1452 = vector.extract_strided_slice %1043 {offsets = [0, 29], sizes = [8, 1], strides = [1, 1]} : vector<8x32xf32> to vector<8x1xf32>
    %1453 = vector.extract_strided_slice %1044 {offsets = [29, 0], sizes = [1, 8], strides = [1, 1]} : vector<32x8xf32> to vector<1x8xf32>
    %1454 = vector.broadcast %1452 : vector<8x1xf32> to vector<8x8xf32>
    %1455 = vector.broadcast %1453 : vector<1x8xf32> to vector<8x8xf32>
    %1456 = arith.addf %1454, %1455 : vector<8x8xf32>
    %cst_258 = arith.constant 0.000000e+00 : f32
    %1457 = vector.broadcast %cst_258 : f32 to vector<8x8xf32>
    %1458 = arith.cmpf ogt, %1456, %1457 : vector<8x8xf32>
    %cst_259 = arith.constant 2.000000e-01 : f32
    %1459 = vector.broadcast %cst_259 : f32 to vector<8x8xf32>
    %1460 = arith.mulf %1459, %1456 : vector<8x8xf32>
    %1461 = arith.select %1458, %1456, %1460 : vector<8x8xi1>, vector<8x8xf32>
    %1462 = vector.extract_strided_slice %1037 {offsets = [0, 29], sizes = [1, 1], strides = [1, 1]} : vector<1x32xf32> to vector<1x1xf32>
    %1463 = vector.broadcast %1462 : vector<1x1xf32> to vector<8x8xf32>
    %1464 = arith.mulf %1463, %1461 : vector<8x8xf32>
    %1465 = arith.addf %1451, %1464 : vector<8x8xf32>
    %1466 = vector.extract_strided_slice %1043 {offsets = [0, 30], sizes = [8, 1], strides = [1, 1]} : vector<8x32xf32> to vector<8x1xf32>
    %1467 = vector.extract_strided_slice %1044 {offsets = [30, 0], sizes = [1, 8], strides = [1, 1]} : vector<32x8xf32> to vector<1x8xf32>
    %1468 = vector.broadcast %1466 : vector<8x1xf32> to vector<8x8xf32>
    %1469 = vector.broadcast %1467 : vector<1x8xf32> to vector<8x8xf32>
    %1470 = arith.addf %1468, %1469 : vector<8x8xf32>
    %cst_260 = arith.constant 0.000000e+00 : f32
    %1471 = vector.broadcast %cst_260 : f32 to vector<8x8xf32>
    %1472 = arith.cmpf ogt, %1470, %1471 : vector<8x8xf32>
    %cst_261 = arith.constant 2.000000e-01 : f32
    %1473 = vector.broadcast %cst_261 : f32 to vector<8x8xf32>
    %1474 = arith.mulf %1473, %1470 : vector<8x8xf32>
    %1475 = arith.select %1472, %1470, %1474 : vector<8x8xi1>, vector<8x8xf32>
    %1476 = vector.extract_strided_slice %1037 {offsets = [0, 30], sizes = [1, 1], strides = [1, 1]} : vector<1x32xf32> to vector<1x1xf32>
    %1477 = vector.broadcast %1476 : vector<1x1xf32> to vector<8x8xf32>
    %1478 = arith.mulf %1477, %1475 : vector<8x8xf32>
    %1479 = arith.addf %1465, %1478 : vector<8x8xf32>
    %1480 = vector.extract_strided_slice %1043 {offsets = [0, 31], sizes = [8, 1], strides = [1, 1]} : vector<8x32xf32> to vector<8x1xf32>
    %1481 = vector.extract_strided_slice %1044 {offsets = [31, 0], sizes = [1, 8], strides = [1, 1]} : vector<32x8xf32> to vector<1x8xf32>
    %1482 = vector.broadcast %1480 : vector<8x1xf32> to vector<8x8xf32>
    %1483 = vector.broadcast %1481 : vector<1x8xf32> to vector<8x8xf32>
    %1484 = arith.addf %1482, %1483 : vector<8x8xf32>
    %cst_262 = arith.constant 0.000000e+00 : f32
    %1485 = vector.broadcast %cst_262 : f32 to vector<8x8xf32>
    %1486 = arith.cmpf ogt, %1484, %1485 : vector<8x8xf32>
    %cst_263 = arith.constant 2.000000e-01 : f32
    %1487 = vector.broadcast %cst_263 : f32 to vector<8x8xf32>
    %1488 = arith.mulf %1487, %1484 : vector<8x8xf32>
    %1489 = arith.select %1486, %1484, %1488 : vector<8x8xi1>, vector<8x8xf32>
    %1490 = vector.extract_strided_slice %1037 {offsets = [0, 31], sizes = [1, 1], strides = [1, 1]} : vector<1x32xf32> to vector<1x1xf32>
    %1491 = vector.broadcast %1490 : vector<1x1xf32> to vector<8x8xf32>
    %1492 = arith.mulf %1491, %1489 : vector<8x8xf32>
    %1493 = arith.addf %1479, %1492 : vector<8x8xf32>
    %cst_264 = arith.constant 0.000000e+00 : f32
    %1494 = vector.broadcast %cst_264 : f32 to vector<8x8xf32>
    %1495 = arith.cmpf ogt, %1, %1494 : vector<8x8xf32>
    %cst_265 = arith.constant -1.000000e+30 : f32
    %1496 = vector.broadcast %cst_265 : f32 to vector<8x8xf32>
    %1497 = arith.select %1495, %1493, %1496 : vector<8x8xi1>, vector<8x8xf32>
    %cst_266 = arith.constant dense<0xFF800000> : vector<8xf32>
    %1498 = vector.multi_reduction <maximumf>, %1497, %cst_266 [1] : vector<8x8xf32> to vector<8xf32>
    %1499 = vector.shape_cast %1498 : vector<8xf32> to vector<8x1xf32>
    %1500 = vector.broadcast %1499 : vector<8x1xf32> to vector<8x8xf32>
    %1501 = arith.subf %1497, %1500 : vector<8x8xf32>
    %1502 = math.exp %1501 : vector<8x8xf32>
    %1503 = arith.mulf %1502, %1 : vector<8x8xf32>
    %cst_267 = arith.constant dense<0.000000e+00> : vector<8xf32>
    %1504 = vector.multi_reduction <add>, %1503, %cst_267 [1] : vector<8x8xf32> to vector<8xf32>
    %1505 = vector.shape_cast %1504 : vector<8xf32> to vector<8x1xf32>
    %1506 = tpu.reciprocal %1505 {approx = true} : vector<8x1xf32> -> vector<8x1xf32>
    %1507 = vector.broadcast %1506 : vector<8x1xf32> to vector<8x8xf32>
    %1508 = arith.mulf %1503, %1507 : vector<8x8xf32>
    %cst_268 = arith.constant dense<0.000000e+00> : vector<8x32xf32>
    %1509 = tpu.matmul %1508, %1042, %cst_268 {dimension_numbers = #tpu.dot_dimension_numbers<[1], [0], [0], [1], [0, 0, 1, 1], [], []>} : vector<8x8xf32>, vector<8x32xf32>, vector<8x32xf32> -> vector<8x32xf32>
    %1510 = vector.broadcast %1038 : vector<1x32xf32> to vector<8x32xf32>
    %1511 = arith.addf %1509, %1510 : vector<8x32xf32>
    %c0_269 = arith.constant 0 : index
    %c0_270 = arith.constant 0 : index
    %1512 = vector.load %arg18[%c0_269, %c0_270] : memref<1x32xf32, #tpu.memory_space<vmem>>, vector<1x32xf32>
    %c0_271 = arith.constant 0 : index
    %c0_272 = arith.constant 0 : index
    %1513 = vector.load %arg19[%c0_271, %c0_272] : memref<1x32xf32, #tpu.memory_space<vmem>>, vector<1x32xf32>
    %1514 = vector.broadcast %1512 : vector<1x32xf32> to vector<8x32xf32>
    %1515 = arith.mulf %1511, %1514 : vector<8x32xf32>
    %1516 = vector.broadcast %1513 : vector<1x32xf32> to vector<8x32xf32>
    %1517 = arith.addf %1515, %1516 : vector<8x32xf32>
    %cst_273 = arith.constant 0.000000e+00 : f32
    %1518 = vector.broadcast %cst_273 : f32 to vector<8x32xf32>
    %1519 = arith.cmpf ogt, %1517, %1518 : vector<8x32xf32>
    %cst_274 = arith.constant 2.000000e-01 : f32
    %1520 = vector.broadcast %cst_274 : f32 to vector<8x32xf32>
    %1521 = arith.mulf %1520, %1517 : vector<8x32xf32>
    %1522 = arith.select %1519, %1517, %1521 : vector<8x32xi1>, vector<8x32xf32>
    %cst_275 = arith.constant dense<0.000000e+00> : vector<8xf32>
    %1523 = vector.multi_reduction <add>, %1522, %cst_275 [1] : vector<8x32xf32> to vector<8xf32>
    %1524 = vector.shape_cast %1523 : vector<8xf32> to vector<8x1xf32>
    %cst_276 = arith.constant 3.200000e+01 : f32
    %1525 = vector.broadcast %cst_276 : f32 to vector<8x1xf32>
    %1526 = arith.divf %1524, %1525 : vector<8x1xf32>
    %1527 = vector.broadcast %1526 : vector<8x1xf32> to vector<8x32xf32>
    %1528 = arith.subf %1522, %1527 : vector<8x32xf32>
    %1529 = arith.mulf %1528, %1528 : vector<8x32xf32>
    %cst_277 = arith.constant dense<0.000000e+00> : vector<8xf32>
    %1530 = vector.multi_reduction <add>, %1529, %cst_277 [1] : vector<8x32xf32> to vector<8xf32>
    %1531 = vector.shape_cast %1530 : vector<8xf32> to vector<8x1xf32>
    %cst_278 = arith.constant 3.200000e+01 : f32
    %1532 = vector.broadcast %cst_278 : f32 to vector<8x1xf32>
    %1533 = arith.divf %1531, %1532 : vector<8x1xf32>
    %cst_279 = arith.constant 9.99999974E-6 : f32
    %1534 = vector.broadcast %cst_279 : f32 to vector<8x1xf32>
    %1535 = arith.addf %1533, %1534 : vector<8x1xf32>
    %1536 = math.rsqrt %1535 : vector<8x1xf32>
    %1537 = vector.broadcast %1536 : vector<8x1xf32> to vector<8x32xf32>
    %1538 = arith.mulf %1528, %1537 : vector<8x32xf32>
    %c0_280 = arith.constant 0 : index
    %c0_281 = arith.constant 0 : index
    %1539 = vector.load %arg20[%c0_280, %c0_281] : memref<1x32xf32, #tpu.memory_space<vmem>>, vector<1x32xf32>
    %1540 = vector.broadcast %1539 : vector<1x32xf32> to vector<8x32xf32>
    %1541 = arith.mulf %1538, %1540 : vector<8x32xf32>
    %c0_282 = arith.constant 0 : index
    %c0_283 = arith.constant 0 : index
    %1542 = vector.load %arg21[%c0_282, %c0_283] : memref<1x32xf32, #tpu.memory_space<vmem>>, vector<1x32xf32>
    %1543 = vector.broadcast %1542 : vector<1x32xf32> to vector<8x32xf32>
    %1544 = arith.addf %1541, %1543 : vector<8x32xf32>
    %c0_284 = arith.constant 0 : index
    %c0_285 = arith.constant 0 : index
    %1545 = vector.load %arg22[%c0_284, %c0_285] : memref<8x32xf32, #tpu.memory_space<vmem>>, vector<8x32xf32>
    tpu.vector_store %arg22[%c0_284, %c0_285], %1544 {strides = array<i32>} : memref<8x32xf32, #tpu.memory_space<vmem>>, vector<8x32xf32>,
    return
  }
}

</mosaic_0001>

<bundles_post_ra>
// kernel: agent_gat_forward.1
= control target key start
LH: loop header
LB: loop body
LE: loop exit
PB: predicated region body
PF: predicated region fallthrough
CT: control target
= control target key end

     0   :  { %s4730_s0 = inlined_call_operand.vmem [shape: f32[8,16], index: 0, kind: input, shape index: {}]   ;;  %s4731_s1 = inlined_call_operand.vmem [shape: f32[8,8], index: 1, kind: input, shape index: {}]   ;;  %s4732_s2 = inlined_call_operand.vmem [shape: f32[16,64], index: 2, kind: input, shape index: {}]   ;;  %s4733_s3 = inlined_call_operand.vmem [shape: f32[1,64], index: 3, kind: input, shape index: {}]   ;;  %s4734_s4 = inlined_call_operand.vmem [shape: f32[4,8], index: 4, kind: input, shape index: {}]   ;;  %s4735_s5 = inlined_call_operand.vmem [shape: f32[1,32], index: 5, kind: input, shape index: {}]   ;;  %s4736_s6 = inlined_call_operand.vmem [shape: f32[1,32], index: 6, kind: input, shape index: {}]   ;;  %s4737_s7 = inlined_call_operand.vmem [shape: f32[1,32], index: 7, kind: input, shape index: {}]   ;;  %s4738_s8 = inlined_call_operand.vmem [shape: f32[32,64], index: 8, kind: input, shape index: {}]   ;;  %s4739_s9 = inlined_call_operand.vmem [shape: f32[1,64], index: 9, kind: input, shape index: {}]   ;;  %s4740_s10 = inlined_call_operand.vmem [shape: f32[1,32], index: 10, kind: input, shape index: {}]   ;;  %s4741_s11 = inlined_call_operand.vmem [shape: f32[1,32], index: 11, kind: input, shape index: {}]   ;;  %s4742_s12 = inlined_call_operand.vmem [shape: f32[1,32], index: 12, kind: input, shape index: {}]   ;;  %s4743_s13 = inlined_call_operand.vmem [shape: f32[1,32], index: 13, kind: input, shape index: {}]   ;;  %s4744_s14 = inlined_call_operand.vmem [shape: f32[32,64], index: 14, kind: input, shape index: {}]   ;;  %s4745_s15 = inlined_call_operand.vmem [shape: f32[1,64], index: 15, kind: input, shape index: {}]   ;;  %s4746_s16 = inlined_call_operand.vmem [shape: f32[1,32], index: 16, kind: input, shape index: {}]   ;;  %s4747_s17 = inlined_call_operand.vmem [shape: f32[1,32], index: 17, kind: input, shape index: {}]   ;;  %s4748_s18 = inlined_call_operand.vmem [shape: f32[1,32], index: 18, kind: input, shape index: {}]   ;;  %s4749_s19 = inlined_call_operand.vmem [shape: f32[1,32], index: 19, kind: input, shape index: {}]   ;;  %s4750_s20 = inlined_call_operand.vmem [shape: f32[1,32], index: 20, kind: input, shape index: {}]   ;;  %s4751_s21 = inlined_call_operand.vmem [shape: f32[1,32], index: 21, kind: input, shape index: {}]   ;;  %s4752_s22 = inlined_call_operand.hbm [shape: f32[8,32], index: 22, kind: output, shape index: {}]  }
   0x1   :  { %4862 = sst [smem:[#allocation17_spill]] %s4730_s0 }
   0x2   :  { %4863 = sst [smem:[#allocation18_spill]] %s4731_s1 }
   0x3   :  { %4864 = sst [smem:[#allocation19_spill]] %s4732_s2 }
   0x4   :  { %4865 = sst [smem:[#allocation20_spill]] %s4733_s3 }
   0x5   :  { %4866 = sst [smem:[#allocation21_spill]] %s4734_s4 }
   0x6   :  { %4867 = sst [smem:[#allocation22_spill]] %s4735_s5 }
   0x7   :  { %4868 = sst [smem:[#allocation23_spill]] %s4736_s6 }
   0x8   :  { %4869 = sst [smem:[#allocation24_spill]] %s4737_s7 }
   0x9   :  { %4870 = sst [smem:[#allocation25_spill]] %s4739_s9 }
   0xa   :  { %4871 = sst [smem:[#allocation26_spill]] %s4741_s11 }
   0xb   :  { %4872 = sst [smem:[#allocation27_spill]] %s4742_s12 }
   0xc   :  { %4873 = sst [smem:[#allocation28_spill]] %s4743_s13 }
   0xd   :  { %4874 = sst [smem:[#allocation29_spill]] %s4744_s14 }
   0xe   :  { %4875 = sst [smem:[#allocation30_spill]] %s4745_s15 }
   0xf   :  { %4876 = sst [smem:[#allocation31_spill]] %s4746_s16 }
  0x10   :  { %4877 = sst [smem:[#allocation32_spill]] %s4747_s17 }
  0x11   :  { %4878 = sst [smem:[#allocation33_spill]] %s4748_s18 }
  0x12   :  { %4879 = sst [smem:[#allocation34_spill]] %s4749_s19 }
  0x13   :  { %4880 = sst [smem:[#allocation35_spill]] %s4750_s20 }
  0x14   :  { %4881 = sst [smem:[#allocation36_spill]] %s4751_s21 }
  0x15   :  { %4882 = sst [smem:[#allocation37_spill]] %s4752_s22 }
  0x16   :  { %s4883_s29 = sld [smem:[#allocation19_spill]]  ;;  %v4823_v2 = vmov 0.0|0.0   ;;  %vm3343_vm0 = vmmov 0   ;;  %v4821_v4 = vmov 0.0   ;;  %s4884_s1 = sld [smem:[#allocation21_spill]]  ;;  %vm85_vm1 = vcmask 130048  }
  0x17   :  { %2971 = vmatprep.subr.bf16.mxu0 %v4823_v2  ;;  %2916 = vmatprep.mubr.msk.f32.mxu0 %vm3343_vm0, %v4821_v4  ;;  %s3345_s5 = smov 127   ;;  %s3346_s24 = smov 125  }
  0x18   :  { %s4885_s26 = sld [smem:[#allocation17_spill]]  ;;  %2919 = vmatprep.subr.mxu1 %v4821_v4 }
  0x1c   :  { %v74_v0 = vld [vmem:[%s4883_s29] sm:$0xff]  ;;  %v75_v1 = vld [vmem:[%s4883_s29 + $0x8] sm:$0xff] }
  0x1d   :  { %v2972_v3 = vpack.c.bf16 %v75_v1, %v74_v0  ;;  %v77_v5 = vld [vmem:[%s4884_s1] sm:$0xf] }
  0x1e   :  { %222 = vrot.lane.b32.xlu0 %v77_v5, %s3345_s5  ;;  %260 = vrot.lane.b32.xlu1 %v77_v5, %s3346_s24  ;;  %2986 = vpush %v77_v5  ;;  %v72_v6 = vld [vmem:[%s4885_s26] sm:$0xff] }
  0x1f   :  { %2973 = vmatpush3.bf16.msra.mxu0 %v2972_v3 }
  0x20   :  { %27 = vsyncpa [#allocation3], 0  ;;  %2929 = vmatprep.subr.mxu0 %v4821_v4  ;;  %2921 = vmatprep.mubr.msk.f32.mxu1 %vm3343_vm0, %v4821_v4  ;;  %s3347_s2 = smov 126   ;;  %s3348_s27 = smov 124   ;;  %v443_v7 = vrot.slane %v77_v5, 1  ;;  %v683_v8 = vrot.slane %v77_v5, 2 }
  0x21   :  { %s3349_s3 = smov 123   ;;  %s3350_s28 = smov 122   ;;  %v923_v9 = vrot.slane %v77_v5, 3  ;;  %v4812_v10 = vmov 33   ;;  %v4819_v11 = vmov 32   ;;  %v4817_v44 = vmov 34  }
  0x22   :  { %2917 = vmatmul.mubr.msk.f32.vlgmr.msra.gmra.mrb[0].mxu0 %vm85_vm1, %v72_v6  ;;  %241 = vrot.lane.b32.xlu0 %v77_v5, %s3347_s2  ;;  %s3351_s29 = smov 121   ;;  %s4886_s0 = sld [smem:[#allocation20_spill]]  ;;  %v4808_v45 = vmov 35   ;;  %v4806_v46 = vmov 40   ;;  %v4804_v47 = vmov 36   ;;  %v4802_v48 = vmov 41  }
  0x23   :  { %279 = vrot.lane.b32.xlu1 %v77_v5, %s3348_s27  ;;  %2931 = vmatprep.mubr.msk.f32.mxu0 %vm3343_vm0, %v4821_v4  ;;  %v4784_v49 = vmov 49   ;;  %v4796_v50 = vmov 42   ;;  %v4766_v51 = vmov 56   ;;  %v4786_v52 = vmov 48   ;;  %s4887_s7 = sld [smem:[#allocation18_spill]] }
  0x24   :  { %3132 = vset.pattern.permute.xlu1 %v4812_v10  ;;  %3131 = vset.pattern.permute.xlu0 %v4819_v11  ;;  %v4810_v53 = vmov 38   ;;  %v4815_v54 = vmov 37   ;;  %v4780_v55 = vmov 51   ;;  %v4798_v56 = vmov 43  }
  0x25   :  { %v4762_v57 = vmov 59   ;;  %v4764_v58 = vmov 57   ;;  %v4760_v59 = vmov 60   ;;  %v4782_v60 = vmov 50  }
  0x26   :  { %298 = vrot.lane.b32.xlu0 %v77_v5, %s3349_s3  ;;  %v4772_v61 = vmov 61   ;;  %v4794_v62 = vmov 44   ;;  %v4776_v63 = vmov 55   ;;  %v4774_v0 = vmov 58  }
  0x27   :  { %317 = vrot.lane.b32.xlu1 %v77_v5, %s3350_s28  ;;  %v4800_v1 = vmov 39   ;;  %v4792_v3 = vmov 45   ;;  %v4790_v6 = vmov 46   ;;  %vm345_vm11 = vcmask 64512  }
  0x28   :  { %v2862_v40 = vld [vmem:[%s4886_s0] ss:$0 sm:$0xff] }
  0x2a   :  { %336 = vrot.lane.b32.xlu0 %v77_v5, %s3351_s29  ;;  %v4778_v5 = vmov 52  }
  0x2b   :  { %461 = vrot.lane.b32.xlu1 %v443_v7, %s3345_s5 }
  0x2e   :  { %480 = vrot.lane.b32.xlu0 %v443_v7, %s3347_s2 }
  0x2f   :  { %499 = vrot.lane.b32.xlu1 %v443_v7, %s3346_s24 }
  0x32   :  { %518 = vrot.lane.b32.xlu0 %v443_v7, %s3348_s27 }
  0x33   :  { %537 = vrot.lane.b32.xlu1 %v443_v7, %s3349_s3 }
  0x36   :  { %556 = vrot.lane.b32.xlu0 %v443_v7, %s3350_s28 }
  0x37   :  { %575 = vrot.lane.b32.xlu1 %v443_v7, %s3351_s29 }
  0x3a   :  { %701 = vrot.lane.b32.xlu0 %v683_v8, %s3345_s5 }
  0x3b   :  { %720 = vrot.lane.b32.xlu1 %v683_v8, %s3347_s2 }
  0x3e   :  { %739 = vrot.lane.b32.xlu0 %v683_v8, %s3346_s24 }
  0x3f   :  { %758 = vrot.lane.b32.xlu1 %v683_v8, %s3348_s27 }
  0x42   :  { %777 = vrot.lane.b32.xlu0 %v683_v8, %s3349_s3 }
  0x43   :  { %796 = vrot.lane.b32.xlu1 %v683_v8, %s3350_s28 }
  0x46   :  { %815 = vrot.lane.b32.xlu0 %v683_v8, %s3351_s29 }
  0x47   :  { %941 = vrot.lane.b32.xlu1 %v923_v9, %s3345_s5 }
  0x4a   :  { %960 = vrot.lane.b32.xlu0 %v923_v9, %s3347_s2 }
  0x4b   :  { %979 = vrot.lane.b32.xlu1 %v923_v9, %s3346_s24 }
  0x4e   :  { %998 = vrot.lane.b32.xlu0 %v923_v9, %s3348_s27 }
  0x4f   :  { %1017 = vrot.lane.b32.xlu1 %v923_v9, %s3349_s3  ;;  %s3668_s23 = spop %2986 }
  0x52   :  { %1036 = vrot.lane.b32.xlu0 %v923_v9, %s3350_s28 }
  0x53   :  { %1055 = vrot.lane.b32.xlu1 %v923_v9, %s3351_s29 }
  0x90   :  { %v223_v12 = vpop.permute.xlu0 %222  ;;  %v261_v13 = vpop.permute.xlu1 %260 }
  0x91   :  { %2988 = vpush %v223_v12  ;;  %v4758_v12 = vmov 62  }
  0x94   :  { %v242_v14 = vpop.permute.xlu0 %241 }
  0x95   :  { %2990 = vpush %v242_v14  ;;  %v280_v15 = vpop.permute.xlu1 %279 }
  0x96   :  { %2992 = vpush %v261_v13  ;;  %v4756_v13 = vmov 63  }
  0x97   :  { %2994 = vpush %v280_v15 }
  0x98   :  { %v299_v17 = vpop.permute.xlu0 %298 }
  0x99   :  { %v318_v16 = vpop.permute.xlu1 %317  ;;  %2996 = vpush %v299_v17 }
  0x9a   :  { %2998 = vpush %v318_v16 }
  0x9c   :  { %v337_v18 = vpop.permute.xlu0 %336 }
  0x9d   :  { %v462_v19 = vpop.permute.xlu1 %461  ;;  %3000 = vpush %v337_v18 }
  0x9e   :  { %3002 = vpush %v443_v7  ;;  %v4770_v7 = vmov 53  }
  0x9f   :  { %3004 = vpush %v462_v19 }
  0xa0   :  { %v481_v20 = vpop.permute.xlu0 %480 }
  0xa1   :  { %v500_v21 = vpop.permute.xlu1 %499  ;;  %3006 = vpush %v481_v20 }
  0xa2   :  { %3008 = vpush %v500_v21 }
  0xa4   :  { %v519_v22 = vpop.permute.xlu0 %518 }
  0xa5   :  { %v538_v23 = vpop.permute.xlu1 %537  ;;  %3010 = vpush %v519_v22 }
  0xa6   :  { %3012 = vpush %v538_v23 }
  0xa8   :  { %v557_v24 = vpop.permute.xlu0 %556 }
  0xa9   :  { %v576_v25 = vpop.permute.xlu1 %575  ;;  %3014 = vpush %v557_v24 }
  0xaa   :  { %3016 = vpush %v576_v25 }
  0xab   :  { %3018 = vpush %v683_v8  ;;  %v4788_v8 = vmov 47  }
  0xac   :  { %v702_v26 = vpop.permute.xlu0 %701 }
  0xad   :  { %v721_v27 = vpop.permute.xlu1 %720  ;;  %3020 = vpush %v702_v26 }
  0xae   :  { %3022 = vpush %v721_v27 }
  0xb0   :  { %v740_v28 = vpop.permute.xlu0 %739 }
  0xb1   :  { %v759_v29 = vpop.permute.xlu1 %758  ;;  %3024 = vpush %v740_v28 }
  0xb2   :  { %3026 = vpush %v759_v29 }
  0xb4   :  { %v778_v30 = vpop.permute.xlu0 %777 }
  0xb5   :  { %v797_v31 = vpop.permute.xlu1 %796  ;;  %3028 = vpush %v778_v30 }
  0xb6   :  { %3030 = vpush %v797_v31 }
  0xb8   :  { %v816_v32 = vpop.permute.xlu0 %815 }
  0xb9   :  { %v942_v33 = vpop.permute.xlu1 %941  ;;  %3032 = vpush %v816_v32 }
  0xba   :  { %3034 = vpush %v923_v9  ;;  %v4768_v9 = vmov 54  }
  0xbb   :  { %3036 = vpush %v942_v33 }
  0xbc   :  { %v961_v34 = vpop.permute.xlu0 %960 }
  0xbd   :  { %v980_v35 = vpop.permute.xlu1 %979  ;;  %3038 = vpush %v961_v34 }
  0xbe   :  { %3040 = vpush %v980_v35 }
  0xc0   :  { %v999_v36 = vpop.permute.xlu0 %998 }
  0xc1   :  { %v1018_v37 = vpop.permute.xlu1 %1017  ;;  %3042 = vpush %v999_v36  ;;  %v196_v36 = vlaneseq }
  0xc2   :  { %3044 = vpush %v1018_v37  ;;  %s3670_s1 = spop %2988 }
  0xc4   :  { %v1037_v38 = vpop.permute.xlu0 %1036 }
  0xc5   :  { %v1056_v39 = vpop.permute.xlu1 %1055  ;;  %3046 = vpush %v1037_v38 }
  0xc6   :  { %3048 = vpush %v1056_v39  ;;  %s3674_s5 = spop %2990  ;;  %v206_v39 = vstv %s3668_s23  ;;  %s4912_s23 = sld [smem:[#allocation24_spill]] }
  0xc7   :  { %s3676_s24 = spop %2992 }
  0xc8   :  { %s3678_s6 = spop %2994 }
  0xca   :  { %s3680_s25 = spop %2996 }
  0xcb   :  { %s3684_s26 = spop %2998 }
  0xce   :  { %s3686_s2 = spop %3000 }
  0xcf   :  { %s3688_s27 = spop %3002 }
  0xd0   :  { %s3690_s3 = spop %3004 }
  0xd2   :  { %s3694_s28 = spop %3006 }
  0xd3   :  { %s3698_s29 = spop %3008 }
  0xd6   :  { %s3700_s30 = spop %3010 }
  0xd7   :  { %s3702_s4 = spop %3012 }
  0xda   :  { %s3706_s0 = spop %3014 }
  0xdb   :  { %s3710_s22 = spop %3016 }
  0xdc   :  { %s3712_s21 = spop %3018 }
  0xde   :  { %s3714_s20 = spop %3020 }
  0xdf   :  { %s3720_s19 = spop %3022 }
  0xe2   :  { %s3722_s18 = spop %3024 }
  0xe3   :  { %s3724_s17 = spop %3026 }
  0xe6   :  { %s3726_s15 = spop %3028 }
  0xe7   :  { %s3736_s13 = spop %3030 }
  0xea   :  { %s3741_s12 = spop %3032 }
  0xeb   :  { %s3751_s11 = spop %3034 }
  0xec   :  { %s3761_s16 = spop %3036 }
  0xee   :  { %s3783_s14 = spop %3038 }
  0xef   :  { %s3041_s9 = spop %3040 }
  0xf5   :  { %v155_v41 = vpop.f32.mrb[0].mxu0 }
  0xf6   :  { %v3573_v42 = vadd.f32 %v2862_v40, %v155_v41  ;;  %v2918_v43 = vpop.f32.mrb[1].mxu0  ;;  %v225_v40 = vstv %s3670_s1  ;;  %v244_v41 = vstv %s3674_s5 }
  0xf7   :  { %v263_v43 = vstv %s3676_s24  ;;  %s4968_s24 = sld [smem:[#allocation31_spill]] }
  0xf8   :  { %211 = vperm.xlu1 %3132, %v3573_v42   ;;  %193 = vperm.xlu0 %3131, %v3573_v42  }
  0xf9   :  { %2920 = vmatpush3.msra.mxu1 %v3573_v42 }
  0xfa   :  { %2924 = vmatprep.subr.mxu1 %v4821_v4 }
  0xfc   :  { %3133 = vset.pattern.permute.xlu1 %v4817_v44  ;;  %3134 = vset.pattern.permute.xlu0 %v4808_v45 }
  0xfd   :  { %230 = vperm.xlu1 %3133, %v3573_v42   ;;  %249 = vperm.xlu0 %3134, %v3573_v42  }
 0x101   :  { %3135 = vset.pattern.permute.xlu1 %v4806_v46  ;;  %3137 = vset.pattern.permute.xlu0 %v4804_v47 }
 0x102   :  { %432 = vperm.xlu1 %3135, %v3573_v42   ;;  %268 = vperm.xlu0 %3137, %v3573_v42  }
 0x106   :  { %3136 = vset.pattern.permute.xlu1 %v4802_v48  ;;  %3140 = vset.pattern.permute.xlu0 %v4784_v49 }
 0x107   :  { %450 = vperm.xlu1 %3136, %v3573_v42   ;;  %690 = vperm.xlu0 %3140, %v3573_v42  }
 0x10b   :  { %3138 = vset.pattern.permute.xlu1 %v4796_v50  ;;  %3143 = vset.pattern.permute.xlu0 %v4766_v51  ;;  %v445_v51 = vstv %s3688_s27  ;;  %s3390_s27 = smov 24  }
 0x10c   :  { %469 = vperm.xlu1 %3138, %v3573_v42   ;;  %912 = vperm.xlu0 %3143, %v3573_v42  }
 0x110   :  { %3139 = vset.pattern.permute.xlu1 %v4786_v52  ;;  %3146 = vset.pattern.permute.xlu0 %v4810_v53 }
 0x111   :  { %672 = vperm.xlu1 %3139, %v3573_v42   ;;  %306 = vperm.xlu0 %3146, %v3573_v42  }
 0x115   :  { %3141 = vset.pattern.permute.xlu1 %v4815_v54  ;;  %3149 = vset.pattern.permute.xlu0 %v4780_v55 }
 0x116   :  { %287 = vperm.xlu1 %3141, %v3573_v42   ;;  %728 = vperm.xlu0 %3149, %v3573_v42  }
 0x11a   :  { %3142 = vset.pattern.permute.xlu1 %v4798_v56  ;;  %3152 = vset.pattern.permute.xlu0 %v4762_v57  ;;  %v197_v57 = vshrl.u32 %v196_v36, 7 }
 0x11b   :  { %488 = vperm.xlu1 %3142, %v3573_v42   ;;  %968 = vperm.xlu0 %3152, %v3573_v42  }
 0x11c   :  { %v3769_v50 = vsub.s32 3, %v197_v57  ;;  %v3771_v56 = vsub.s32 4, %v197_v57  ;;  %v3775_v48 = vsub.s32 6, %v197_v57  ;;  %v3777_v47 = vsub.s32 7, %v197_v57 }
 0x11f   :  { %3144 = vset.pattern.permute.xlu1 %v4764_v58  ;;  %3155 = vset.pattern.permute.xlu0 %v4760_v59  ;;  %v320_v59 = vstv %s3684_s26  ;;  %v339_v58 = vstv %s3686_s2  ;;  %s4999_s26 = sld [smem:[#allocation26_spill]] }
 0x120   :  { %930 = vperm.xlu1 %3144, %v3573_v42   ;;  %987 = vperm.xlu0 %3155, %v3573_v42  }
 0x124   :  { %3145 = vset.pattern.permute.xlu1 %v4782_v60  ;;  %3158 = vset.pattern.permute.xlu0 %v4772_v61 }
 0x125   :  { %709 = vperm.xlu1 %3145, %v3573_v42   ;;  %1006 = vperm.xlu0 %3158, %v3573_v42  }
 0x129   :  { %3147 = vset.pattern.permute.xlu1 %v4794_v62  ;;  %3161 = vset.pattern.permute.xlu0 %v4776_v63  ;;  %v3767_v62 = vsub.s32 2, %v197_v57 }
 0x12a   :  { %507 = vperm.xlu1 %3147, %v3573_v42   ;;  %804 = vperm.xlu0 %3161, %v3573_v42  }
 0x12e   :  { %3148 = vset.pattern.permute.xlu1 %v4774_v0 }
 0x12f   :  { %949 = vperm.xlu1 %3148, %v3573_v42  }
 0x133   :  { %3150 = vset.pattern.permute.xlu1 %v4800_v1  ;;  %v3773_v1 = vsub.s32 5, %v197_v57 }
 0x134   :  { %325 = vperm.xlu1 %3150, %v3573_v42  }
 0x138   :  { %3151 = vset.pattern.permute.xlu1 %v4792_v3  ;;  %v3765_v3 = vsub.s32 1, %v197_v57 }
 0x139   :  { %526 = vperm.xlu1 %3151, %v3573_v42  }
 0x13d   :  { %3153 = vset.pattern.permute.xlu1 %v4778_v5 }
 0x13e   :  { %747 = vperm.xlu1 %3153, %v3573_v42  }
 0x142   :  { %3154 = vset.pattern.permute.xlu1 %v4790_v6  ;;  %v3763_v6 = vsub.s32 0, %v197_v57 }
 0x143   :  { %545 = vperm.xlu1 %3154, %v3573_v42  }
 0x147   :  { %3156 = vset.pattern.permute.xlu1 %v4770_v7 }
 0x148   :  { %766 = vperm.xlu1 %3156, %v3573_v42  }
 0x14c   :  { %3157 = vset.pattern.permute.xlu1 %v4788_v8 }
 0x14d   :  { %564 = vperm.xlu1 %3157, %v3573_v42  }
 0x151   :  { %3159 = vset.pattern.permute.xlu1 %v4768_v9  ;;  %v464_v9 = vstv %s3690_s3  ;;  %s4910_s3 = sld [smem:[#allocation22_spill]] }
 0x152   :  { %785 = vperm.xlu1 %3159, %v3573_v42  }
 0x156   :  { %3160 = vset.pattern.permute.xlu1 %v4758_v12  ;;  %v301_v12 = vstv %s3680_s25 }
 0x157   :  { %1025 = vperm.xlu1 %3160, %v3573_v42  }
 0x15b   :  { %3162 = vset.pattern.permute.xlu1 %v4756_v13  ;;  %v282_v13 = vstv %s3678_s6 }
 0x15c   :  { %1044 = vperm.xlu1 %3162, %v3573_v42  }
 0x177   :  { %v3640_v14 = vpop.permute.xlu1 %211  ;;  %v3696_v31 = vpop.permute.xlu0 %193 }
 0x17c   :  { %v3642_v15 = vpop.permute.xlu1 %230  ;;  %v3708_v33 = vpop.permute.xlu0 %249 }
 0x181   :  { %v3644_v16 = vpop.permute.xlu1 %432  ;;  %v3718_v35 = vpop.permute.xlu0 %268 }
 0x185   :  { %159 = vxpose.xlu1.b32.start.end [1/1] (short) (narrow) %v3573_v42, 32 }
 0x186   :  { %v3646_v17 = vpop.permute.xlu1 %450  ;;  %v3730_v38 = vpop.permute.xlu0 %690 }
 0x18b   :  { %v3648_v18 = vpop.permute.xlu1 %469  ;;  %v3759_v36 = vpop.permute.xlu0 %912 }
 0x190   :  { %v3650_v19 = vpop.permute.xlu1 %672  ;;  %v307_v44 = vpop.permute.xlu0 %306 }
 0x195   :  { %v3652_v20 = vpop.permute.xlu1 %287 }
 0x19a   :  { %v3654_v21 = vpop.permute.xlu1 %488 }
 0x19f   :  { %v3656_v22 = vpop.permute.xlu1 %930 }
 0x1a4   :  { %v3658_v23 = vpop.permute.xlu1 %709 }
 0x1a9   :  { %v3660_v24 = vpop.permute.xlu1 %507 }
 0x1ae   :  { %v3662_v25 = vpop.permute.xlu1 %949 }
 0x1b3   :  { %v3664_v26 = vpop.permute.xlu1 %325 }
 0x1b8   :  { %v3666_v27 = vpop.permute.xlu1 %526 }
 0x1bd   :  { %v3672_v28 = vpop.permute.xlu1 %747 }
 0x1c2   :  { %v3682_v29 = vpop.permute.xlu1 %545 }
 0x1c7   :  { %v3692_v30 = vpop.permute.xlu1 %766 }
 0x1cc   :  { %v3704_v32 = vpop.permute.xlu1 %564 }
 0x1d1   :  { %v3716_v34 = vpop.permute.xlu1 %785 }
 0x1d6   :  { %v3728_v37 = vpop.permute.xlu1 %1025 }
 0x1db   :  { %v3757_v8 = vpop.permute.xlu1 %1044 }
 0x205   :  { %v175_v2 = vpop.trf.xlu1 }
 0x206   :  { %v199_v52 = vrot.slane %v175_v2, %v3763_v6  ;;  %v217_v49 = vrot.slane %v175_v2, %v3765_v3  ;;  %v236_v60 = vrot.slane %v175_v2, %v3767_v62  ;;  %v255_v57 = vrot.slane %v175_v2, %v3769_v50 }
 0x207   :  { %v274_v45 = vrot.slane %v175_v2, %v3771_v56  ;;  %v293_v10 = vrot.slane %v175_v2, %v3773_v1  ;;  %v312_v53 = vrot.slane %v175_v2, %v3775_v48  ;;  %v331_v54 = vrot.slane %v175_v2, %v3777_v47 }
 0x208   :  { %v200_v4 = vadd.f32 %v199_v52, %v3696_v31  ;;  %v218_v11 = vadd.f32 %v217_v49, %v3640_v14  ;;  %v237_v46 = vadd.f32 %v236_v60, %v3642_v15  ;;  %v256_v55 = vadd.f32 %v255_v57, %v3708_v33 }
 0x209   :  { %v3801_v5 = vpop.trf.xlu1  ;;  %v275_v63 = vadd.f32 %v274_v45, %v3718_v35  ;;  %v294_v0 = vadd.f32 %v293_v10, %v3652_v20  ;;  %v313_v61 = vadd.f32 %v312_v53, %v307_v44  ;;  %v332_v7 = vadd.f32 %v331_v54, %v3664_v26 }
 0x20a   :  { %v438_v2 = vrot.slane %v3801_v5, %v3763_v6  ;;  %v456_v49 = vrot.slane %v3801_v5, %v3765_v3  ;;  %vm201_vm2 = vcmp.gt.f32.partialorder %v200_v4, 0.0  ;;  %v202_v52 = vmul.f32 0.2, %v200_v4 }
 0x20b   :  { %vm219_vm3 = vcmp.gt.f32.partialorder %v218_v11, 0.0  ;;  %v220_v60 = vmul.f32 0.2, %v218_v11  ;;  %vm238_vm4 = vcmp.gt.f32.partialorder %v237_v46, 0.0  ;;  %v239_v45 = vmul.f32 0.2, %v237_v46 }
 0x20c   :  { %v203_v14 = vsel %vm201_vm2, %v200_v4, %v202_v52  ;;  %vm257_vm5 = vcmp.gt.f32.partialorder %v256_v55, 0.0  ;;  %v258_v10 = vmul.f32 0.2, %v256_v55  ;;  %vm276_vm6 = vcmp.gt.f32.partialorder %v275_v63, 0.0 }
 0x20d   :  { %v3810_v44 = vpop.trf.xlu1  ;;  %v208_v53 = vmul.f32 %v206_v39, %v203_v14  ;;  %v221_v54 = vsel %vm219_vm3, %v218_v11, %v220_v60  ;;  %v240_v15 = vsel %vm238_vm4, %v237_v46, %v239_v45  ;;  %v277_v20 = vmul.f32 0.2, %v275_v63  ;;  %v3825_v11 = vld [vmem:[%s4887_s7] sm:$0xff] }
 0x20e   :  { %v678_v26 = vrot.slane %v3810_v44, %v3763_v6  ;;  %v696_v31 = vrot.slane %v3810_v44, %v3765_v3  ;;  %v227_v4 = vmul.f32 %v225_v40, %v221_v54  ;;  %v246_v33 = vmul.f32 %v244_v41, %v240_v15  ;;  %4888 = vst [vmem:[#allocation5_spill] sm:$0xff] %v3825_v11 }
 0x20f   :  { %v259_v35 = vsel %vm257_vm5, %v256_v55, %v258_v10  ;;  %v278_v57 = vsel %vm276_vm6, %v275_v63, %v277_v20  ;;  %vm295_vm7 = vcmp.gt.f32.partialorder %v294_v0, 0.0  ;;  %v296_v52 = vmul.f32 0.2, %v294_v0 }
 0x210   :  { %v228_v46 = vadd.f32 %v227_v4, %v208_v53  ;;  %v265_v39 = vmul.f32 %v263_v43, %v259_v35  ;;  %v284_v60 = vmul.f32 %v282_v13, %v278_v57  ;;  %vm314_vm8 = vcmp.gt.f32.partialorder %v313_v61, 0.0  ;;  %v3839_v53 = vpop.permute.xlu0 %728 }
 0x211   :  { %v3831_v45 = vpop.trf.xlu1  ;;  %v297_v40 = vsel %vm295_vm7, %v294_v0, %v296_v52  ;;  %v315_v55 = vmul.f32 0.2, %v313_v61  ;;  %vm333_vm9 = vcmp.gt.f32.partialorder %v332_v7, 0.0  ;;  %v334_v63 = vmul.f32 0.2, %v332_v7 }
 0x212   :  { %v918_v41 = vrot.slane %v3831_v45, %v3763_v6  ;;  %v936_v14 = vrot.slane %v3831_v45, %v3765_v3  ;;  %v247_v10 = vadd.f32 %v246_v33, %v228_v46  ;;  %v303_v43 = vmul.f32 %v301_v12, %v297_v40 }
 0x213   :  { %v316_v13 = vsel %vm314_vm8, %v313_v61, %v315_v55  ;;  %v335_v54 = vsel %vm333_vm9, %v332_v7, %v334_v63  ;;  %vm343_vm10 = vcmp.gt.f32.partialorder %v3825_v11, 0.0  ;;  %v439_v0 = vadd.f32 %v438_v2, %v3644_v16 }
 0x214   :  { %v457_v15 = vadd.f32 %v456_v49, %v3646_v17  ;;  %v266_v20 = vadd.f32 %v265_v39, %v247_v10  ;;  %v322_v4 = vmul.f32 %v320_v59, %v316_v13  ;;  %v341_v35 = vmul.f32 %v339_v58, %v335_v54 }
 0x215   :  { %v475_v12 = vrot.slane %v3801_v5, %v3767_v62  ;;  %vm440_vm12 = vcmp.gt.f32.partialorder %v439_v0, 0.0  ;;  %v441_v61 = vmul.f32 0.2, %v439_v0  ;;  %v494_v17 = vrot.slane %v3801_v5, %v3769_v50 }
 0x216   :  { %vm458_vm13 = vcmp.gt.f32.partialorder %v457_v15, 0.0  ;;  %v459_v7 = vmul.f32 0.2, %v457_v15  ;;  %v285_v33 = vadd.f32 %v284_v60, %v266_v20  ;;  %v513_v59 = vrot.slane %v3801_v5, %v3771_v56 }
 0x217   :  { %v476_v16 = vadd.f32 %v475_v12, %v3648_v18  ;;  %v442_v58 = vsel %vm440_vm12, %v439_v0, %v441_v61  ;;  %v532_v49 = vrot.slane %v3801_v5, %v3773_v1  ;;  %v551_v57 = vrot.slane %v3801_v5, %v3775_v48  ;;  %v3863_v18 = vpop.permute.xlu0 %968 }
 0x218   :  { %v460_v2 = vsel %vm458_vm13, %v457_v15, %v459_v7  ;;  %v304_v52 = vadd.f32 %v303_v43, %v285_v33  ;;  %v447_v46 = vmul.f32 %v445_v51, %v442_v58  ;;  %v495_v40 = vadd.f32 %v494_v17, %v3654_v21 }
 0x219   :  { %v466_v39 = vmul.f32 %v464_v9, %v460_v2  ;;  %vm477_vm14 = vcmp.gt.f32.partialorder %v476_v16, 0.0  ;;  %v478_v60 = vmul.f32 0.2, %v476_v16  ;;  %v514_v55 = vadd.f32 %v513_v59, %v3660_v24 }
 0x21a   :  { %v533_v63 = vadd.f32 %v532_v49, %v3666_v27  ;;  %v323_v10 = vadd.f32 %v322_v4, %v304_v52  ;;  %v552_v54 = vadd.f32 %v551_v57, %v3682_v29  ;;  %v570_v51 = vrot.slane %v3801_v5, %v3777_v47 }
 0x21b   :  { %v467_v13 = vadd.f32 %v466_v39, %v447_v46  ;;  %v479_v9 = vsel %vm477_vm14, %v476_v16, %v478_v60  ;;  %vm496_vm15 = vcmp.gt.f32.partialorder %v495_v40, 0.0  ;;  %v497_v43 = vmul.f32 0.2, %v495_v40  ;;  %v3879_v33 = vpop.permute.xlu0 %987 }
 0x21c   :  { %vm515_vm2 = vcmp.gt.f32.partialorder %v514_v55, 0.0  ;;  %v342_v0 = vadd.f32 %v341_v35, %v323_v10  ;;  %v4889_v15 = vstv %s3694_s28  ;;  %v516_v20 = vmul.f32 0.2, %v514_v55  ;;  %s5001_s28 = sld [smem:[#allocation28_spill]] }
 0x21d   :  { %v485_v21 = vmul.f32 %v4889_v15, %v479_v9  ;;  %vm534_vm3 = vcmp.gt.f32.partialorder %v533_v63, 0.0  ;;  %v498_v24 = vsel %vm496_vm15, %v495_v40, %v497_v43  ;;  %v535_v27 = vmul.f32 0.2, %v533_v63 }
 0x21e   :  { %vm553_vm4 = vcmp.gt.f32.partialorder %v552_v54, 0.0  ;;  %v554_v29 = vmul.f32 0.2, %v552_v54  ;;  %v3875_v4 = vsel %vm343_vm10, %v342_v0, -1e+30  ;;  %v4890_v12 = vstv %s3698_s29 }
 0x21f   :  { %v486_v5 = vadd.f32 %v485_v21, %v467_v13  ;;  %v504_v61 = vmul.f32 %v4890_v12, %v498_v24  ;;  %v517_v7 = vsel %vm515_vm2, %v514_v55, %v516_v20  ;;  %v346_v35 = vsel %vm345_vm11, %v3875_v4, -inf  ;;  %v3906_v9 = vpop.permute.xlu0 %1006 }
 0x220   :  { %v4891_v16 = vstv %s3700_s30  ;;  %v536_v59 = vsel %vm534_vm3, %v533_v63, %v535_v27  ;;  %v555_v58 = vsel %vm553_vm4, %v552_v54, %v554_v29  ;;  %347 = vmax.xlane.f32.xlu0 %v346_v35  ;;  %v4892_v49 = vstv %s3702_s4  ;;  %s4911_s30 = sld [smem:[#allocation23_spill]]  ;;  %s5003_s4 = sld [smem:[#allocation30_spill]] }
 0x221   :  { %v523_v17 = vmul.f32 %v4891_v16, %v517_v7  ;;  %v505_v2 = vadd.f32 %v504_v61, %v486_v5  ;;  %v542_v57 = vmul.f32 %v4892_v49, %v536_v59  ;;  %v4893_v52 = vstv %s3706_s0 }
 0x222   :  { %v561_v46 = vmul.f32 %v4893_v52, %v555_v58  ;;  %v571_v39 = vadd.f32 %v570_v51, %v3704_v32  ;;  %v679_v60 = vadd.f32 %v678_v26, %v3650_v19  ;;  %v697_v40 = vadd.f32 %v696_v31, %v3730_v38 }
 0x223   :  { %v715_v55 = vrot.slane %v3810_v44, %v3767_v62  ;;  %v734_v63 = vrot.slane %v3810_v44, %v3769_v50  ;;  %v524_v10 = vadd.f32 %v523_v17, %v505_v2  ;;  %v753_v13 = vrot.slane %v3810_v44, %v3771_v56 }
 0x224   :  { %vm572_vm5 = vcmp.gt.f32.partialorder %v571_v39, 0.0  ;;  %v573_v32 = vmul.f32 0.2, %v571_v39  ;;  %vm680_vm6 = vcmp.gt.f32.partialorder %v679_v60, 0.0  ;;  %v681_v19 = vmul.f32 0.2, %v679_v60 }
 0x225   :  { %vm698_vm7 = vcmp.gt.f32.partialorder %v697_v40, 0.0  ;;  %v699_v26 = vmul.f32 0.2, %v697_v40  ;;  %v543_v38 = vadd.f32 %v542_v57, %v524_v10  ;;  %v716_v54 = vadd.f32 %v715_v55, %v3658_v23 }
 0x226   :  { %v574_v31 = vsel %vm572_vm5, %v571_v39, %v573_v32  ;;  %v735_v51 = vadd.f32 %v734_v63, %v3839_v53  ;;  %v4894_v43 = vstv %s3710_s22  ;;  %v682_v15 = vsel %vm680_vm6, %v679_v60, %v681_v19  ;;  %v805_v60 = vpop.permute.xlu0 %804  ;;  %s3422_s22 = smov [#allocation2]  }
 0x227   :  { %v580_v0 = vmul.f32 %v4894_v43, %v574_v31  ;;  %v700_v21 = vsel %vm698_vm7, %v697_v40, %v699_v26  ;;  %v754_v20 = vadd.f32 %v753_v13, %v3672_v28  ;;  %v562_v24 = vadd.f32 %v561_v46, %v543_v38  ;;  %s2854_s1 = sshll.u32 %s3422_s22, 4  ;;  %s2855_s1 = int_to_ptr.vmem [resolvable:$true] %s2854_s1 }
 0x228   :  { %v4895_v27 = vstv %s3712_s21  ;;  %v4896_v5 = vstv %s3714_s20  ;;  %vm717_vm8 = vcmp.gt.f32.partialorder %v716_v54, 0.0  ;;  %v718_v61 = vmul.f32 0.2, %v716_v54  ;;  %s5063_s21 = sld [smem:[#allocation36_spill]]  ;;  %s3318_s5 = scalar_lea.vmem %s2855_s1, 128 }
 0x229   :  { %v687_v29 = vmul.f32 %v4895_v27, %v682_v15  ;;  %v706_v12 = vmul.f32 %v4896_v5, %v700_v21  ;;  %vm736_vm9 = vcmp.gt.f32.partialorder %v735_v51, 0.0  ;;  %v737_v23 = vmul.f32 0.2, %v735_v51  ;;  %p3319_p0 = scmp.ne.s32.totalorder %s2855_s1, %s3318_s5  ;;  %p3323_p1 = scmp.lt.s32.totalorder %s2855_s1, %s2855_s1 }
 0x22a   :  { %vm755_vm12 = vcmp.gt.f32.partialorder %v754_v20, 0.0  ;;  %v581_v53 = vadd.f32 %v580_v0, %v562_v24  ;;  %v756_v35 = vmul.f32 0.2, %v754_v20  ;;  %v772_v16 = vrot.slane %v3810_v44, %v3773_v1  ;;  %p3324_p2 = scmp.lt.s32.totalorder %s3318_s5, %s3318_s5 }
 0x22b   :  { %v707_v7 = vadd.f32 %v706_v12, %v687_v29  ;;  %v719_v28 = vsel %vm717_vm8, %v716_v54, %v718_v61  ;;  %v738_v17 = vsel %vm736_vm9, %v735_v51, %v737_v23  ;;  %v791_v59 = vrot.slane %v3810_v44, %v3775_v48 }
 0x22c   :  { %v810_v58 = vrot.slane %v3810_v44, %v3777_v47  ;;  %v3923_v2 = vsel %vm343_vm10, %v581_v53, -1e+30  ;;  %v4897_v49 = vstv %s3720_s19  ;;  %v4898_v52 = vstv %s3722_s18  ;;  %s3387_s18 = smov 8   ;;  %s3388_s19 = smov 16  }
 0x22d   :  { %v725_v57 = vmul.f32 %v4897_v49, %v719_v28  ;;  %v744_v46 = vmul.f32 %v4898_v52, %v738_v17  ;;  %v757_v39 = vsel %vm755_vm12, %v754_v20, %v756_v35  ;;  %v583_v40 = vsel %vm345_vm11, %v3923_v2, -inf  ;;  %p3325_p3 = por %p3324_p2, %p3323_p1 }
 0x22e   :  { %v4899_v55 = vstv %s3724_s17  ;;  %v773_v10 = vadd.f32 %v772_v16, %v3692_v30  ;;  %v792_v32 = vadd.f32 %v791_v59, %v3716_v34  ;;  %584 = vmax.xlane.f32.xlu0 %v583_v40  ;;  %v811_v13 = vadd.f32 %v810_v58, %v805_v60  ;;  %s3386_s17 = smov 104  }
 0x22f   :  { %v763_v63 = vmul.f32 %v4899_v55, %v757_v39  ;;  %v726_v44 = vadd.f32 %v725_v57, %v707_v7  ;;  %v919_v19 = vadd.f32 %v918_v41, %v3759_v36  ;;  %v937_v26 = vadd.f32 %v936_v14, %v3656_v22  ;;  %p3326_p4 = pnand %p3325_p3, %p3319_p0 }
 0x230   :  { %vm774_vm13 = vcmp.gt.f32.partialorder %v773_v10, 0.0  ;;  %v775_v30 = vmul.f32 0.2, %v773_v10  ;;  %vm793_vm14 = vcmp.gt.f32.partialorder %v792_v32, 0.0  ;;  %v794_v34 = vmul.f32 0.2, %v792_v32 }
 0x231   :  { %v745_v38 = vadd.f32 %v744_v46, %v726_v44  ;;  %vm812_vm15 = vcmp.gt.f32.partialorder %v811_v13, 0.0  ;;  %v813_v31 = vmul.f32 0.2, %v811_v13  ;;  %vm920_vm2 = vcmp.gt.f32.partialorder %v919_v19, 0.0 }
 0x232   :  { %v776_v54 = vsel %vm774_vm13, %v773_v10, %v775_v30  ;;  %v795_v51 = vsel %vm793_vm14, %v792_v32, %v794_v34  ;;  %v921_v43 = vmul.f32 0.2, %v919_v19  ;;  %vm938_vm3 = vcmp.gt.f32.partialorder %v937_v26, 0.0 }
 0x233   :  { %v764_v36 = vadd.f32 %v763_v63, %v745_v38  ;;  %v4900_v41 = vstv %s3726_s15  ;;  %v4901_v15 = vstv %s3736_s13  ;;  %v814_v14 = vsel %vm812_vm15, %v811_v13, %v813_v31  ;;  %s3384_s15 = smov 120  }
 0x234   :  { %v782_v0 = vmul.f32 %v4900_v41, %v776_v54  ;;  %v801_v22 = vmul.f32 %v4901_v15, %v795_v51  ;;  %v4902_v21 = vstv %s3741_s12  ;;  %v922_v24 = vsel %vm920_vm2, %v919_v19, %v921_v43 }
 0x235   :  { %v820_v20 = vmul.f32 %v4902_v21, %v814_v14  ;;  %v939_v27 = vmul.f32 0.2, %v937_v26  ;;  %v955_v29 = vrot.slane %v3831_v45, %v3767_v62  ;;  %v4903_v12 = vstv %s3751_s11  ;;  %s3043_s11 = spop %3042 }
 0x236   :  { %v783_v5 = vadd.f32 %v782_v0, %v764_v36  ;;  %v927_v61 = vmul.f32 %v4903_v12, %v922_v24  ;;  %v974_v23 = vrot.slane %v3831_v45, %v3769_v50  ;;  %v993_v53 = vrot.slane %v3831_v45, %v3771_v56  ;;  %s3045_s12 = spop %3044 }
 0x237   :  { %v940_v7 = vsel %vm938_vm3, %v937_v26, %v939_v27  ;;  %v956_v35 = vadd.f32 %v955_v29, %v3662_v25  ;;  %v1012_v16 = vrot.slane %v3831_v45, %v3773_v1  ;;  %v1031_v28 = vrot.slane %v3831_v45, %v3775_v48  ;;  %s3047_s13 = spop %3046 }
 0x238   :  { %v802_v17 = vadd.f32 %v801_v22, %v783_v5  ;;  %v4904_v59 = vstv %s3761_s16  ;;  %v975_v49 = vadd.f32 %v974_v23, %v3863_v18  ;;  %v994_v57 = vadd.f32 %v993_v53, %v3879_v33  ;;  %s3385_s16 = smov 112  }
 0x239   :  { %v946_v58 = vmul.f32 %v4904_v59, %v940_v7  ;;  %vm957_vm4 = vcmp.gt.f32.partialorder %v956_v35, 0.0  ;;  %v958_v52 = vmul.f32 0.2, %v956_v35  ;;  %v1013_v46 = vadd.f32 %v1012_v16, %v3906_v9 }
 0x23a   :  { %v1032_v25 = vadd.f32 %v1031_v28, %v3728_v37  ;;  %v821_v39 = vadd.f32 %v820_v20, %v802_v17  ;;  %vm976_vm5 = vcmp.gt.f32.partialorder %v975_v49, 0.0  ;;  %v977_v40 = vmul.f32 0.2, %v975_v49 }
 0x23b   :  { %v947_v60 = vadd.f32 %v946_v58, %v927_v61  ;;  %v959_v55 = vsel %vm957_vm4, %v956_v35, %v958_v52  ;;  %vm995_vm6 = vcmp.gt.f32.partialorder %v994_v57, 0.0  ;;  %v996_v63 = vmul.f32 0.2, %v994_v57 }
 0x23c   :  { %vm1014_vm7 = vcmp.gt.f32.partialorder %v1013_v46, 0.0  ;;  %v822_v18 = vsel %vm343_vm10, %v821_v39, -1e+30  ;;  %v4905_v33 = vstv %s3783_s14  ;;  %v978_v32 = vsel %vm976_vm5, %v975_v49, %v977_v40  ;;  %s3049_s14 = spop %3048 }
 0x23d   :  { %v965_v10 = vmul.f32 %v4905_v33, %v959_v55  ;;  %v1015_v44 = vmul.f32 0.2, %v1013_v46  ;;  %v982_v9 = vstv %s3041_s9  ;;  %v823_v37 = vsel %vm345_vm11, %v822_v18, -inf  ;;  %s5059_s9 = sld [smem:[#allocation32_spill]] }
 0x23e   :  { %v997_v13 = vsel %vm995_vm6, %v994_v57, %v996_v63  ;;  %824 = vmax.xlane.f32.xlu0 %v823_v37  ;;  %v984_v26 = vmul.f32 %v982_v9, %v978_v32  ;;  %vm1033_vm8 = vcmp.gt.f32.partialorder %v1032_v25, 0.0  ;;  %v1034_v30 = vmul.f32 0.2, %v1032_v25 }
 0x23f   :  { %v966_v19 = vadd.f32 %v965_v10, %v947_v60  ;;  %v1001_v34 = vstv %s3043_s11  ;;  %v1016_v38 = vsel %vm1014_vm7, %v1013_v46, %v1015_v44  ;;  %v1050_v31 = vrot.slane %v3831_v45, %v3777_v47 }
 0x240   :  { %v1003_v51 = vmul.f32 %v1001_v34, %v997_v13  ;;  %v1020_v43 = vstv %s3045_s12  ;;  %v1035_v36 = vsel %vm1033_vm8, %v1032_v25, %v1034_v30  ;;  %v1039_v22 = vstv %s3047_s13  ;;  %s4914_s12 = sld [smem:[#allocation25_spill]] }
 0x241   :  { %v985_v54 = vadd.f32 %v984_v26, %v966_v19  ;;  %v1051_v41 = vadd.f32 %v1050_v31, %v3757_v8  ;;  %v1022_v15 = vmul.f32 %v1020_v43, %v1016_v38  ;;  %v1041_v20 = vmul.f32 %v1039_v22, %v1035_v36  ;;  %s5060_s13 = sld [smem:[#allocation33_spill]] }
 0x242   :  { %v1058_v24 = vstv %s3049_s14  ;;  %v4906_v39 = vmov 0.0|0.0   ;;  %v4907_v26 = vmov 0.0   ;;  %vm1165_vm12 = vcmask 195584  }
 0x243   :  { %v1004_v0 = vadd.f32 %v1003_v51, %v985_v54  ;;  %vm1052_vm9 = vcmp.gt.f32.partialorder %v1051_v41, 0.0  ;;  %v1053_v14 = vmul.f32 0.2, %v1051_v41  ;;  %vm1206_vm14 = vcmask 261120  }
 0x245   :  { %v1023_v21 = vadd.f32 %v1022_v15, %v1004_v0  ;;  %v1054_v27 = vsel %vm1052_vm9, %v1051_v41, %v1053_v14 }
 0x246   :  { %v1060_v5 = vmul.f32 %v1058_v24, %v1054_v27  ;;  %v1194_v24 = vld [vmem:[%s4738_s8 + $0x8] sm:$0xff]  ;;  %v1195_v27 = vld [vmem:[%s4738_s8 + $0x10] sm:$0xff] }
 0x247   :  { %v1042_v29 = vadd.f32 %v1041_v20, %v1023_v21  ;;  %v1193_v20 = vld [vmem:[%s4738_s8] sm:$0xff] }
 0x249   :  { %v1061_v45 = vadd.f32 %v1060_v5, %v1042_v29  ;;  %v2975_v29 = vpack.c.bf16 %v1194_v24, %v1193_v20  ;;  %v1196_v5 = vld [vmem:[%s4738_s8 + $0x18] sm:$0xff]  ;;  %v2871_v24 = vld [vmem:[%s4914_s12] ss:$0 sm:$0xff]  ;;  %s5000_s8 = sld [smem:[#allocation27_spill]] }
 0x24b   :  { %v1062_v12 = vsel %vm343_vm10, %v1061_v45, -1e+30  ;;  %v2978_v45 = vpack.c.bf16 %v1196_v5, %v1195_v27 }
 0x24c   :  { %v1063_v61 = vsel %vm345_vm11, %v1062_v12, -inf }
 0x24d   :  { %1064 = vmax.xlane.f32.xlu1 %v1063_v61  ;;  %v4853_v61 = vmov 0  }
 0x24e   :  { %3163 = vset.pattern.permute.xlu1 %v4853_v61 }
 0x254   :  { %595 = vrot.lane.b32.xlu0 %v3573_v42, %s3384_s15 }
 0x258   :  { %835 = vrot.lane.b32.xlu0 %v3573_v42, %s3385_s16  ;;  %s5061_s16 = sld [smem:[#allocation34_spill]] }
 0x2ad   :  { %v348_v8 = vpop.xlane.xlu0 %347 }
 0x2ae   :  { %v349_v23 = vsub.f32 %v3875_v4, %v348_v8 }
 0x2b0   :  { %v350_v53 = vmul.f32 1.442695, %v349_v23 }
 0x2b2   :  { %3291 = vpow2.f32 %v350_v53  ;;  %v4848_v53 = vmov 3  }
 0x2b3   :  { %3166 = vset.pattern.permute.xlu0 %v4848_v53 }
 0x2bb   :  { %v585_v7 = vpop.xlane.xlu0 %584 }
 0x2bc   :  { %v586_v35 = vsub.f32 %v3923_v2, %v585_v7  ;;  %v3292_v16 = vpop.eup %3291  ;;  %v4852_v7 = vmov 1  }
 0x2bd   :  { %v352_v17 = vmul.f32 %v3292_v16, %v3825_v11  ;;  %v4844_v16 = vmov 6  }
 0x2be   :  { %v587_v28 = vmul.f32 1.442695, %v586_v35  ;;  %v4850_v35 = vmov 2  }
 0x2bf   :  { %v353_v59 = vsel %vm345_vm11, %v352_v17, 0.0 }
 0x2c0   :  { %3293 = vpow2.f32 %v587_v28  ;;  %354 = vadd.xlane.f32.xlu0 %v353_v59  ;;  %v3395_v28 = vmov 4   ;;  %v4846_v59 = vmov 5  }
 0x2ca   :  { %v3294_v49 = vpop.eup %3293 }
 0x2cb   :  { %v825_v58 = vpop.xlane.xlu0 %824  ;;  %v589_v52 = vmul.f32 %v3294_v49, %v3825_v11  ;;  %v4851_v49 = vmov 7  }
 0x2cc   :  { %v826_v57 = vsub.f32 %v822_v18, %v825_v58  ;;  %v4835_v58 = vmov 12  }
 0x2cd   :  { %v590_v25 = vsel %vm345_vm11, %v589_v52, 0.0 }
 0x2ce   :  { %v827_v46 = vmul.f32 1.442695, %v826_v57  ;;  %591 = vadd.xlane.f32.xlu0 %v590_v25  ;;  %v4847_v57 = vmov 13   ;;  %v4843_v25 = vmov 16  }
 0x2cf   :  { %v596_v4 = vpop.permute.xlu0 %595 }
 0x2d0   :  { %3295 = vpow2.f32 %v827_v46  ;;  %v4845_v46 = vmov 14  }
 0x2d3   :  { %v836_v2 = vpop.permute.xlu0 %835 }
 0x2d4   :  { %2930 = vmatpush3.msra.mxu0 %v836_v2  ;;  %v4837_v2 = vmov 11  }
 0x2d5   :  { %2974 = vmatprep.subr.bf16.mxu0 %v4906_v39 }
 0x2da   :  { %v1065_v60 = vpop.xlane.xlu1 %1064  ;;  %v3296_v40 = vpop.eup %3295 }
 0x2db   :  { %v1066_v55 = vsub.f32 %v1062_v12, %v1065_v60  ;;  %v829_v63 = vmul.f32 %v3296_v40, %v3825_v11  ;;  %v4026_v12 = vld [vmem:[%s4740_s10] ss:$0 sm:$0xff]  ;;  %v4840_v60 = vmov 17   ;;  %v4833_v40 = vmov 15  }
 0x2dd   :  { %v1067_v33 = vmul.f32 1.442695, %v1066_v55  ;;  %v830_v18 = vsel %vm345_vm11, %v829_v63, 0.0  ;;  %v4831_v55 = vmov 19  }
 0x2de   :  { %831 = vadd.xlane.f32.xlu0 %v830_v18  ;;  %v4830_v18 = vmov 20  }
 0x2df   :  { %3297 = vpow2.f32 %v1067_v33  ;;  %v4829_v33 = vmov 22  }
 0x2e9   :  { %v3298_v10 = vpop.eup %3297 }
 0x2ea   :  { %v1069_v32 = vmul.f32 %v3298_v10, %v3825_v11  ;;  %v4827_v10 = vmov 25  }
 0x2ec   :  { %v1070_v44 = vsel %vm345_vm11, %v1069_v32, 0.0 }
 0x2ed   :  { %1071 = vadd.xlane.f32.xlu0 %v1070_v44  ;;  %v4825_v44 = vmov 28  }
 0x303   :  { %1075 = vrot.lane.b32.xlu0 %v3573_v42, %s3386_s17  ;;  %s4967_s17 = sld [smem:[#allocation29_spill]] }
 0x34d   :  { %v355_v9 = vpop.xlane.xlu0 %354 }
 0x34e   :  { %3299 = vrcp.f32 %v355_v9  ;;  %v4828_v9 = vmov 23  }
 0x358   :  { %v3300_v37 = vpop.eup %3299 }
 0x359   :  { %v357_v19 = vmul.f32 %v3300_v37, %v352_v17  ;;  %v4839_v17 = vmov 9   ;;  %v4908_v37 = vmov 32  }
 0x35b   :  { %v592_v13 = vpop.xlane.xlu0 %591  ;;  %2922 = vmatmul.mubr.msk.f32.vlgmr.msra.gmra.mrb[0].mxu1 %vm345_vm11, %v357_v19  ;;  %v4826_v19 = vmov 26  }
 0x35c   :  { %3301 = vrcp.f32 %v592_v13  ;;  %2925 = vmatpush3.msra.mxu1 %v596_v4  ;;  %2926 = vmatprep.mubr.msk.f32.mxu1 %vm3343_vm0, %v4907_v26  ;;  %v4849_v4 = vmov 10   ;;  %v4834_v13 = vmov 24  }
 0x35d   :  { %2934 = vmatprep.subr.mxu1 %v4907_v26 }
 0x366   :  { %v3302_v30 = vpop.eup %3301 }
 0x367   :  { %v594_v34 = vmul.f32 %v3302_v30, %v589_v52  ;;  %v4842_v52 = vmov 8   ;;  %v4832_v30 = vmov 27  }
 0x369   :  { %2927 = vmatmul.mubr.msk.f32.vlgmr.msra.gmra.mrb[2].mxu1 %vm345_vm11, %v594_v34  ;;  %v4909_v34 = vmov 34  }
 0x36a   :  { %2936 = vmatprep.mubr.msk.f32.mxu1 %vm3343_vm0, %v4907_v26 }
 0x36b   :  { %v832_v38 = vpop.xlane.xlu0 %831 }
 0x36c   :  { %3303 = vrcp.f32 %v832_v38 }
 0x376   :  { %v3304_v42 = vpop.eup %3303 }
 0x377   :  { %v834_v31 = vmul.f32 %v3304_v42, %v829_v63  ;;  %v4838_v63 = vmov 18  }
 0x379   :  { %2932 = vmatmul.mubr.msk.f32.vlgmr.msra.gmra.mrb[2].mxu0 %vm345_vm11, %v834_v31 }
 0x37a   :  { %v1072_v54 = vpop.xlane.xlu0 %1071  ;;  %2947 = vmatprep.mubr.msk.f32.mxu0 %vm3343_vm0, %v4907_v26  ;;  %2976 = vmatpush3.bf16.msra.mxu0 %v2975_v29 }
 0x37b   :  { %3305 = vrcp.f32 %v1072_v54  ;;  %2977 = vmatprep.subr.bf16.mxu0 %v4906_v39  ;;  %v2868_v54 = vld [vmem:[%s4910_s3] ss:$0 sm:$0xff] }
 0x37e   :  { %v1076_v51 = vpop.permute.xlu0 %1075  ;;  %2979 = vmatpush3.bf16.msra.mxu0 %v2978_v45  ;;  %v4915_v45 = vmov 37  }
 0x37f   :  { %2935 = vmatpush3.msra.mxu1 %v1076_v51  ;;  %2966 = vmatprep.subr.mxu0 %v4907_v26 }
 0x380   :  { %2950 = vmatprep.subr.mxu1 %v4907_v26 }
 0x385   :  { %v3306_v43 = vpop.eup %3305 }
 0x386   :  { %v1074_v36 = vmul.f32 %v3306_v43, %v1069_v32  ;;  %v4836_v32 = vmov 21  }
 0x388   :  { %2937 = vmatmul.mubr.msk.f32.vlgmr.msra.gmra.mrb[4].mxu1 %vm345_vm11, %v1074_v36  ;;  %v2869_v36 = vld [vmem:[%s4911_s30] ss:$0 sm:$0xff] }
 0x389   :  { %2952 = vmatprep.mubr.msk.f32.mxu1 %vm3343_vm0, %v4907_v26 }
 0x42e   :  { %v4008_v41 = vpop.f32.mrb[0].mxu1 }
 0x42f   :  { %v2923_v0 = vpop.f32.mrb[1].mxu1 }
 0x43c   :  { %v667_v15 = vpop.f32.mrb[2].mxu1 }
 0x43d   :  { %1152 = vrot.lane.b32.xlu0 %v667_v15, %s3387_s18  ;;  %v2928_v22 = vpop.f32.mrb[3].mxu1  ;;  %s5062_s18 = sld [smem:[#allocation35_spill]] }
 0x43e   :  { %v2870_v22 = vld [vmem:[%s4912_s23] ss:$0 sm:$0xff] }
 0x44c   :  { %v907_v14 = vpop.f32.mrb[2].mxu0 }
 0x44d   :  { %1156 = vrot.lane.b32.xlu1 %v907_v14, %s3388_s19  ;;  %v2933_v21 = vpop.f32.mrb[3].mxu0 }
 0x451   :  { %1331 = vperm.xlu1 %3163, %v4026_v12  }
 0x455   :  { %3164 = vset.pattern.permute.xlu1 %v4852_v7  ;;  %v4944_v7 = vmov 59  }
 0x456   :  { %1349 = vperm.xlu1 %3164, %v4026_v12  }
 0x45a   :  { %3165 = vset.pattern.permute.xlu1 %v4850_v35  ;;  %v4942_v35 = vmov 57  }
 0x45b   :  { %v1147_v8 = vpop.f32.mrb[4].mxu1  ;;  %1367 = vperm.xlu1 %3165, %v4026_v12  }
 0x45c   :  { %1160 = vrot.lane.b32.xlu0 %v1147_v8, %s3390_s27  ;;  %v2938_v23 = vpop.f32.mrb[5].mxu1  ;;  %v4916_v8 = vmov 33  }
 0x45d   :  { %v4917_v23 = vmov 38  }
 0x45f   :  { %3167 = vset.pattern.permute.xlu1 %v3395_v28 }
 0x460   :  { %1385 = vperm.xlu0 %3166, %v4026_v12   ;;  %1403 = vperm.xlu1 %3167, %v4026_v12  }
 0x464   :  { %3169 = vset.pattern.permute.xlu0 %v4844_v16  ;;  %3168 = vset.pattern.permute.xlu1 %v4846_v59 }
 0x465   :  { %1439 = vperm.xlu0 %3169, %v4026_v12   ;;  %1421 = vperm.xlu1 %3168, %v4026_v12  }
 0x469   :  { %3172 = vset.pattern.permute.xlu0 %v4839_v17  ;;  %3170 = vset.pattern.permute.xlu1 %v4851_v49  ;;  %v4937_v17 = vmov 53  }
 0x46a   :  { %1493 = vperm.xlu0 %3172, %v4026_v12   ;;  %1457 = vperm.xlu1 %3170, %v4026_v12  }
 0x46e   :  { %3175 = vset.pattern.permute.xlu0 %v4835_v58  ;;  %3171 = vset.pattern.permute.xlu1 %v4842_v52 }
 0x46f   :  { %1547 = vperm.xlu0 %3175, %v4026_v12   ;;  %1475 = vperm.xlu1 %3171, %v4026_v12  }
 0x473   :  { %3176 = vset.pattern.permute.xlu0 %v4847_v57  ;;  %3173 = vset.pattern.permute.xlu1 %v4849_v4  ;;  %v4940_v57 = vmov 56  }
 0x474   :  { %1565 = vperm.xlu0 %3176, %v4026_v12   ;;  %1511 = vperm.xlu1 %3173, %v4026_v12  }
 0x478   :  { %3177 = vset.pattern.permute.xlu0 %v4845_v46  ;;  %3174 = vset.pattern.permute.xlu1 %v4837_v2  ;;  %v4939_v46 = vmov 54  }
 0x479   :  { %1583 = vperm.xlu0 %3177, %v4026_v12   ;;  %1529 = vperm.xlu1 %3174, %v4026_v12  }
 0x47d   :  { %3179 = vset.pattern.permute.xlu0 %v4843_v25  ;;  %3178 = vset.pattern.permute.xlu1 %v4833_v40 }
 0x47e   :  { %1619 = vperm.xlu0 %3179, %v4026_v12   ;;  %1601 = vperm.xlu1 %3178, %v4026_v12  }
 0x482   :  { %3180 = vset.pattern.permute.xlu0 %v4840_v60  ;;  %3181 = vset.pattern.permute.xlu1 %v4838_v63 }
 0x483   :  { %1637 = vperm.xlu0 %3180, %v4026_v12   ;;  %1655 = vperm.xlu1 %3181, %v4026_v12  }
 0x487   :  { %3182 = vset.pattern.permute.xlu0 %v4831_v55  ;;  %3183 = vset.pattern.permute.xlu1 %v4830_v18  ;;  %v4936_v55 = vmov 61  }
 0x488   :  { %1673 = vperm.xlu0 %3182, %v4026_v12   ;;  %1691 = vperm.xlu1 %3183, %v4026_v12  }
 0x48c   :  { %3185 = vset.pattern.permute.xlu0 %v4829_v33  ;;  %3184 = vset.pattern.permute.xlu1 %v4836_v32  ;;  %v4935_v33 = vmov 58  }
 0x48d   :  { %1727 = vperm.xlu0 %3185, %v4026_v12   ;;  %1709 = vperm.xlu1 %3184, %v4026_v12  }
 0x491   :  { %3188 = vset.pattern.permute.xlu0 %v4827_v10  ;;  %3186 = vset.pattern.permute.xlu1 %v4828_v9  ;;  %v4934_v10 = vmov 55  }
 0x492   :  { %1781 = vperm.xlu0 %3188, %v4026_v12   ;;  %1745 = vperm.xlu1 %3186, %v4026_v12  }
 0x496   :  { %3191 = vset.pattern.permute.xlu0 %v4825_v44  ;;  %3187 = vset.pattern.permute.xlu1 %v4834_v13  ;;  %v4933_v44 = vmov 52  }
 0x497   :  { %1835 = vperm.xlu0 %3191, %v4026_v12   ;;  %1763 = vperm.xlu1 %3187, %v4026_v12  }
 0x49b   :  { %3192 = vset.pattern.permute.xlu0 %v4908_v37  ;;  %3189 = vset.pattern.permute.xlu1 %v4826_v19 }
 0x49c   :  { %1799 = vperm.xlu1 %3189, %v4026_v12  }
 0x4a0   :  { %3190 = vset.pattern.permute.xlu1 %v4832_v30  ;;  %v4841_v30 = vmov 30  }
 0x4a1   :  { %1817 = vperm.xlu1 %3190, %v4026_v12  }
 0x4a5   :  { %3194 = vset.pattern.permute.xlu1 %v4909_v34 }
 0x4af   :  { %v1153_v38 = vpop.permute.xlu0 %1152 }
 0x4b0   :  { %v1163_v31 = vsel %vm345_vm11, %v4008_v41, %v1153_v38  ;;  %v4918_v38 = vmov 35  }
 0x4bf   :  { %v1157_v42 = vpop.permute.xlu1 %1156 }
 0x4c0   :  { %v1164_v51 = vsel %vm85_vm1, %v1163_v31, %v1157_v42  ;;  %v4919_v42 = vmov 40   ;;  %v4920_v31 = vmov 36  }
 0x4ce   :  { %v1161_v43 = vpop.permute.xlu0 %1160 }
 0x4cf   :  { %v1166_v0 = vsel %vm1165_vm12, %v1164_v51, %v1161_v43  ;;  %v4922_v51 = vmov 39   ;;  %v4923_v43 = vmov 43  }
 0x4d0   :  { %v1173_v15 = vadd.f32 %v2868_v54, %v1166_v0  ;;  %v4921_v54 = vmov 41   ;;  %v4925_v0 = vmov 44  }
 0x4d2   :  { %v1182_v14 = vmul.f32 %v2869_v36, %v1173_v15  ;;  %v4924_v36 = vmov 42   ;;  %v4926_v15 = vmov 45  }
 0x4d4   :  { %v1189_v21 = vadd.f32 %v2870_v22, %v1182_v14  ;;  %v4927_v22 = vmov 46   ;;  %v4928_v14 = vmov 47  }
 0x4d6   :  { %vm1190_vm13 = vcmp.gt.f32.partialorder %v1189_v21, 0.0  ;;  %v1191_v41 = vmul.f32 0.2, %v1189_v21 }
 0x4d8   :  { %v4101_v20 = vsel %vm1190_vm13, %v1189_v21, %v1191_v41  ;;  %v4929_v21 = vmov 48   ;;  %v4930_v41 = vmov 49  }
 0x4d9   :  { %4913 = vst [vmem:[#allocation6_spill] sm:$0xff] %v4101_v20  ;;  %2948 = vmatmul.mubr.msk.f32.vlgmr.msra.gmra.mrb[4].mxu0 %vm1206_vm14, %v4101_v20 }
 0x4da   :  { %2968 = vmatprep.mubr.msk.f32.mxu0 %vm3343_vm0, %v4907_v26 }
 0x4df   :  { %v4180_v2 = vpop.permute.xlu0 %1385 }
 0x4e4   :  { %v4185_v60 = vpop.permute.xlu0 %1439 }
 0x4e9   :  { %v4189_v52 = vpop.permute.xlu0 %1493 }
 0x5ac   :  { %v1276_v27 = vpop.f32.mrb[4].mxu0 }
 0x5ad   :  { %v4110_v29 = vadd.f32 %v2871_v24, %v1276_v27  ;;  %v2949_v5 = vpop.f32.mrb[5].mxu0  ;;  %v4931_v24 = vmov 50   ;;  %v4932_v27 = vmov 51  }
 0x5ae   :  { %v4152_v5 = vpop.permute.xlu1 %1331 }
 0x5af   :  { %1355 = vperm.xlu1 %3194, %v4110_v29   ;;  %1314 = vperm.xlu0 %3192, %v4110_v29  }
 0x5b0   :  { %2951 = vmatpush3.msra.mxu1 %v4110_v29 }
 0x5b1   :  { %2980 = vmatprep.subr.bf16.mxu1 %v4906_v39 }
 0x5b2   :  { %v4156_v19 = vpop.permute.xlu1 %1349 }
 0x5b3   :  { %3197 = vset.pattern.permute.xlu1 %v4915_v45  ;;  %3193 = vset.pattern.permute.xlu0 %v4916_v8 }
 0x5b4   :  { %1409 = vperm.xlu1 %3197, %v4110_v29   ;;  %1337 = vperm.xlu0 %3193, %v4110_v29  }
 0x5b6   :  { %v4160_v9 = vpop.permute.xlu1 %1367 }
 0x5b8   :  { %3198 = vset.pattern.permute.xlu1 %v4917_v23  ;;  %3195 = vset.pattern.permute.xlu0 %v4918_v38 }
 0x5b9   :  { %1427 = vperm.xlu1 %3198, %v4110_v29   ;;  %1373 = vperm.xlu0 %3195, %v4110_v29  }
 0x5ba   :  { %v4164_v18 = vpop.permute.xlu1 %1403 }
 0x5bd   :  { %3200 = vset.pattern.permute.xlu1 %v4919_v42  ;;  %3196 = vset.pattern.permute.xlu0 %v4920_v31 }
 0x5be   :  { %1463 = vperm.xlu1 %3200, %v4110_v29   ;;  %1391 = vperm.xlu0 %3196, %v4110_v29   ;;  %v4170_v40 = vpop.permute.xlu1 %1421 }
 0x5c2   :  { %3201 = vset.pattern.permute.xlu1 %v4921_v54  ;;  %3199 = vset.pattern.permute.xlu0 %v4922_v51  ;;  %v4174_v13 = vpop.permute.xlu1 %1457 }
 0x5c3   :  { %1481 = vperm.xlu1 %3201, %v4110_v29   ;;  %1445 = vperm.xlu0 %3199, %v4110_v29  }
 0x5c6   :  { %v4176_v58 = vpop.permute.xlu1 %1475 }
 0x5c7   :  { %3203 = vset.pattern.permute.xlu1 %v4923_v43  ;;  %3202 = vset.pattern.permute.xlu0 %v4924_v36 }
 0x5c8   :  { %1517 = vperm.xlu1 %3203, %v4110_v29   ;;  %1499 = vperm.xlu0 %3202, %v4110_v29  }
 0x5ca   :  { %v4178_v32 = vpop.permute.xlu1 %1511 }
 0x5cc   :  { %3204 = vset.pattern.permute.xlu1 %v4925_v0  ;;  %3205 = vset.pattern.permute.xlu0 %v4926_v15  ;;  %v4953_v0 = vmov 0  }
 0x5cd   :  { %1535 = vperm.xlu1 %3204, %v4110_v29   ;;  %1553 = vperm.xlu0 %3205, %v4110_v29  }
 0x5ce   :  { %v4182_v63 = vpop.permute.xlu1 %1529 }
 0x5d1   :  { %3206 = vset.pattern.permute.xlu1 %v4927_v22  ;;  %3207 = vset.pattern.permute.xlu0 %v4928_v14 }
 0x5d2   :  { %1571 = vperm.xlu1 %3206, %v4110_v29   ;;  %1589 = vperm.xlu0 %3207, %v4110_v29  }
 0x5d6   :  { %3208 = vset.pattern.permute.xlu0 %v4929_v21 }
 0x5d7   :  { %1607 = vperm.xlu0 %3208, %v4110_v29  }
 0x5db   :  { %3209 = vset.pattern.permute.xlu0 %v4930_v41 }
 0x5dc   :  { %1625 = vperm.xlu0 %3209, %v4110_v29  }
 0x5e0   :  { %3210 = vset.pattern.permute.xlu0 %v4931_v24 }
 0x5e1   :  { %1643 = vperm.xlu0 %3210, %v4110_v29  }
 0x5e5   :  { %3211 = vset.pattern.permute.xlu0 %v4932_v27 }
 0x5e6   :  { %1661 = vperm.xlu0 %3211, %v4110_v29  }
 0x5ea   :  { %3212 = vset.pattern.permute.xlu0 %v4933_v44 }
 0x5eb   :  { %1679 = vperm.xlu0 %3212, %v4110_v29  }
 0x5ef   :  { %3215 = vset.pattern.permute.xlu0 %v4934_v10 }
 0x5f0   :  { %1733 = vperm.xlu0 %3215, %v4110_v29  }
 0x5f4   :  { %3218 = vset.pattern.permute.xlu0 %v4935_v33  ;;  %v4946_v33 = vmov 60  }
 0x5f5   :  { %1787 = vperm.xlu0 %3218, %v4110_v29  }
 0x5f9   :  { %3221 = vset.pattern.permute.xlu0 %v4936_v55 }
 0x5fa   :  { %1841 = vperm.xlu0 %3221, %v4110_v29  }
 0x5fb   :  { %1280 = vxpose.xlu1.b32.start.end [1/1] (short) (narrow) %v4110_v29, 32 }
 0x5fe   :  { %3225 = vset.pattern.permute.xlu0 %v4841_v30  ;;  %v4187_v30 = vpop.permute.xlu1 %1601 }
 0x5ff   :  { %1871 = vperm.xlu0 %3225, %v4026_v12  }
 0x602   :  { %v4191_v25 = vpop.permute.xlu1 %1655 }
 0x603   :  { %3231 = vset.pattern.permute.xlu0 %v3395_v28  ;;  %v4194_v28 = vpop.permute.xlu0 %1547 }
 0x606   :  { %v4196_v16 = vpop.permute.xlu1 %1691 }
 0x607   :  { %4938 = vst [vmem:[#allocation7_spill] sm:$0xff] %v4196_v16  ;;  %v4200_v59 = vpop.permute.xlu0 %1565 }
 0x60a   :  { %v4203_v53 = vpop.permute.xlu1 %1709 }
 0x60b   :  { %4941 = vst [vmem:[#allocation8_spill] sm:$0xff] %v4203_v53  ;;  %v4206_v4 = vpop.permute.xlu0 %1583 }
 0x60e   :  { %v4210_v49 = vpop.permute.xlu1 %1745 }
 0x60f   :  { %4943 = vst [vmem:[#allocation9_spill] sm:$0xff] %v4210_v49  ;;  %v4213_v61 = vpop.permute.xlu0 %1619 }
 0x612   :  { %v4216_v55 = vpop.permute.xlu1 %1763 }
 0x613   :  { %4945 = vst [vmem:[#allocation10_spill] sm:$0xff] %v4216_v55 }
 0x616   :  { %v4222_v10 = vpop.permute.xlu1 %1799 }
 0x617   :  { %4947 = vst [vmem:[#allocation11_spill] sm:$0xff] %v4222_v10 }
 0x619   :  { %3213 = vset.pattern.permute.xlu1 %v4937_v17  ;;  %v4948_v17 = vmov 62  }
 0x625   :  { %1697 = vperm.xlu1 %3213, %v4110_v29  }
 0x629   :  { %3214 = vset.pattern.permute.xlu1 %v4939_v46  ;;  %v4950_v46 = vmov 63  }
 0x62a   :  { %1715 = vperm.xlu1 %3214, %v4110_v29  }
 0x62e   :  { %3216 = vset.pattern.permute.xlu1 %v4940_v57  ;;  %v4220_v57 = vpop.permute.xlu0 %1637 }
 0x62f   :  { %1751 = vperm.xlu1 %3216, %v4110_v29  }
 0x633   :  { %3217 = vset.pattern.permute.xlu1 %v4942_v35  ;;  %v4226_v35 = vpop.permute.xlu0 %1673 }
 0x634   :  { %1769 = vperm.xlu1 %3217, %v4110_v29  }
 0x637   :  { %v4232_v44 = vpop.permute.xlu0 %1727 }
 0x638   :  { %3219 = vset.pattern.permute.xlu1 %v4944_v7  ;;  %v4228_v7 = vpop.permute.xlu1 %1817  ;;  %4951 = vst [vmem:[#allocation13_spill] sm:$0xff] %v4232_v44 }
 0x639   :  { %1805 = vperm.xlu1 %3219, %v4110_v29   ;;  %4949 = vst [vmem:[#allocation12_spill] sm:$0xff] %v4228_v7 }
 0x63b   :  { %v4236_v15 = vpop.permute.xlu0 %1781 }
 0x63c   :  { %v1356_v27 = vpop.permute.xlu1 %1355  ;;  %4952 = vst [vmem:[#allocation14_spill] sm:$0xff] %v4236_v15 }
 0x63d   :  { %3220 = vset.pattern.permute.xlu1 %v4946_v33  ;;  %v4854_v33 = vmov 29  }
 0x63e   :  { %1823 = vperm.xlu1 %3220, %v4110_v29  }
 0x640   :  { %v1410_v24 = vpop.permute.xlu1 %1409 }
 0x642   :  { %3222 = vset.pattern.permute.xlu1 %v4948_v17  ;;  %v4855_v17 = vmov 31  }
 0x643   :  { %1859 = vperm.xlu1 %3222, %v4110_v29  }
 0x647   :  { %3223 = vset.pattern.permute.xlu1 %v4950_v46  ;;  %v4241_v46 = vpop.permute.xlu0 %1835 }
 0x648   :  { %1877 = vperm.xlu1 %3223, %v4110_v29   ;;  %4954 = vst [vmem:[#allocation15_spill] sm:$0xff] %v4241_v46  ;;  %v1428_v29 = vpop.permute.xlu1 %1427 }
 0x64b   :  { %v1315_v41 = vpop.permute.xlu0 %1314 }
 0x64c   :  { %3224 = vset.pattern.permute.xlu1 %v4854_v33  ;;  %v1464_v36 = vpop.permute.xlu1 %1463 }
 0x64d   :  { %1853 = vperm.xlu1 %3224, %v4026_v12  }
 0x64f   :  { %v1338_v21 = vpop.permute.xlu0 %1337 }
 0x650   :  { %v4243_v33 = vpop.permute.xlu1 %1481 }
 0x651   :  { %3226 = vset.pattern.permute.xlu1 %v4855_v17 }
 0x652   :  { %1889 = vperm.xlu1 %3226, %v4026_v12  }
 0x653   :  { %v1374_v54 = vpop.permute.xlu0 %1373 }
 0x654   :  { %v4245_v14 = vpop.permute.xlu1 %1517 }
 0x656   :  { %3227 = vset.pattern.permute.xlu1 %v4953_v0 }
 0x657   :  { %v1392_v51 = vpop.permute.xlu0 %1391 }
 0x658   :  { %v4247_v22 = vpop.permute.xlu1 %1535 }
 0x65b   :  { %v1446_v17 = vpop.permute.xlu0 %1445 }
 0x65c   :  { %v4249_v23 = vpop.permute.xlu1 %1571 }
 0x65f   :  { %v1500_v12 = vpop.permute.xlu0 %1499 }
 0x663   :  { %v4259_v49 = vpop.permute.xlu0 %1553 }
 0x67b   :  { %v1296_v43 = vpop.trf.xlu1 }
 0x67c   :  { %v1320_v0 = vrot.slane %v1296_v43, %v3763_v6  ;;  %v1343_v31 = vrot.slane %v1296_v43, %v3765_v3  ;;  %v1361_v42 = vrot.slane %v1296_v43, %v3767_v62  ;;  %v1379_v38 = vrot.slane %v1296_v43, %v3769_v50 }
 0x67d   :  { %v1397_v45 = vrot.slane %v1296_v43, %v3771_v56  ;;  %v1415_v34 = vrot.slane %v1296_v43, %v3773_v1  ;;  %v1433_v20 = vrot.slane %v1296_v43, %v3775_v48  ;;  %v1451_v10 = vrot.slane %v1296_v43, %v3777_v47 }
 0x67e   :  { %v1321_v8 = vadd.f32 %v1320_v0, %v1315_v41  ;;  %v1344_v37 = vadd.f32 %v1343_v31, %v1338_v21  ;;  %v1362_v39 = vadd.f32 %v1361_v42, %v1356_v27  ;;  %v1380_v26 = vadd.f32 %v1379_v38, %v1374_v54 }
 0x67f   :  { %v1398_v11 = vadd.f32 %v1397_v45, %v1392_v51  ;;  %v1416_v46 = vadd.f32 %v1415_v34, %v1410_v24  ;;  %v1434_v7 = vadd.f32 %v1433_v20, %v1428_v29  ;;  %v4263_v31 = vpop.trf.xlu1  ;;  %v1452_v54 = vadd.f32 %v1451_v10, %v1446_v17 }
 0x680   :  { %vm1322_vm1 = vcmp.gt.f32.partialorder %v1321_v8, 0.0  ;;  %v1323_v15 = vmul.f32 0.2, %v1321_v8  ;;  %vm1345_vm15 = vcmp.gt.f32.partialorder %v1344_v37, 0.0  ;;  %v1346_v55 = vmul.f32 0.2, %v1344_v37 }
 0x681   :  { %vm1363_vm2 = vcmp.gt.f32.partialorder %v1362_v39, 0.0  ;;  %v1364_v44 = vmul.f32 0.2, %v1362_v39  ;;  %vm1381_vm3 = vcmp.gt.f32.partialorder %v1380_v26, 0.0  ;;  %v1382_v53 = vmul.f32 0.2, %v1380_v26 }
 0x682   :  { %v1324_v16 = vsel %vm1322_vm1, %v1321_v8, %v1323_v15  ;;  %v1347_v41 = vsel %vm1345_vm15, %v1344_v37, %v1346_v55  ;;  %vm1399_vm4 = vcmp.gt.f32.partialorder %v1398_v11, 0.0  ;;  %v1400_v42 = vmul.f32 0.2, %v1398_v11  ;;  %v1590_v37 = vpop.permute.xlu0 %1589 }
 0x683   :  { %v1334_v45 = vmul.f32 %v4152_v5, %v1324_v16  ;;  %v1352_v34 = vmul.f32 %v4156_v19, %v1347_v41  ;;  %v1365_v20 = vsel %vm1363_vm2, %v1362_v39, %v1364_v44  ;;  %v1383_v38 = vsel %vm1381_vm3, %v1380_v26, %v1382_v53 }
 0x684   :  { %vm1417_vm5 = vcmp.gt.f32.partialorder %v1416_v46, 0.0  ;;  %v1370_v43 = vmul.f32 %v4160_v9, %v1365_v20  ;;  %v1401_v21 = vsel %vm1399_vm4, %v1398_v11, %v1400_v42  ;;  %v1418_v24 = vmul.f32 0.2, %v1416_v46 }
 0x685   :  { %v1353_v51 = vadd.f32 %v1352_v34, %v1334_v45  ;;  %v1388_v8 = vmul.f32 %v4180_v2, %v1383_v38  ;;  %vm1435_vm6 = vcmp.gt.f32.partialorder %v1434_v7, 0.0  ;;  %v1436_v55 = vmul.f32 0.2, %v1434_v7 }
 0x686   :  { %v1469_v16 = vrot.slane %v4263_v31, %v3763_v6  ;;  %v1419_v39 = vsel %vm1417_vm5, %v1416_v46, %v1418_v24  ;;  %v1487_v26 = vrot.slane %v4263_v31, %v3765_v3  ;;  %v1505_v53 = vrot.slane %v4263_v31, %v3767_v62 }
 0x687   :  { %v1371_v19 = vadd.f32 %v1370_v43, %v1353_v51  ;;  %v1406_v17 = vmul.f32 %v4164_v18, %v1401_v21  ;;  %v1454_v11 = vmul.f32 0.2, %v1452_v54  ;;  %v1424_v2 = vmul.f32 %v4170_v40, %v1419_v39  ;;  %v1608_v40 = vpop.permute.xlu0 %1607  ;;  %v4284_v51 = vpop.trf.xlu1 }
 0x688   :  { %v1470_v10 = vadd.f32 %v1469_v16, %v1464_v36  ;;  %vm1453_vm7 = vcmp.gt.f32.partialorder %v1452_v54, 0.0  ;;  %v1488_v9 = vadd.f32 %v1487_v26, %v4243_v33  ;;  %v1437_v15 = vsel %vm1435_vm6, %v1434_v7, %v1436_v55 }
 0x689   :  { %v1389_v44 = vadd.f32 %v1388_v8, %v1371_v19  ;;  %v1506_v5 = vadd.f32 %v1505_v53, %v1500_v12  ;;  %v1523_v46 = vrot.slane %v4263_v31, %v3769_v50  ;;  %v1541_v18 = vrot.slane %v4263_v31, %v3771_v56 }
 0x68a   :  { %v1472_v27 = vmul.f32 0.2, %v1470_v10  ;;  %vm1471_vm8 = vcmp.gt.f32.partialorder %v1470_v10, 0.0  ;;  %v1490_v0 = vmul.f32 0.2, %v1488_v9  ;;  %v1455_v41 = vsel %vm1453_vm7, %v1452_v54, %v1454_v11 }
 0x68b   :  { %v1407_v29 = vadd.f32 %v1406_v17, %v1389_v44  ;;  %vm1489_vm9 = vcmp.gt.f32.partialorder %v1488_v9, 0.0  ;;  %v1524_v36 = vadd.f32 %v1523_v46, %v4245_v14  ;;  %v1442_v33 = vmul.f32 %v4185_v60, %v1437_v15  ;;  %v1626_v19 = vpop.permute.xlu0 %1625 }
 0x68c   :  { %v1508_v7 = vmul.f32 0.2, %v1506_v5  ;;  %v1473_v45 = vsel %vm1471_vm8, %v1470_v10, %v1472_v27  ;;  %vm1507_vm12 = vcmp.gt.f32.partialorder %v1506_v5, 0.0  ;;  %v1542_v12 = vadd.f32 %v1541_v18, %v4247_v22 }
 0x68d   :  { %v1425_v42 = vadd.f32 %v1424_v2, %v1407_v29  ;;  %v1460_v20 = vmul.f32 %v4174_v13, %v1455_v41  ;;  %v1491_v38 = vsel %vm1489_vm9, %v1488_v9, %v1490_v0  ;;  %v1526_v43 = vmul.f32 0.2, %v1524_v36 }
 0x68e   :  { %v1559_v54 = vrot.slane %v4263_v31, %v3773_v1  ;;  %v1577_v14 = vrot.slane %v4263_v31, %v3775_v48  ;;  %v1595_v60 = vrot.slane %v4263_v31, %v3777_v47  ;;  %v1478_v24 = vmul.f32 %v4176_v58, %v1473_v45 }
 0x68f   :  { %v1443_v34 = vadd.f32 %v1442_v33, %v1425_v42  ;;  %v1509_v22 = vsel %vm1507_vm12, %v1506_v5, %v1508_v7  ;;  %vm1525_vm13 = vcmp.gt.f32.partialorder %v1524_v36, 0.0  ;;  %v1544_v8 = vmul.f32 0.2, %v1542_v12  ;;  %v1644_v27 = vpop.permute.xlu0 %1643 }
 0x690   :  { %v1560_v13 = vadd.f32 %v1559_v54, %v4259_v49  ;;  %v1578_v55 = vadd.f32 %v1577_v14, %v4249_v23  ;;  %v1613_v16 = vrot.slane %v4284_v51, %v3763_v6  ;;  %v1496_v26 = vmul.f32 %v4189_v52, %v1491_v38 }
 0x691   :  { %v1461_v21 = vadd.f32 %v1460_v20, %v1443_v34  ;;  %vm1543_vm1 = vcmp.gt.f32.partialorder %v1542_v12, 0.0  ;;  %v1527_v53 = vsel %vm1525_vm13, %v1524_v36, %v1526_v43  ;;  %v1596_v17 = vadd.f32 %v1595_v60, %v1590_v37  ;;  %v4310_v20 = vpop.trf.xlu1 }
 0x692   :  { %v1562_v31 = vmul.f32 0.2, %v1560_v13  ;;  %v1514_v58 = vmul.f32 %v4178_v32, %v1509_v22  ;;  %vm1561_vm15 = vcmp.gt.f32.partialorder %v1560_v13, 0.0  ;;  %v1614_v10 = vadd.f32 %v1613_v16, %v1608_v40 }
 0x693   :  { %v1479_v39 = vadd.f32 %v1478_v24, %v1461_v21  ;;  %v1631_v49 = vrot.slane %v4284_v51, %v3765_v3  ;;  %v1545_v23 = vsel %vm1543_vm1, %v1542_v12, %v1544_v8  ;;  %v1580_v44 = vmul.f32 0.2, %v1578_v55  ;;  %v1662_v45 = vpop.permute.xlu0 %1661 }
 0x694   :  { %v1532_v2 = vmul.f32 %v4182_v63, %v1527_v53  ;;  %vm1579_vm2 = vcmp.gt.f32.partialorder %v1578_v55, 0.0  ;;  %v1563_v15 = vsel %vm1561_vm15, %v1560_v13, %v1562_v31  ;;  %v1598_v52 = vmul.f32 0.2, %v1596_v17 }
 0x695   :  { %v1497_v11 = vadd.f32 %v1496_v26, %v1479_v39  ;;  %v1550_v5 = vmul.f32 %v4194_v28, %v1545_v23  ;;  %vm1597_vm3 = vcmp.gt.f32.partialorder %v1596_v17, 0.0  ;;  %v1649_v32 = vrot.slane %v4284_v51, %v3767_v62 }
 0x696   :  { %v1581_v46 = vsel %vm1579_vm2, %v1578_v55, %v1580_v44  ;;  %v1616_v29 = vmul.f32 0.2, %v1614_v10  ;;  %v1632_v0 = vadd.f32 %v1631_v49, %v1626_v19  ;;  %v1568_v41 = vmul.f32 %v4200_v59, %v1563_v15 }
 0x697   :  { %v1515_v9 = vadd.f32 %v1514_v58, %v1497_v11  ;;  %vm1615_vm4 = vcmp.gt.f32.partialorder %v1614_v10, 0.0  ;;  %v1599_v63 = vsel %vm1597_vm3, %v1596_v17, %v1598_v52  ;;  %v1586_v36 = vmul.f32 %v4206_v4, %v1581_v46  ;;  %v1680_v22 = vpop.permute.xlu0 %1679  ;;  %v4956_v46 = vld [vmem:[#allocation8_spill] sm:$0xff] }
 0x698   :  { %v1667_v42 = vrot.slane %v4284_v51, %v3769_v50  ;;  %v1617_v28 = vsel %vm1615_vm4, %v1614_v10, %v1616_v29  ;;  %v1634_v33 = vmul.f32 0.2, %v1632_v0  ;;  %v1650_v7 = vadd.f32 %v1649_v32, %v1644_v27  ;;  %v4955_v27 = vld [vmem:[#allocation7_spill] sm:$0xff] }
 0x699   :  { %v1533_v37 = vadd.f32 %v1532_v2, %v1515_v9  ;;  %v1604_v34 = vmul.f32 %v4187_v30, %v1599_v63  ;;  %vm1633_vm5 = vcmp.gt.f32.partialorder %v1632_v0, 0.0  ;;  %v1622_v59 = vmul.f32 %v4213_v61, %v1617_v28  ;;  %v4957_v63 = vld [vmem:[#allocation13_spill] sm:$0xff] }
 0x69a   :  { %v1685_v4 = vrot.slane %v4284_v51, %v3771_v56  ;;  %v1635_v43 = vsel %vm1633_vm5, %v1632_v0, %v1634_v33  ;;  %v1652_v54 = vmul.f32 0.2, %v1650_v7  ;;  %v1668_v14 = vadd.f32 %v1667_v42, %v1662_v45 }
 0x69b   :  { %v1551_v18 = vadd.f32 %v1550_v5, %v1533_v37  ;;  %vm1651_vm6 = vcmp.gt.f32.partialorder %v1650_v7, 0.0  ;;  %v1703_v21 = vrot.slane %v4284_v51, %v3773_v1  ;;  %v1640_v30 = vmul.f32 %v4220_v57, %v1635_v43  ;;  %v1734_v2 = vpop.permute.xlu0 %1733  ;;  %v4958_v43 = vld [vmem:[#allocation9_spill] sm:$0xff] }
 0x69c   :  { %v1653_v8 = vsel %vm1651_vm6, %v1650_v7, %v1652_v54  ;;  %v1670_v13 = vmul.f32 0.2, %v1668_v14  ;;  %v1686_v55 = vadd.f32 %v1685_v4, %v1680_v22  ;;  %vm1669_vm7 = vcmp.gt.f32.partialorder %v1668_v14, 0.0  ;;  %v4959_v22 = vld [vmem:[#allocation10_spill] sm:$0xff] }
 0x69d   :  { %v1569_v40 = vadd.f32 %v1568_v41, %v1551_v18  ;;  %v1721_v19 = vrot.slane %v4284_v51, %v3775_v48  ;;  %v1658_v39 = vmul.f32 %v4191_v25, %v1653_v8  ;;  %v1739_v57 = vrot.slane %v4284_v51, %v3777_v47 }
 0x69e   :  { %v1671_v53 = vsel %vm1669_vm7, %v1668_v14, %v1670_v13  ;;  %v1688_v31 = vmul.f32 0.2, %v1686_v55  ;;  %vm1687_vm8 = vcmp.gt.f32.partialorder %v1686_v55, 0.0  ;;  %v1757_v15 = vrot.slane %v4310_v20, %v3763_v6 }
 0x69f   :  { %v1587_v12 = vadd.f32 %v1586_v36, %v1569_v40  ;;  %v1676_v10 = vmul.f32 %v4226_v35, %v1671_v53  ;;  %v1740_v52 = vadd.f32 %v1739_v57, %v1734_v2  ;;  %v1775_v51 = vrot.slane %v4310_v20, %v3765_v3 }
 0x6a0   :  { %v1689_v49 = vsel %vm1687_vm8, %v1686_v55, %v1688_v31  ;;  %v1793_v42 = vrot.slane %v4310_v20, %v3767_v62  ;;  %v1865_v31 = vrot.slane %v4310_v20, %v3775_v48 }
 0x6a1   :  { %v1605_v38 = vadd.f32 %v1604_v34, %v1587_v12  ;;  %v1694_v5 = vmul.f32 %v4955_v27, %v1689_v49  ;;  %v1742_v18 = vmul.f32 0.2, %v1740_v52  ;;  %vm1741_vm13 = vcmp.gt.f32.partialorder %v1740_v52, 0.0  ;;  %v1788_v12 = vpop.permute.xlu0 %1787 }
 0x6a2   :  { %v1794_v4 = vadd.f32 %v1793_v42, %v1788_v12 }
 0x6a3   :  { %v1623_v60 = vadd.f32 %v1622_v59, %v1605_v38  ;;  %v1743_v33 = vsel %vm1741_vm13, %v1740_v52, %v1742_v18  ;;  %v1811_v59 = vrot.slane %v4310_v20, %v3769_v50  ;;  %v1883_v52 = vrot.slane %v4310_v20, %v3777_v47 }
 0x6a4   :  { %v1698_v24 = vpop.permute.xlu1 %1697  ;;  %v1748_v54 = vmul.f32 %v4958_v43, %v1743_v33  ;;  %v1796_v55 = vmul.f32 0.2, %v1794_v4  ;;  %vm1795_vm2 = vcmp.gt.f32.partialorder %v1794_v4, 0.0 }
 0x6a5   :  { %v1641_v16 = vadd.f32 %v1640_v30, %v1623_v60  ;;  %v1704_v61 = vadd.f32 %v1703_v21, %v1698_v24  ;;  %v1829_v21 = vrot.slane %v4310_v20, %v3771_v56 }
 0x6a7   :  { %v1659_v58 = vadd.f32 %v1658_v39, %v1641_v16  ;;  %v1706_v11 = vmul.f32 0.2, %v1704_v61  ;;  %vm1705_vm9 = vcmp.gt.f32.partialorder %v1704_v61, 0.0  ;;  %v4960_v16 = vld [vmem:[#allocation14_spill] sm:$0xff]  ;;  %v1847_v39 = vrot.slane %v4310_v20, %v3773_v1 }
 0x6a9   :  { %v1716_v26 = vpop.permute.xlu1 %1715  ;;  %v1677_v9 = vadd.f32 %v1676_v10, %v1659_v58  ;;  %v1707_v25 = vsel %vm1705_vm9, %v1704_v61, %v1706_v11  ;;  %v1797_v58 = vsel %vm1795_vm2, %v1794_v4, %v1796_v55  ;;  %v1842_v11 = vpop.permute.xlu0 %1841  ;;  %v4966_v55 = vmov 0.0  }
 0x6aa   :  { %v1722_v17 = vadd.f32 %v1721_v19, %v1716_v26  ;;  %v1712_v29 = vmul.f32 %v4956_v46, %v1707_v25  ;;  %v4962_v25 = vld [vmem:[#allocation12_spill] sm:$0xff] }
 0x6ab   :  { %v1695_v35 = vadd.f32 %v1694_v5, %v1677_v9 }
 0x6ac   :  { %v1724_v23 = vmul.f32 0.2, %v1722_v17  ;;  %vm1723_vm12 = vcmp.gt.f32.partialorder %v1722_v17, 0.0 }
 0x6ad   :  { %v1713_v28 = vadd.f32 %v1712_v29, %v1695_v35  ;;  %v1872_v18 = vpop.permute.xlu0 %1871 }
 0x6ae   :  { %v1752_v44 = vpop.permute.xlu1 %1751  ;;  %v1725_v37 = vsel %vm1723_vm12, %v1722_v17, %v1724_v23  ;;  %v1848_v23 = vadd.f32 %v1847_v39, %v1842_v11  ;;  %v4971_v11 = vmov 7  }
 0x6af   :  { %v1758_v32 = vadd.f32 %v1757_v15, %v1752_v44  ;;  %v1730_v36 = vmul.f32 %v4957_v63, %v1725_v37  ;;  %v4961_v44 = vld [vmem:[#allocation11_spill] sm:$0xff] }
 0x6b0   :  { %v1802_v2 = vmul.f32 %v4961_v44, %v1797_v58  ;;  %vm1849_vm6 = vcmp.gt.f32.partialorder %v1848_v23, 0.0  ;;  %v4970_v58 = vmov 1   ;;  %v4976_v44 = vmov 5  }
 0x6b1   :  { %v1760_v40 = vmul.f32 0.2, %v1758_v32  ;;  %vm1759_vm1 = vcmp.gt.f32.partialorder %v1758_v32, 0.0  ;;  %v1731_v34 = vadd.f32 %v1730_v36, %v1713_v28 }
 0x6b3   :  { %v1770_v0 = vpop.permute.xlu1 %1769  ;;  %v1761_v38 = vsel %vm1759_vm1, %v1758_v32, %v1760_v40  ;;  %v1749_v24 = vadd.f32 %v1748_v54, %v1731_v34  ;;  %v1850_v32 = vmul.f32 0.2, %v1848_v23 }
 0x6b4   :  { %v1776_v41 = vadd.f32 %v1775_v51, %v1770_v0  ;;  %v1766_v30 = vmul.f32 %v4959_v22, %v1761_v38  ;;  %v4963_v51 = vld [vmem:[#allocation15_spill] sm:$0xff] }
 0x6b5   :  { %v1851_v63 = vsel %vm1849_vm6, %v1848_v23, %v1850_v32  ;;  %v4975_v23 = vmov 13   ;;  %v4985_v32 = vmov 21  }
 0x6b6   :  { %v1778_v7 = vmul.f32 0.2, %v1776_v41  ;;  %vm1777_vm15 = vcmp.gt.f32.partialorder %v1776_v41, 0.0  ;;  %v1767_v26 = vadd.f32 %v1766_v30, %v1749_v24 }
 0x6b8   :  { %v1806_v45 = vpop.permute.xlu1 %1805  ;;  %v1779_v14 = vsel %vm1777_vm15, %v1776_v41, %v1778_v7 }
 0x6b9   :  { %v1812_v60 = vadd.f32 %v1811_v59, %v1806_v45  ;;  %v1784_v61 = vmul.f32 %v4960_v16, %v1779_v14  ;;  %v2006_v16 = vld [vmem:[%s4967_s17] sm:$0xff] }
 0x6bb   :  { %v1814_v19 = vmul.f32 0.2, %v1812_v60  ;;  %vm1813_vm3 = vcmp.gt.f32.partialorder %v1812_v60, 0.0  ;;  %v1785_v57 = vadd.f32 %v1784_v61, %v1767_v26  ;;  %v2007_v61 = vld [vmem:[%s4967_s17 + $0x8] sm:$0xff]  ;;  %v2009_v26 = vld [vmem:[%s4967_s17 + $0x18] sm:$0xff] }
 0x6bc   :  { %v2981_v39 = vpack.c.bf16 %v2007_v61, %v2006_v16  ;;  %v5005_v16 = vmov 37   ;;  %v5006_v61 = vmov 35  }
 0x6bd   :  { %v1824_v8 = vpop.permute.xlu1 %1823  ;;  %v1815_v10 = vsel %vm1813_vm3, %v1812_v60, %v1814_v19  ;;  %v1803_v5 = vadd.f32 %v1802_v2, %v1785_v57  ;;  %v2008_v19 = vld [vmem:[%s4967_s17 + $0x10] sm:$0xff]  ;;  %v4972_v57 = vmov 2   ;;  %v4977_v2 = vmov 14  }
 0x6be   :  { %v1830_v13 = vadd.f32 %v1829_v21, %v1824_v8  ;;  %v1820_v15 = vmul.f32 %v4962_v25, %v1815_v10  ;;  %v4355_v21 = vld [vmem:[%s4887_s7] sm:$0xff]  ;;  %v4973_v10 = vmov 10   ;;  %v4979_v25 = vmov 16  }
 0x6bf   :  { %4965 = vst [vmem:[#allocation7_spill] sm:$0xff] %v4355_v21 }
 0x6c0   :  { %v1832_v53 = vmul.f32 0.2, %v1830_v13  ;;  %vm1831_vm4 = vcmp.gt.f32.partialorder %v1830_v13, 0.0  ;;  %v1821_v29 = vadd.f32 %v1820_v15, %v1803_v5  ;;  %v4980_v15 = vmov 8  }
 0x6c1   :  { %v4983_v5 = vmov 18  }
 0x6c2   :  { %v1860_v17 = vpop.permute.xlu1 %1859  ;;  %v1833_v9 = vsel %vm1831_vm4, %v1830_v13, %v1832_v53  ;;  %v4377_v53 = vld [vmem:[%s4968_s24] ss:$0 sm:$0xff] }
 0x6c3   :  { %v1866_v49 = vadd.f32 %v1865_v31, %v1860_v17  ;;  %v1838_v35 = vmul.f32 %v4963_v51, %v1833_v9  ;;  %v2984_v31 = vpack.c.bf16 %v2009_v26, %v2008_v19  ;;  %v4969_v17 = vmov 0.0|0.0  }
 0x6c4   :  { %v4978_v9 = vmov 6   ;;  %v4986_v51 = vmov 12   ;;  %v5007_v19 = vmov 40   ;;  %v5009_v26 = vmov 43  }
 0x6c5   :  { %v1868_v37 = vmul.f32 0.2, %v1866_v49  ;;  %vm1867_vm5 = vcmp.gt.f32.partialorder %v1866_v49, 0.0  ;;  %v1839_v40 = vadd.f32 %v1838_v35, %v1821_v29  ;;  %v4987_v35 = vmov 24  }
 0x6c6   :  { %v4989_v29 = vmov 27  }
 0x6c7   :  { %v1878_v27 = vpop.permute.xlu1 %1877  ;;  %v1869_v0 = vsel %vm1867_vm5, %v1866_v49, %v1868_v37  ;;  %v4974_v49 = vmov 3   ;;  %v4984_v37 = vmov 11  }
 0x6c8   :  { %v1884_v46 = vadd.f32 %v1883_v52, %v1878_v27  ;;  %v1874_v28 = vmul.f32 %v1872_v18, %v1869_v0  ;;  %v4981_v52 = vmov 17   ;;  %v4982_v27 = vmov 9  }
 0x6c9   :  { %v4990_v0 = vmov 19   ;;  %v4991_v18 = vmov 32  }
 0x6ca   :  { %v1886_v36 = vmul.f32 0.2, %v1884_v46  ;;  %vm1885_vm7 = vcmp.gt.f32.partialorder %v1884_v46, 0.0 }
 0x6cc   :  { %v1854_v41 = vpop.permute.xlu1 %1853  ;;  %v1887_v33 = vsel %vm1885_vm7, %v1884_v46, %v1886_v36  ;;  %v4988_v46 = vmov 15   ;;  %v4994_v36 = vmov 23  }
 0x6cd   :  { %v1856_v42 = vmul.f32 %v1854_v41, %v1851_v63  ;;  %v4992_v41 = vmov 20   ;;  %v4993_v63 = vmov 22  }
 0x6cf   :  { %v1857_v20 = vadd.f32 %v1856_v42, %v1839_v40  ;;  %v4995_v40 = vmov 25   ;;  %v4996_v42 = vmov 26  }
 0x6d1   :  { %v1890_v7 = vpop.permute.xlu1 %1889  ;;  %v1875_v45 = vadd.f32 %v1874_v28, %v1857_v20  ;;  %v4997_v28 = vmov 28   ;;  %v4998_v20 = vmov 33  }
 0x6d2   :  { %v1892_v12 = vmul.f32 %v1890_v7, %v1887_v33  ;;  %v2874_v33 = vld [vmem:[%s4999_s26] ss:$0 sm:$0xff] }
 0x6d4   :  { %v1893_v34 = vadd.f32 %v1892_v12, %v1875_v45  ;;  %v2876_v45 = vld [vmem:[%s5000_s8] ss:$0 sm:$0xff] }
 0x6d6   :  { %v1894_v59 = vsel %vm343_vm10, %v1893_v34, -1e+30 }
 0x6d7   :  { %v1895_v4 = vsel %vm345_vm11, %v1894_v59, -inf }
 0x6d8   :  { %1896 = vmax.xlane.f32.xlu1 %v1895_v4 }
 0x6e9   :  { %2143 = vperm.xlu1 %3227, %v4377_v53  }
 0x6ed   :  { %3228 = vset.pattern.permute.xlu1 %v4970_v58  ;;  %v5012_v58 = vmov 39  }
 0x6ee   :  { %2161 = vperm.xlu1 %3228, %v4377_v53  }
 0x6f2   :  { %3229 = vset.pattern.permute.xlu1 %v4972_v57  ;;  %v5014_v57 = vmov 41  }
 0x6f3   :  { %2179 = vperm.xlu1 %3229, %v4377_v53  }
 0x6f7   :  { %3230 = vset.pattern.permute.xlu1 %v4974_v49  ;;  %v5016_v49 = vmov 42  }
 0x6f8   :  { %2197 = vperm.xlu1 %3230, %v4377_v53  }
 0x6fc   :  { %3232 = vset.pattern.permute.xlu1 %v4976_v44  ;;  %v5018_v44 = vmov 44  }
 0x6fd   :  { %2233 = vperm.xlu1 %3232, %v4377_v53  }
 0x701   :  { %3233 = vset.pattern.permute.xlu1 %v4978_v9  ;;  %v5020_v9 = vmov 45  }
 0x702   :  { %2251 = vperm.xlu1 %3233, %v4377_v53  }
 0x706   :  { %3235 = vset.pattern.permute.xlu1 %v4980_v15 }
 0x707   :  { %2287 = vperm.xlu1 %3235, %v4377_v53  }
 0x70b   :  { %3236 = vset.pattern.permute.xlu1 %v4982_v27 }
 0x70c   :  { %2305 = vperm.xlu1 %3236, %v4377_v53  }
 0x710   :  { %3238 = vset.pattern.permute.xlu1 %v4984_v37  ;;  %v5024_v37 = vmov 57  }
 0x711   :  { %2341 = vperm.xlu1 %3238, %v4377_v53  }
 0x715   :  { %3239 = vset.pattern.permute.xlu1 %v4986_v51  ;;  %v5025_v51 = vmov 60  }
 0x716   :  { %2359 = vperm.xlu1 %3239, %v4377_v53  }
 0x71a   :  { %3242 = vset.pattern.permute.xlu1 %v4988_v46  ;;  %v5026_v46 = vmov 63  }
 0x71b   :  { %2413 = vperm.xlu1 %3242, %v4377_v53  }
 0x71f   :  { %3246 = vset.pattern.permute.xlu1 %v4990_v0  ;;  %v5027_v0 = vmov 31  }
 0x720   :  { %2485 = vperm.xlu1 %3246, %v4377_v53  }
 0x724   :  { %3247 = vset.pattern.permute.xlu1 %v4992_v41 }
 0x725   :  { %2503 = vperm.xlu1 %3247, %v4377_v53  }
 0x729   :  { %3249 = vset.pattern.permute.xlu1 %v4993_v63 }
 0x72a   :  { %2539 = vperm.xlu1 %3249, %v4377_v53  }
 0x72e   :  { %3250 = vset.pattern.permute.xlu1 %v4994_v36 }
 0x72f   :  { %2557 = vperm.xlu1 %3250, %v4377_v53  }
 0x733   :  { %3252 = vset.pattern.permute.xlu1 %v4995_v40 }
 0x734   :  { %2593 = vperm.xlu1 %3252, %v4377_v53  }
 0x738   :  { %3253 = vset.pattern.permute.xlu1 %v4996_v42 }
 0x739   :  { %2611 = vperm.xlu1 %3253, %v4377_v53  }
 0x73d   :  { %3255 = vset.pattern.permute.xlu1 %v4997_v28 }
 0x73e   :  { %2647 = vperm.xlu1 %3255, %v4377_v53  }
 0x742   :  { %3257 = vset.pattern.permute.xlu1 %v4998_v20  ;;  %v5029_v20 = vmov 53  }
 0x765   :  { %v1897_v43 = vpop.xlane.xlu1 %1896 }
 0x766   :  { %v1898_v54 = vsub.f32 %v1894_v59, %v1897_v43  ;;  %v2877_v59 = vld [vmem:[%s5001_s28] ss:$0 sm:$0xff] }
 0x768   :  { %v1899_v14 = vmul.f32 1.442695, %v1898_v54 }
 0x769   :  { %v4493_v15 = vpop.permute.xlu1 %2143 }
 0x76a   :  { %3307 = vpow2.f32 %v1899_v14 }
 0x76d   :  { %v4497_v27 = vpop.permute.xlu1 %2161 }
 0x774   :  { %v3308_v60 = vpop.eup %3307 }
 0x775   :  { %v1901_v24 = vmul.f32 %v4355_v21, %v3308_v60  ;;  %v5002_v60 = vld [vmem:[#allocation6_spill] sm:$0xff] }
 0x777   :  { %v1902_v22 = vsel %vm345_vm11, %v1901_v24, 0.0 }
 0x778   :  { %1903 = vadd.xlane.f32.xlu0 %v1902_v22  ;;  %v2878_v22 = vld [vmem:[%s5003_s4] ss:$0 sm:$0xff] }
 0x78e   :  { %2215 = vperm.xlu0 %3231, %v4377_v53  }
 0x792   :  { %3234 = vset.pattern.permute.xlu0 %v4971_v11  ;;  %v5013_v11 = vmov 47  }
 0x793   :  { %2269 = vperm.xlu0 %3234, %v4377_v53  }
 0x797   :  { %3237 = vset.pattern.permute.xlu0 %v4973_v10  ;;  %v5015_v10 = vmov 48  }
 0x798   :  { %2323 = vperm.xlu0 %3237, %v4377_v53  }
 0x79c   :  { %3240 = vset.pattern.permute.xlu0 %v4975_v23  ;;  %v5017_v23 = vmov 49  }
 0x79d   :  { %2377 = vperm.xlu0 %3240, %v4377_v53  }
 0x7a1   :  { %3241 = vset.pattern.permute.xlu0 %v4977_v2  ;;  %v5019_v2 = vmov 50  }
 0x7a2   :  { %2395 = vperm.xlu0 %3241, %v4377_v53  }
 0x7a6   :  { %3243 = vset.pattern.permute.xlu0 %v4979_v25  ;;  %v5021_v25 = vmov 51  }
 0x7a7   :  { %2431 = vperm.xlu0 %3243, %v4377_v53  }
 0x7ab   :  { %3244 = vset.pattern.permute.xlu0 %v4981_v52  ;;  %v5022_v52 = vmov 52  }
 0x7ac   :  { %2449 = vperm.xlu0 %3244, %v4377_v53  }
 0x7b0   :  { %3245 = vset.pattern.permute.xlu0 %v4983_v5  ;;  %v5023_v5 = vmov 54  }
 0x7b1   :  { %2467 = vperm.xlu0 %3245, %v4377_v53  }
 0x7b5   :  { %3248 = vset.pattern.permute.xlu0 %v4985_v32  ;;  %v4502_v32 = vpop.permute.xlu1 %2179 }
 0x7b6   :  { %2521 = vperm.xlu0 %3248, %v4377_v53  }
 0x7ba   :  { %3251 = vset.pattern.permute.xlu0 %v4987_v35  ;;  %v4507_v35 = vpop.permute.xlu1 %2197 }
 0x7bb   :  { %2575 = vperm.xlu0 %3251, %v4377_v53  }
 0x7bf   :  { %3254 = vset.pattern.permute.xlu0 %v4989_v29  ;;  %v4511_v29 = vpop.permute.xlu1 %2233 }
 0x7c0   :  { %2629 = vperm.xlu0 %3254, %v4377_v53  }
 0x7c4   :  { %3256 = vset.pattern.permute.xlu0 %v4991_v18  ;;  %v4515_v18 = vpop.permute.xlu1 %2251 }
 0x7c8   :  { %v4517_v41 = vpop.permute.xlu1 %2287 }
 0x7cc   :  { %v4520_v63 = vpop.permute.xlu1 %2305 }
 0x7d0   :  { %v4522_v36 = vpop.permute.xlu1 %2341 }
 0x7d4   :  { %v4524_v40 = vpop.permute.xlu1 %2359 }
 0x7d8   :  { %v4526_v42 = vpop.permute.xlu1 %2413 }
 0x7dc   :  { %v4528_v28 = vpop.permute.xlu1 %2485 }
 0x7dd   :  { %5028 = vst [vmem:[#allocation8_spill] sm:$0xff] %v4528_v28 }
 0x805   :  { %v1904_v30 = vpop.xlane.xlu0 %1903 }
 0x806   :  { %3309 = vrcp.f32 %v1904_v30 }
 0x810   :  { %v3310_v8 = vpop.eup %3309 }
 0x811   :  { %v1906_v13 = vmul.f32 %v3310_v8, %v1901_v24 }
 0x813   :  { %2953 = vmatmul.mubr.msk.f32.vlgmr.msra.gmra.mrb[6].mxu1 %vm345_vm11, %v1906_v13 }
 0x814   :  { %2963 = vmatprep.mubr.msk.f32.mxu1 %vm3343_vm0, %v4966_v55  ;;  %2982 = vmatpush3.bf16.msra.mxu1 %v2981_v39  ;;  %v5004_v55 = vmov 34   ;;  %v5008_v39 = vmov 36  }
 0x815   :  { %2983 = vmatprep.subr.bf16.mxu1 %v4969_v17  ;;  %v5011_v17 = vmov 46  }
 0x818   :  { %2985 = vmatpush3.bf16.msra.mxu1 %v2984_v31  ;;  %v5010_v31 = vmov 38  }
 0x8e6   :  { %v1982_v7 = vpop.f32.mrb[6].mxu1 }
 0x8e7   :  { %v1983_v12 = vadd.f32 %v2874_v33, %v1982_v7  ;;  %v2954_v34 = vpop.f32.mrb[7].mxu1  ;;  %v4531_v33 = vpop.permute.xlu1 %2503 }
 0x8e8   :  { %5030 = vst [vmem:[#allocation13_spill] sm:$0xff] %v4531_v33  ;;  %v4533_v7 = vpop.permute.xlu0 %2215 }
 0x8e9   :  { %v1994_v4 = vmul.f32 %v2876_v45, %v1983_v12 }
 0x8eb   :  { %v2001_v43 = vadd.f32 %v2877_v59, %v1994_v4  ;;  %v4535_v45 = vpop.permute.xlu1 %2539  ;;  %v5033_v59 = vmov 55   ;;  %v5034_v4 = vmov 56  }
 0x8ec   :  { %5031 = vst [vmem:[#allocation9_spill] sm:$0xff] %v4535_v45  ;;  %v4538_v12 = vpop.permute.xlu0 %2269 }
 0x8ed   :  { %vm2002_vm0 = vcmp.gt.f32.partialorder %v2001_v43, 0.0  ;;  %v2003_v54 = vmul.f32 0.2, %v2001_v43 }
 0x8ef   :  { %v2004_v14 = vsel %vm2002_vm0, %v2001_v43, %v2003_v54  ;;  %v4540_v34 = vpop.permute.xlu1 %2557 }
 0x8f0   :  { %v2005_v24 = vadd.f32 %v2004_v14, %v5002_v60  ;;  %5032 = vst [vmem:[#allocation10_spill] sm:$0xff] %v4540_v34  ;;  %v4545_v43 = vpop.permute.xlu0 %2323  ;;  %v5036_v14 = vmov 58  }
 0x8f2   :  { %2964 = vmatmul.mubr.msk.f32.vlgmr.msra.gmra.mrb[8].mxu1 %vm1206_vm14, %v2005_v24 }
 0x8f3   :  { %v4547_v54 = vpop.permute.xlu1 %2593 }
 0x8f4   :  { %5035 = vst [vmem:[#allocation14_spill] sm:$0xff] %v4547_v54  ;;  %v4552_v60 = vpop.permute.xlu0 %2377 }
 0x8f7   :  { %v4554_v24 = vpop.permute.xlu1 %2611 }
 0x8f8   :  { %5037 = vst [vmem:[#allocation11_spill] sm:$0xff] %v4554_v24 }
 0x9c5   :  { %v2088_v30 = vpop.f32.mrb[8].mxu1 }
 0x9c6   :  { %v4452_v8 = vadd.f32 %v2878_v22, %v2088_v30  ;;  %v2965_v13 = vpop.f32.mrb[9].mxu1  ;;  %v5038_v22 = vmov 59   ;;  %v4558_v30 = vpop.permute.xlu0 %2395 }
 0x9c7   :  { %v4560_v13 = vpop.permute.xlu1 %2647 }
 0x9c8   :  { %2149 = vperm.xlu1 %3257, %v4452_v8   ;;  %2126 = vperm.xlu0 %3256, %v4452_v8   ;;  %5039 = vst [vmem:[#allocation12_spill] sm:$0xff] %v4560_v13 }
 0x9c9   :  { %2967 = vmatpush3.msra.mxu0 %v4452_v8 }
 0x9cc   :  { %3258 = vset.pattern.permute.xlu1 %v5004_v55  ;;  %3261 = vset.pattern.permute.xlu0 %v5005_v16  ;;  %v5040_v55 = vmov 61   ;;  %v4564_v16 = vpop.permute.xlu0 %2431 }
 0x9cd   :  { %2167 = vperm.xlu1 %3258, %v4452_v8   ;;  %2221 = vperm.xlu0 %3261, %v4452_v8  }
 0x9d1   :  { %3259 = vset.pattern.permute.xlu1 %v5006_v61  ;;  %3264 = vset.pattern.permute.xlu0 %v5007_v19  ;;  %v5041_v19 = vmov 62  }
 0x9d2   :  { %2185 = vperm.xlu1 %3259, %v4452_v8   ;;  %2275 = vperm.xlu0 %3264, %v4452_v8  }
 0x9d6   :  { %3260 = vset.pattern.permute.xlu1 %v5008_v39  ;;  %3267 = vset.pattern.permute.xlu0 %v5009_v26  ;;  %v4568_v39 = vpop.permute.xlu0 %2449 }
 0x9d7   :  { %2203 = vperm.xlu1 %3260, %v4452_v8   ;;  %2329 = vperm.xlu0 %3267, %v4452_v8  }
 0x9db   :  { %3262 = vset.pattern.permute.xlu1 %v5010_v31  ;;  %3270 = vset.pattern.permute.xlu0 %v5011_v17  ;;  %v5042_v31 = vmov 29   ;;  %v5043_v17 = vmov 30  }
 0x9dc   :  { %2239 = vperm.xlu1 %3262, %v4452_v8   ;;  %2383 = vperm.xlu0 %3270, %v4452_v8  }
 0x9e0   :  { %3263 = vset.pattern.permute.xlu1 %v5012_v58  ;;  %3271 = vset.pattern.permute.xlu0 %v5013_v11  ;;  %v4573_v58 = vpop.permute.xlu0 %2467 }
 0x9e1   :  { %2257 = vperm.xlu1 %3263, %v4452_v8   ;;  %2401 = vperm.xlu0 %3271, %v4452_v8  }
 0x9e5   :  { %3265 = vset.pattern.permute.xlu1 %v5014_v57  ;;  %3272 = vset.pattern.permute.xlu0 %v5015_v10  ;;  %v4576_v57 = vpop.permute.xlu0 %2521 }
 0x9e6   :  { %2293 = vperm.xlu1 %3265, %v4452_v8   ;;  %2419 = vperm.xlu0 %3272, %v4452_v8   ;;  %5044 = vst [vmem:[#allocation15_spill] sm:$0xff] %v4576_v57 }
 0x9ea   :  { %3266 = vset.pattern.permute.xlu1 %v5016_v49  ;;  %3273 = vset.pattern.permute.xlu0 %v5017_v23  ;;  %v4578_v49 = vpop.permute.xlu0 %2575 }
 0x9eb   :  { %2311 = vperm.xlu1 %3266, %v4452_v8   ;;  %2437 = vperm.xlu0 %3273, %v4452_v8   ;;  %5045 = vst [vmem:[#allocation6_spill] sm:$0xff] %v4578_v49 }
 0x9ee   :  { %v4580_v23 = vpop.permute.xlu0 %2629 }
 0x9ef   :  { %3268 = vset.pattern.permute.xlu1 %v5018_v44  ;;  %3274 = vset.pattern.permute.xlu0 %v5019_v2  ;;  %5046 = vst [vmem:[#allocation16_spill] sm:$0xff] %v4580_v23 }
 0x9f0   :  { %2347 = vperm.xlu1 %3268, %v4452_v8   ;;  %2455 = vperm.xlu0 %3274, %v4452_v8  }
 0x9f4   :  { %3269 = vset.pattern.permute.xlu1 %v5020_v9  ;;  %3275 = vset.pattern.permute.xlu0 %v5021_v25 }
 0x9f5   :  { %2365 = vperm.xlu1 %3269, %v4452_v8   ;;  %2473 = vperm.xlu0 %3275, %v4452_v8  }
 0x9f9   :  { %3276 = vset.pattern.permute.xlu0 %v5022_v52 }
 0x9fa   :  { %2491 = vperm.xlu0 %3276, %v4452_v8  }
 0x9fe   :  { %3278 = vset.pattern.permute.xlu0 %v5023_v5 }
 0x9ff   :  { %2527 = vperm.xlu0 %3278, %v4452_v8  }
 0xa03   :  { %3281 = vset.pattern.permute.xlu0 %v5024_v37 }
 0xa04   :  { %2581 = vperm.xlu0 %3281, %v4452_v8  }
 0xa08   :  { %3284 = vset.pattern.permute.xlu0 %v5025_v51 }
 0xa09   :  { %2635 = vperm.xlu0 %3284, %v4452_v8  }
 0xa0d   :  { %3289 = vset.pattern.permute.xlu0 %v5026_v46 }
 0xa0e   :  { %2689 = vperm.xlu0 %3289, %v4452_v8  }
 0xa12   :  { %3290 = vset.pattern.permute.xlu0 %v5027_v0 }
 0xa13   :  { %2701 = vperm.xlu0 %3290, %v4377_v53  }
 0xa1e   :  { %2092 = vxpose.xlu1.b32.start.end [1/1] (short) (narrow) %v4452_v8, 32 }
 0xa3c   :  { %3277 = vset.pattern.permute.xlu1 %v5029_v20 }
 0xa47   :  { %v2150_v61 = vpop.permute.xlu1 %2149  ;;  %v2127_v2 = vpop.permute.xlu0 %2126 }
 0xa48   :  { %2509 = vperm.xlu1 %3277, %v4452_v8  }
 0xa4c   :  { %3279 = vset.pattern.permute.xlu1 %v5033_v59  ;;  %v2168_v26 = vpop.permute.xlu1 %2167  ;;  %v2222_v25 = vpop.permute.xlu0 %2221 }
 0xa4d   :  { %2545 = vperm.xlu1 %3279, %v4452_v8  }
 0xa51   :  { %3280 = vset.pattern.permute.xlu1 %v5034_v4  ;;  %v2186_v11 = vpop.permute.xlu1 %2185  ;;  %v2276_v5 = vpop.permute.xlu0 %2275 }
 0xa52   :  { %2563 = vperm.xlu1 %3280, %v4452_v8  }
 0xa56   :  { %3282 = vset.pattern.permute.xlu1 %v5036_v14  ;;  %v2204_v10 = vpop.permute.xlu1 %2203  ;;  %v4588_v51 = vpop.permute.xlu0 %2329 }
 0xa57   :  { %2599 = vperm.xlu1 %3282, %v4452_v8  }
 0xa5b   :  { %3283 = vset.pattern.permute.xlu1 %v5038_v22  ;;  %v4596_v14 = vpop.permute.xlu0 %2383 }
 0xa5c   :  { %2617 = vperm.xlu1 %3283, %v4452_v8  }
 0xa60   :  { %3285 = vset.pattern.permute.xlu1 %v5040_v55 }
 0xa61   :  { %2653 = vperm.xlu1 %3285, %v4452_v8  }
 0xa65   :  { %3286 = vset.pattern.permute.xlu1 %v5041_v19 }
 0xa66   :  { %2671 = vperm.xlu1 %3286, %v4452_v8   ;;  %v2240_v8 = vpop.permute.xlu1 %2239 }
 0xa6a   :  { %3287 = vset.pattern.permute.xlu1 %v5042_v31  ;;  %v2258_v44 = vpop.permute.xlu1 %2257 }
 0xa6b   :  { %2665 = vperm.xlu1 %3287, %v4377_v53  }
 0xa6e   :  { %v4582_v9 = vpop.permute.xlu1 %2293 }
 0xa6f   :  { %3288 = vset.pattern.permute.xlu1 %v5043_v17 }
 0xa70   :  { %2683 = vperm.xlu1 %3288, %v4377_v53  }
 0xa72   :  { %v4584_v52 = vpop.permute.xlu1 %2311 }
 0xa76   :  { %v4586_v37 = vpop.permute.xlu1 %2347 }
 0xa7a   :  { %v4590_v53 = vpop.permute.xlu1 %2365 }
 0xa9e   :  { %v2108_v46 = vpop.trf.xlu1 }
 0xa9f   :  { %v2132_v0 = vrot.slane %v2108_v46, %v3763_v6  ;;  %v2155_v20 = vrot.slane %v2108_v46, %v3765_v3  ;;  %v2173_v59 = vrot.slane %v2108_v46, %v3767_v62  ;;  %v2191_v4 = vrot.slane %v2108_v46, %v3769_v50 }
 0xaa0   :  { %v2209_v22 = vrot.slane %v2108_v46, %v3771_v56  ;;  %v2227_v55 = vrot.slane %v2108_v46, %v3773_v1  ;;  %v2245_v19 = vrot.slane %v2108_v46, %v3775_v48  ;;  %v2263_v54 = vrot.slane %v2108_v46, %v3777_v47 }
 0xaa1   :  { %v2133_v31 = vadd.f32 %v2132_v0, %v2127_v2  ;;  %v2156_v17 = vadd.f32 %v2155_v20, %v2150_v61  ;;  %v2174_v21 = vadd.f32 %v2173_v59, %v2168_v26  ;;  %v2192_v38 = vadd.f32 %v2191_v4, %v2186_v11  ;;  %v4602_v61 = vpop.permute.xlu0 %2401 }
 0xaa2   :  { %v2210_v13 = vadd.f32 %v2209_v22, %v2204_v10  ;;  %v2228_v23 = vadd.f32 %v2227_v55, %v2222_v25  ;;  %v2246_v24 = vadd.f32 %v2245_v19, %v2240_v8  ;;  %v4606_v25 = vpop.trf.xlu1  ;;  %v2264_v46 = vadd.f32 %v2263_v54, %v2258_v44 }
 0xaa3   :  { %vm2134_vm8 = vcmp.gt.f32.partialorder %v2133_v31, 0.0  ;;  %v2135_v49 = vmul.f32 0.2, %v2133_v31  ;;  %vm2157_vm9 = vcmp.gt.f32.partialorder %v2156_v17, 0.0  ;;  %v2158_v34 = vmul.f32 0.2, %v2156_v17 }
 0xaa4   :  { %vm2175_vm12 = vcmp.gt.f32.partialorder %v2174_v21, 0.0  ;;  %v2176_v45 = vmul.f32 0.2, %v2174_v21  ;;  %vm2193_vm13 = vcmp.gt.f32.partialorder %v2192_v38, 0.0  ;;  %v2194_v57 = vmul.f32 0.2, %v2192_v38 }
 0xaa5   :  { %v2136_v33 = vsel %vm2134_vm8, %v2133_v31, %v2135_v49  ;;  %v2159_v28 = vsel %vm2157_vm9, %v2156_v17, %v2158_v34  ;;  %vm2211_vm1 = vcmp.gt.f32.partialorder %v2210_v13, 0.0  ;;  %v2212_v2 = vmul.f32 0.2, %v2210_v13  ;;  %v2420_v54 = vpop.permute.xlu0 %2419 }
 0xaa6   :  { %v2146_v26 = vmul.f32 %v4493_v15, %v2136_v33  ;;  %v2164_v11 = vmul.f32 %v4497_v27, %v2159_v28  ;;  %v2177_v10 = vsel %vm2175_vm12, %v2174_v21, %v2176_v45  ;;  %v2195_v8 = vsel %vm2193_vm13, %v2192_v38, %v2194_v57 }
 0xaa7   :  { %vm2229_vm15 = vcmp.gt.f32.partialorder %v2228_v23, 0.0  ;;  %v2182_v20 = vmul.f32 %v4502_v32, %v2177_v10  ;;  %v2213_v59 = vsel %vm2211_vm1, %v2210_v13, %v2212_v2  ;;  %v2230_v49 = vmul.f32 0.2, %v2228_v23 }
 0xaa8   :  { %v2165_v0 = vadd.f32 %v2164_v11, %v2146_v26  ;;  %v2200_v34 = vmul.f32 %v4507_v35, %v2195_v8  ;;  %vm2247_vm2 = vcmp.gt.f32.partialorder %v2246_v24, 0.0  ;;  %v2248_v4 = vmul.f32 0.2, %v2246_v24 }
 0xaa9   :  { %v2281_v15 = vrot.slane %v4606_v25, %v3763_v6  ;;  %v2231_v27 = vsel %vm2229_vm15, %v2228_v23, %v2230_v49  ;;  %v2299_v38 = vrot.slane %v4606_v25, %v3765_v3  ;;  %v2317_v21 = vrot.slane %v4606_v25, %v3767_v62  ;;  %v2438_v26 = vpop.permute.xlu0 %2437 }
 0xaaa   :  { %v2183_v33 = vadd.f32 %v2182_v20, %v2165_v0  ;;  %v2218_v28 = vmul.f32 %v4533_v7, %v2213_v59  ;;  %v2266_v32 = vmul.f32 0.2, %v2264_v46  ;;  %v2236_v35 = vmul.f32 %v4511_v29, %v2231_v27  ;;  %v4628_v0 = vpop.trf.xlu1 }
 0xaab   :  { %v2282_v45 = vadd.f32 %v2281_v15, %v2276_v5  ;;  %vm2265_vm3 = vcmp.gt.f32.partialorder %v2264_v46, 0.0  ;;  %v2300_v57 = vadd.f32 %v2299_v38, %v4582_v9  ;;  %v2249_v44 = vsel %vm2247_vm2, %v2246_v24, %v2248_v4 }
 0xaac   :  { %v2201_v13 = vadd.f32 %v2200_v34, %v2183_v33  ;;  %v2318_v23 = vadd.f32 %v2317_v21, %v4584_v52  ;;  %v2335_v55 = vrot.slane %v4606_v25, %v3769_v50  ;;  %v2353_v7 = vrot.slane %v4606_v25, %v3771_v56 }
 0xaad   :  { %v2284_v22 = vmul.f32 0.2, %v2282_v45  ;;  %vm2283_vm4 = vcmp.gt.f32.partialorder %v2282_v45, 0.0  ;;  %v2302_v31 = vmul.f32 0.2, %v2300_v57  ;;  %v2267_v5 = vsel %vm2265_vm3, %v2264_v46, %v2266_v32 }
 0xaae   :  { %v2219_v19 = vadd.f32 %v2218_v28, %v2201_v13  ;;  %vm2301_vm5 = vcmp.gt.f32.partialorder %v2300_v57, 0.0  ;;  %v2336_v29 = vadd.f32 %v2335_v55, %v4588_v51  ;;  %v2254_v9 = vmul.f32 %v4515_v18, %v2249_v44  ;;  %v2456_v28 = vpop.permute.xlu0 %2455 }
 0xaaf   :  { %v2320_v24 = vmul.f32 0.2, %v2318_v23  ;;  %v2285_v2 = vsel %vm2283_vm4, %v2282_v45, %v2284_v22  ;;  %vm2319_vm6 = vcmp.gt.f32.partialorder %v2318_v23, 0.0  ;;  %v2354_v52 = vadd.f32 %v2353_v7, %v4586_v37 }
 0xab0   :  { %v2237_v17 = vadd.f32 %v2236_v35, %v2219_v19  ;;  %v2272_v10 = vmul.f32 %v4538_v12, %v2267_v5  ;;  %v2303_v8 = vsel %vm2301_vm5, %v2300_v57, %v2302_v31  ;;  %v2338_v20 = vmul.f32 0.2, %v2336_v29 }
 0xab1   :  { %v2371_v46 = vrot.slane %v4606_v25, %v3773_v1  ;;  %v2389_v51 = vrot.slane %v4606_v25, %v3775_v48  ;;  %v2407_v18 = vrot.slane %v4606_v25, %v3777_v47  ;;  %v2290_v37 = vmul.f32 %v4517_v41, %v2285_v2 }
 0xab2   :  { %v2255_v11 = vadd.f32 %v2254_v9, %v2237_v17  ;;  %v2321_v49 = vsel %vm2319_vm6, %v2318_v23, %v2320_v24  ;;  %vm2337_vm7 = vcmp.gt.f32.partialorder %v2336_v29, 0.0  ;;  %v2356_v34 = vmul.f32 0.2, %v2354_v52  ;;  %v2474_v7 = vpop.permute.xlu0 %2473 }
 0xab3   :  { %v2372_v12 = vadd.f32 %v2371_v46, %v4590_v53  ;;  %v2390_v4 = vadd.f32 %v2389_v51, %v4596_v14  ;;  %v2425_v15 = vrot.slane %v4628_v0, %v3763_v6  ;;  %v2308_v27 = vmul.f32 %v4520_v63, %v2303_v8  ;;  %v4657_v8 = vpop.trf.xlu1 }
 0xab4   :  { %v2273_v59 = vadd.f32 %v2272_v10, %v2255_v11  ;;  %vm2355_vm0 = vcmp.gt.f32.partialorder %v2354_v52, 0.0  ;;  %v2339_v38 = vsel %vm2337_vm7, %v2336_v29, %v2338_v20  ;;  %v2408_v25 = vadd.f32 %v2407_v18, %v4602_v61 }
 0xab5   :  { %v2374_v21 = vmul.f32 0.2, %v2372_v12  ;;  %v2443_v41 = vrot.slane %v4628_v0, %v3765_v3  ;;  %v2326_v53 = vmul.f32 %v4545_v43, %v2321_v49  ;;  %vm2373_vm8 = vcmp.gt.f32.partialorder %v2372_v12, 0.0 }
 0xab6   :  { %v2291_v33 = vadd.f32 %v2290_v37, %v2273_v59  ;;  %v2357_v14 = vsel %vm2355_vm0, %v2354_v52, %v2356_v34  ;;  %v2392_v45 = vmul.f32 0.2, %v2390_v4  ;;  %v2426_v13 = vadd.f32 %v2425_v15, %v2420_v54  ;;  %v2492_v20 = vpop.permute.xlu0 %2491 }
 0xab7   :  { %v2461_v35 = vrot.slane %v4628_v0, %v3767_v62  ;;  %v2344_v57 = vmul.f32 %v4522_v36, %v2339_v38  ;;  %vm2391_vm9 = vcmp.gt.f32.partialorder %v2390_v4, 0.0  ;;  %v2375_v44 = vsel %vm2373_vm8, %v2372_v12, %v2374_v21 }
 0xab8   :  { %v2309_v32 = vadd.f32 %v2308_v27, %v2291_v33  ;;  %v2410_v61 = vmul.f32 0.2, %v2408_v25  ;;  %v2444_v22 = vadd.f32 %v2443_v41, %v2438_v26  ;;  %v2362_v23 = vmul.f32 %v4524_v40, %v2357_v14  ;;  %v5047_v41 = vld [vmem:[#allocation8_spill] sm:$0xff] }
 0xab9   :  { %vm2409_vm12 = vcmp.gt.f32.partialorder %v2408_v25, 0.0  ;;  %v2479_v43 = vrot.slane %v4628_v0, %v3769_v50  ;;  %v2393_v19 = vsel %vm2391_vm9, %v2390_v4, %v2392_v45  ;;  %v2428_v31 = vmul.f32 0.2, %v2426_v13 }
 0xaba   :  { %v2327_v63 = vadd.f32 %v2326_v53, %v2309_v32  ;;  %v2462_v54 = vadd.f32 %v2461_v35, %v2456_v28  ;;  %v2380_v5 = vmul.f32 %v4552_v60, %v2375_v44  ;;  %vm2427_vm13 = vcmp.gt.f32.partialorder %v2426_v13, 0.0  ;;  %v5048_v35 = vld [vmem:[#allocation13_spill] sm:$0xff] }
 0xabb   :  { %v2411_v36 = vsel %vm2409_vm12, %v2408_v25, %v2410_v61  ;;  %v2446_v17 = vmul.f32 0.2, %v2444_v22  ;;  %v2398_v24 = vmul.f32 %v4558_v30, %v2393_v19  ;;  %vm2445_vm1 = vcmp.gt.f32.partialorder %v2444_v22, 0.0  ;;  %v2528_v25 = vpop.permute.xlu0 %2527 }
 0xabc   :  { %v2345_v55 = vadd.f32 %v2344_v57, %v2327_v63  ;;  %v2497_v40 = vrot.slane %v4628_v0, %v3771_v56  ;;  %v2429_v2 = vsel %vm2427_vm13, %v2426_v13, %v2428_v31  ;;  %v2464_v52 = vmul.f32 0.2, %v2462_v54 }
 0xabd   :  { %v2480_v26 = vadd.f32 %v2479_v43, %v2474_v7  ;;  %v2416_v10 = vmul.f32 %v4526_v42, %v2411_v36  ;;  %vm2463_vm15 = vcmp.gt.f32.partialorder %v2462_v54, 0.0  ;;  %v2447_v60 = vsel %vm2445_vm1, %v2444_v22, %v2446_v17 }
 0xabe   :  { %v2363_v29 = vadd.f32 %v2362_v23, %v2345_v55  ;;  %v2515_v46 = vrot.slane %v4628_v0, %v3773_v1  ;;  %v2434_v30 = vmul.f32 %v4564_v16, %v2429_v2  ;;  %v2465_v18 = vsel %vm2463_vm15, %v2462_v54, %v2464_v52  ;;  %v5049_v23 = vld [vmem:[#allocation15_spill] sm:$0xff] }
 0xabf   :  { %v2482_v59 = vmul.f32 0.2, %v2480_v26  ;;  %v2498_v37 = vadd.f32 %v2497_v40, %v2492_v20  ;;  %v2452_v34 = vmul.f32 %v4568_v39, %v2447_v60  ;;  %vm2481_vm2 = vcmp.gt.f32.partialorder %v2480_v26, 0.0  ;;  %v2582_v7 = vpop.permute.xlu0 %2581  ;;  %v5052_v20 = vld [vmem:[#allocation6_spill] sm:$0xff] }
 0xac0   :  { %v2381_v9 = vadd.f32 %v2380_v5, %v2363_v29  ;;  %v2470_v4 = vmul.f32 %v4573_v58, %v2465_v18  ;;  %v2533_v38 = vrot.slane %v4628_v0, %v3775_v48  ;;  %v2551_v53 = vrot.slane %v4628_v0, %v3777_v47 }
 0xac1   :  { %v2483_v33 = vsel %vm2481_vm2, %v2480_v26, %v2482_v59  ;;  %v2500_v27 = vmul.f32 0.2, %v2498_v37  ;;  %vm2499_vm3 = vcmp.gt.f32.partialorder %v2498_v37, 0.0  ;;  %v2569_v57 = vrot.slane %v4657_v8, %v3763_v6  ;;  %v5051_v26 = vld [vmem:[#allocation10_spill] sm:$0xff] }
 0xac2   :  { %v2399_v11 = vadd.f32 %v2398_v24, %v2381_v9  ;;  %v2488_v28 = vmul.f32 %v5047_v41, %v2483_v33  ;;  %v2534_v14 = vadd.f32 %v2533_v38, %v2528_v25  ;;  %v2587_v0 = vrot.slane %v4657_v8, %v3765_v3  ;;  %v5050_v9 = vld [vmem:[#allocation9_spill] sm:$0xff] }
 0xac3   :  { %v2501_v39 = vsel %vm2499_vm3, %v2498_v37, %v2500_v27  ;;  %v2605_v6 = vrot.slane %v4657_v8, %v3767_v62  ;;  %v2623_v3 = vrot.slane %v4657_v8, %v3769_v50  ;;  %v2641_v62 = vrot.slane %v4657_v8, %v3771_v56 }
 0xac4   :  { %v2417_v51 = vadd.f32 %v2416_v10, %v2399_v11  ;;  %v2506_v63 = vmul.f32 %v5048_v35, %v2501_v39  ;;  %v2536_v44 = vmul.f32 0.2, %v2534_v14  ;;  %vm2535_vm5 = vcmp.gt.f32.partialorder %v2534_v14, 0.0 }
 0xac5   :  { %v2588_v17 = vadd.f32 %v2587_v0, %v2582_v7  ;;  %v2659_v50 = vrot.slane %v4657_v8, %v3773_v1  ;;  %v2695_v27 = vrot.slane %v4657_v8, %v3777_v47  ;;  %v2677_v41 = vrot.slane %v4657_v8, %v3775_v48 }
 0xac6   :  { %v2435_v49 = vadd.f32 %v2434_v30, %v2417_v51  ;;  %v2537_v31 = vsel %vm2535_vm5, %v2534_v14, %v2536_v44 }
 0xac7   :  { %v2510_v12 = vpop.permute.xlu1 %2509  ;;  %v2542_v24 = vmul.f32 %v5050_v9, %v2537_v31  ;;  %v2590_v10 = vmul.f32 0.2, %v2588_v17  ;;  %vm2589_vm0 = vcmp.gt.f32.partialorder %v2588_v17, 0.0 }
 0xac8   :  { %v2453_v42 = vadd.f32 %v2452_v34, %v2435_v49  ;;  %v2516_v15 = vadd.f32 %v2515_v46, %v2510_v12  ;;  %v2636_v49 = vpop.permute.xlu0 %2635 }
 0xac9   :  { %v2591_v59 = vsel %vm2589_vm0, %v2588_v17, %v2590_v10 }
 0xaca   :  { %v2471_v21 = vadd.f32 %v2470_v4, %v2453_v42  ;;  %v2518_v16 = vmul.f32 0.2, %v2516_v15  ;;  %vm2517_vm4 = vcmp.gt.f32.partialorder %v2516_v15, 0.0  ;;  %v2642_v4 = vadd.f32 %v2641_v62, %v2636_v49 }
 0xacc   :  { %v2546_v32 = vpop.permute.xlu1 %2545  ;;  %v2489_v58 = vadd.f32 %v2488_v28, %v2471_v21  ;;  %v2519_v45 = vsel %vm2517_vm4, %v2516_v15, %v2518_v16  ;;  %v5053_v15 = vld [vmem:[#allocation14_spill] sm:$0xff]  ;;  %v5054_v16 = vld [vmem:[#allocation11_spill] sm:$0xff]  ;;  %v2690_v39 = vpop.permute.xlu0 %2689  ;;  %vm2643_vm12 = vcmp.gt.f32.partialorder %v2642_v4, 0.0 }
 0xacd   :  { %v2552_v13 = vadd.f32 %v2551_v53, %v2546_v32  ;;  %v2524_v55 = vmul.f32 %v5049_v23, %v2519_v45  ;;  %v2596_v33 = vmul.f32 %v5053_v15, %v2591_v59  ;;  %v2644_v32 = vmul.f32 0.2, %v2642_v4  ;;  %v5055_v53 = vld [vmem:[#allocation16_spill] sm:$0xff] }
 0xace   :  { %v2507_v22 = vadd.f32 %v2506_v63, %v2489_v58  ;;  %v2696_v1 = vadd.f32 %v2695_v27, %v2690_v39 }
 0xacf   :  { %v2554_v19 = vmul.f32 0.2, %v2552_v13  ;;  %vm2553_vm6 = vcmp.gt.f32.partialorder %v2552_v13, 0.0  ;;  %v2645_v47 = vsel %vm2643_vm12, %v2642_v4, %v2644_v32 }
 0xad0   :  { %v2525_v5 = vadd.f32 %v2524_v55, %v2507_v22  ;;  %vm2697_vm1 = vcmp.gt.f32.partialorder %v2696_v1, 0.0  ;;  %v5056_v22 = vld [vmem:[#allocation12_spill] sm:$0xff] }
 0xad1   :  { %v2564_v61 = vpop.permute.xlu1 %2563  ;;  %v2555_v36 = vsel %vm2553_vm6, %v2552_v13, %v2554_v19  ;;  %v2650_v48 = vmul.f32 %v5056_v22, %v2645_v47 }
 0xad2   :  { %v2570_v43 = vadd.f32 %v2569_v57, %v2564_v61  ;;  %v2543_v52 = vadd.f32 %v2542_v24, %v2525_v5  ;;  %v2560_v11 = vmul.f32 %v5051_v26, %v2555_v36  ;;  %v2698_v57 = vmul.f32 0.2, %v2696_v1 }
 0xad4   :  { %v2572_v54 = vmul.f32 0.2, %v2570_v43  ;;  %vm2571_vm7 = vcmp.gt.f32.partialorder %v2570_v43, 0.0  ;;  %v2561_v18 = vadd.f32 %v2560_v11, %v2543_v52  ;;  %v2699_v55 = vsel %vm2697_vm1, %v2696_v1, %v2698_v57  ;;  %v5058_v52 = vld [vmem:[#allocation7_spill] sm:$0xff] }
 0xad6   :  { %v2600_v29 = vpop.permute.xlu1 %2599  ;;  %v2573_v40 = vsel %vm2571_vm7, %v2570_v43, %v2572_v54  ;;  %v2702_v43 = vpop.permute.xlu0 %2701 }
 0xad7   :  { %v2606_v2 = vadd.f32 %v2605_v6, %v2600_v29  ;;  %v2578_v46 = vmul.f32 %v5052_v20, %v2573_v40  ;;  %v2704_v7 = vmul.f32 %v2702_v43, %v2699_v55  ;;  %v2881_v20 = vld [vmem:[%s5059_s9] ss:$0 sm:$0xff] }
 0xad9   :  { %v2608_v30 = vmul.f32 0.2, %v2606_v2  ;;  %vm2607_vm8 = vcmp.gt.f32.partialorder %v2606_v2, 0.0  ;;  %v2579_v34 = vadd.f32 %v2578_v46, %v2561_v18  ;;  %v2884_v18 = vld [vmem:[%s5061_s16] ss:$0 sm:$0xff] }
 0xadb   :  { %v2618_v60 = vpop.permute.xlu1 %2617  ;;  %v2609_v42 = vsel %vm2607_vm8, %v2606_v2, %v2608_v30  ;;  %v2597_v21 = vadd.f32 %v2596_v33, %v2579_v34 }
 0xadc   :  { %v2624_v51 = vadd.f32 %v2623_v3, %v2618_v60  ;;  %v2614_v25 = vmul.f32 %v5054_v16, %v2609_v42  ;;  %v2885_v16 = vld [vmem:[%s5062_s18] ss:$0 sm:$0xff] }
 0xade   :  { %v2626_v37 = vmul.f32 0.2, %v2624_v51  ;;  %vm2625_vm9 = vcmp.gt.f32.partialorder %v2624_v51, 0.0  ;;  %v2615_v13 = vadd.f32 %v2614_v25, %v2597_v21 }
 0xae0   :  { %v2654_v12 = vpop.permute.xlu1 %2653  ;;  %v2627_v38 = vsel %vm2625_vm9, %v2624_v51, %v2626_v37  ;;  %v2883_v51 = vld [vmem:[%s5060_s13] ss:$0 sm:$0xff] }
 0xae1   :  { %v2660_v56 = vadd.f32 %v2659_v50, %v2654_v12  ;;  %v2632_v14 = vmul.f32 %v5055_v53, %v2627_v38 }
 0xae3   :  { %v2662_v58 = vmul.f32 0.2, %v2660_v56  ;;  %vm2661_vm13 = vcmp.gt.f32.partialorder %v2660_v56, 0.0  ;;  %v2633_v63 = vadd.f32 %v2632_v14, %v2615_v13 }
 0xae5   :  { %v2672_v28 = vpop.permute.xlu1 %2671  ;;  %v2663_v61 = vsel %vm2661_vm13, %v2660_v56, %v2662_v58  ;;  %v2651_v23 = vadd.f32 %v2650_v48, %v2633_v63 }
 0xae6   :  { %v2678_v45 = vadd.f32 %v2677_v41, %v2672_v28  ;;  %v2886_v41 = vld [vmem:[%s5063_s21] ss:$0 sm:$0xff] }
 0xae8   :  { %v2680_v44 = vmul.f32 0.2, %v2678_v45  ;;  %vm2679_vm15 = vcmp.gt.f32.partialorder %v2678_v45, 0.0 }
 0xaea   :  { %v2666_v35 = vpop.permute.xlu1 %2665  ;;  %v2681_v19 = vsel %vm2679_vm15, %v2678_v45, %v2680_v44 }
 0xaeb   :  { %v2668_v8 = vmul.f32 %v2666_v35, %v2663_v61 }
 0xaed   :  { %v2669_v31 = vadd.f32 %v2668_v8, %v2651_v23 }
 0xaef   :  { %v2684_v0 = vpop.permute.xlu1 %2683 }
 0xaf0   :  { %v2686_v54 = vmul.f32 %v2684_v0, %v2681_v19 }
 0xaf2   :  { %v2687_v5 = vadd.f32 %v2686_v54, %v2669_v31 }
 0xaf4   :  { %v2705_v29 = vadd.f32 %v2704_v7, %v2687_v5 }
 0xaf6   :  { %v2706_v6 = vsel %vm343_vm10, %v2705_v29, -1e+30 }
 0xaf7   :  { %v2707_v17 = vsel %vm345_vm11, %v2706_v6, -inf }
 0xaf8   :  { %2708 = vmax.xlane.f32.xlu1 %v2707_v17 }
 0xb85   :  { %v2709_v9 = vpop.xlane.xlu1 %2708 }
 0xb86   :  { %v2710_v24 = vsub.f32 %v2706_v6, %v2709_v9 }
 0xb88   :  { %v2711_v40 = vmul.f32 1.442695, %v2710_v24 }
 0xb8a   :  { %3311 = vpow2.f32 %v2711_v40 }
 0xb94   :  { %v3312_v2 = vpop.eup %3311 }
 0xb95   :  { %v2713_v26 = vmul.f32 %v5058_v52, %v3312_v2 }
 0xb97   :  { %v2714_v11 = vsel %vm345_vm11, %v2713_v26, 0.0 }
 0xb98   :  { %2715 = vadd.xlane.f32.xlu0 %v2714_v11 }
 0xc25   :  { %v2716_v3 = vpop.xlane.xlu0 %2715 }
 0xc26   :  { %3313 = vrcp.f32 %v2716_v3 }
 0xc30   :  { %v3314_v10 = vpop.eup %3313 }
 0xc31   :  { %v2718_v60 = vmul.f32 %v3314_v10, %v2713_v26 }
 0xc33   :  { %2969 = vmatmul.mubr.msk.f32.vlgmr.msra.gmra.mrb[6].mxu0 %vm345_vm11, %v2718_v60 }
 0xd06   :  { %v2794_v46 = vpop.f32.mrb[6].mxu0 }
 0xd07   :  { %v2795_v30 = vadd.f32 %v2881_v20, %v2794_v46  ;;  %v2970_v62 = vpop.f32.mrb[7].mxu0 }
 0xd09   :  { %v2806_v59 = vmul.f32 %v2883_v51, %v2795_v30 }
 0xd0b   :  { %v2813_v37 = vadd.f32 %v2884_v18, %v2806_v59 }
 0xd0d   :  { %vm2814_vm10 = vcmp.gt.f32.partialorder %v2813_v37, 0.0  ;;  %v2815_v49 = vmul.f32 0.2, %v2813_v37 }
 0xd0f   :  { %v2816_v34 = vsel %vm2814_vm10, %v2813_v37, %v2815_v49 }
 0xd10   :  { %v2817_v12 = vsel %vm1206_vm14, %v2816_v34, 0.0 }
 0xd11   :  { %2818 = vadd.xlane.f32.xlu1 %v2817_v12 }
 0xd9e   :  { %v2819_v42 = vpop.xlane.xlu1 %2818 }
 0xd9f   :  { %v2821_v50 = vmul.f32 0.03125, %v2819_v42 }
 0xda1   :  { %v2822_v4 = vsub.f32 %v2816_v34, %v2821_v50 }
 0xda3   :  { %v2823_v15 = vmul.f32 %v2822_v4, %v2822_v4 }
 0xda5   :  { %v2824_v33 = vsel %vm1206_vm14, %v2823_v15, 0.0 }
 0xda6   :  { %2825 = vadd.xlane.f32.xlu0 %v2824_v33 }
 0xe33   :  { %v2826_v27 = vpop.xlane.xlu0 %2825 }
 0xe34   :  { %v2827_v38 = vmul.f32 0.03125, %v2826_v27 }
 0xe36   :  { %v2828_v56 = vadd.f32 1e-05, %v2827_v38 }
 0xe38   :  { %3315 = vrsqrt.f32 %v2828_v56 }
 0xe42   :  { %v3316_v21 = vpop.eup %3315 }
 0xe43   :  { %v2830_v25 = vmul.f32 %v3316_v21, %v2822_v4 }
 0xe45   :  { %v2838_v28 = vmul.f32 %v2885_v16, %v2830_v25 }
 0xe47   :  { %v2846_v32 = vadd.f32 %v2886_v41, %v2838_v28 }
 0xe49   :  { %2847 = vst.msk [vmem:[#allocation2] sm:$0xff] %vm1206_vm14, %v2846_v32 }
 0xe4a   :  { %3329 = shalt.err (!%p3326_p4)
}
 0xe4b   :  { %s5064_s25 = sld [smem:[#allocation37_spill]] }
 0xe51   :  { %s3330_s26 = scalar_lea.hbm %s5064_s25, 128 }
 0xe52   :  { %p3331_p5 = scmp.ne.s32.totalorder %s5064_s25, %s3330_s26  ;;  %p3334_p6 = scmp.lt.u32.totalorder %s3330_s26, %s5064_s25 }
 0xe54   :  { %p3336_p7 = pnand %p3334_p6, %p3331_p5 }
 0xe56   :  { %3339 = shalt.err (!%p3336_p7)
}
 0xe57   :  { %2857 = dma.vmem_to_hbm [thread:$0]  %s2855_s1, 128, %s5064_s25, [#allocation3]  }
 0xe58   :  { %3340 = dma.done.wait [#allocation3], 128  }
 0xe59   :  { %3341 = vsyncadd [#allocation3], 4294967168 }
 0xe5a   :  { %2861 = vsyncpa [#allocation3], 1 }

</bundles_post_ra>
